<compile_context>
chip_gen: v7x
topology: tpu7x:2x2x1
jax: 0.10.0
libtpu: 0.0.40
codegen_flags: <defaults>
</compile_context>

<pallas_src>
import functools

import numpy as np
import jax
import jax.numpy as jnp
from jax.experimental import pallas as pl
from jax.experimental.pallas import tpu as pltpu

_LANE = 128                       # hidden/class dims padded to this lane width
_VMEM_CAP = 48 * 1024 * 1024      # leave headroom below v7x's 64 MiB physical


def _round_up(x, m):
    return (x + m - 1) // m * m


def _vmem_limit(resident_bytes):
    return int(min(max(2 * resident_bytes, 8 * 1024 * 1024), _VMEM_CAP))


def _choose_tiles(n, tm_max=512):
    """Pick (n_pad, tm, tk) with n_pad % tm == 0, n_pad % tk == 0, all %128."""
    n_pad = _round_up(n, _LANE)
    tm = min(tm_max, n_pad)
    if tm >= 512:
        tm = 512
    elif tm >= 256:
        tm = 256
    else:
        tm = 128
    n_pad = _round_up(n_pad, tm)
    tk = 256 if n_pad % 256 == 0 else 128
    return n_pad, tm, tk


# ---------------------------------------------------------------------------
# Kernel 1: row-tiled feature transform  Y_tile = X_tile @ W1  (bf16 out)
# ---------------------------------------------------------------------------
def _linear_kernel(x_ref, w_ref, y_ref):
    y_ref[...] = jnp.dot(x_ref[...], w_ref[...],
                         preferred_element_type=jnp.float32).astype(y_ref.dtype)


def _linear(x, w, *, tm):
    n_pad, f_pad = x.shape
    h_pad = w.shape[1]
    resident = (2 * tm * f_pad * 2      # X row tiles (double-buffered)
                + 2 * f_pad * h_pad * 2  # resident W1
                + 2 * tm * h_pad * 2)    # out tiles
    return pl.pallas_call(
        _linear_kernel,
        out_shape=jax.ShapeDtypeStruct((n_pad, h_pad), jnp.bfloat16),
        grid_spec=pltpu.PrefetchScalarGridSpec(
            num_scalar_prefetch=0,
            grid=(n_pad // tm,),
            in_specs=[pl.BlockSpec((tm, f_pad), lambda i: (i, 0)),
                      pl.BlockSpec((f_pad, h_pad), lambda i: (0, 0))],
            out_specs=pl.BlockSpec((tm, h_pad), lambda i: (i, 0)),
        ),
        compiler_params=pltpu.CompilerParams(
            dimension_semantics=("parallel",),
            vmem_limit_bytes=_vmem_limit(resident)),
        cost_estimate=pl.CostEstimate(
            flops=2 * n_pad * f_pad * h_pad,
            transcendentals=0,
            bytes_accessed=x.size * 2 + w.size * 2 + n_pad * h_pad * 2),
    )(x, w)


# ---------------------------------------------------------------------------
# Kernel 2 (fused): HW_tile = relu( sum_k A[i,k] @ XW[k] + b1 ) @ W2
# Block-sparse K axis driven by the scalar-prefetched nonzero-block table.
# XW stays fully resident in VMEM and is sliced dynamically per K block.
# ---------------------------------------------------------------------------
def _agg_project_kernel(idx_ref, cnt_ref, a_ref, xw_ref, b1_ref, w2_ref,
                        hw_ref, acc_ref, *, tk):
    i = pl.program_id(0)
    j = pl.program_id(1)

    @pl.when(j == 0)
    def _():
        acc_ref[...] = jnp.zeros_like(acc_ref)

    @pl.when(j < cnt_ref[i])                    # skip padded (all-zero) blocks
    def _():
        off = pl.multiple_of(idx_ref[i, j] * tk, tk)
        acc_ref[...] += jnp.dot(a_ref[...], xw_ref[pl.ds(off, tk), :],
                                preferred_element_type=jnp.float32)

    @pl.when(j == pl.num_programs(1) - 1)
    def _():
        h1 = jnp.maximum(acc_ref[...] + b1_ref[...], 0.0)
        hw_ref[...] = jnp.dot(h1.astype(w2_ref.dtype), w2_ref[...],
                              preferred_element_type=jnp.float32
                              ).astype(hw_ref.dtype)


def _agg_project(blk_idx, blk_cnt, a, xw, b1, w2, *, tm, tk):
    n_pad = a.shape[0]
    h_pad = xw.shape[1]
    c_pad = w2.shape[1]
    nrt = n_pad // tm
    max_blocks = blk_idx.shape[1]
    resident = (2 * tm * tk * 2           # A blocks (double-buffered)
                + 2 * n_pad * h_pad * 2   # resident XW
                + 2 * h_pad * c_pad * 2   # resident W2
                + 2 * h_pad * 4           # bias
                + 2 * tm * c_pad * 2      # out tiles
                + tm * h_pad * 4)         # f32 accumulator scratch
    kernel = functools.partial(_agg_project_kernel, tk=tk)
    return pl.pallas_call(
        kernel,
        out_shape=jax.ShapeDtypeStruct((n_pad, c_pad), jnp.bfloat16),
        grid_spec=pltpu.PrefetchScalarGridSpec(
            num_scalar_prefetch=2,
            grid=(nrt, max_blocks),
            in_specs=[
                pl.BlockSpec((tm, tk), lambda i, j, idx, cnt: (i, idx[i, j])),
                pl.BlockSpec((n_pad, h_pad), lambda i, j, idx, cnt: (0, 0)),
                pl.BlockSpec((1, h_pad), lambda i, j, idx, cnt: (0, 0)),
                pl.BlockSpec((h_pad, c_pad), lambda i, j, idx, cnt: (0, 0)),
            ],
            out_specs=pl.BlockSpec((tm, c_pad), lambda i, j, idx, cnt: (i, 0)),
            scratch_shapes=[pltpu.VMEM((tm, h_pad), jnp.float32)],
        ),
        compiler_params=pltpu.CompilerParams(
            dimension_semantics=("parallel", "arbitrary"),
            vmem_limit_bytes=_vmem_limit(resident)),
        cost_estimate=pl.CostEstimate(
            flops=2 * nrt * max_blocks * tm * tk * h_pad
            + 2 * n_pad * h_pad * c_pad,
            transcendentals=0,
            bytes_accessed=nrt * max_blocks * tm * tk * 2
            + xw.size * 2 + w2.size * 2 + n_pad * c_pad * 2),
    )(blk_idx, blk_cnt, a, xw, b1, w2)


# ---------------------------------------------------------------------------
# Kernel 3: out_tile = log_softmax( sum_k A[i,k] @ HW[k] + b2 )
# Padded class lanes of b2 carry -1e30, so a plain full-128-lane log_softmax
# is exact over the valid classes (f32 output, so -1e30 is representable).
# ---------------------------------------------------------------------------
def _agg_softmax_kernel(idx_ref, cnt_ref, a_ref, hw_ref, b2_ref,
                        o_ref, acc_ref, *, tk):
    i = pl.program_id(0)
    j = pl.program_id(1)

    @pl.when(j == 0)
    def _():
        acc_ref[...] = jnp.zeros_like(acc_ref)

    @pl.when(j < cnt_ref[i])
    def _():
        off = pl.multiple_of(idx_ref[i, j] * tk, tk)
        acc_ref[...] += jnp.dot(a_ref[...], hw_ref[pl.ds(off, tk), :],
                                preferred_element_type=jnp.float32)

    @pl.when(j == pl.num_programs(1) - 1)
    def _():
        z = acc_ref[...] + b2_ref[...]
        z = z - jnp.max(z, axis=1, keepdims=True)
        o_ref[...] = (z - jnp.log(jnp.sum(jnp.exp(z), axis=1, keepdims=True))
                      ).astype(o_ref.dtype)


def _agg_softmax(blk_idx, blk_cnt, a, hw, b2, *, tm, tk):
    n_pad = a.shape[0]
    c_pad = hw.shape[1]
    nrt = n_pad // tm
    max_blocks = blk_idx.shape[1]
    resident = (2 * tm * tk * 2
                + 2 * n_pad * c_pad * 2
                + 2 * c_pad * 4
                + 2 * tm * c_pad * 4
                + tm * c_pad * 4)
    kernel = functools.partial(_agg_softmax_kernel, tk=tk)
    return pl.pallas_call(
        kernel,
        out_shape=jax.ShapeDtypeStruct((n_pad, c_pad), jnp.float32),
        grid_spec=pltpu.PrefetchScalarGridSpec(
            num_scalar_prefetch=2,
            grid=(nrt, max_blocks),
            in_specs=[
                pl.BlockSpec((tm, tk), lambda i, j, idx, cnt: (i, idx[i, j])),
                pl.BlockSpec((n_pad, c_pad), lambda i, j, idx, cnt: (0, 0)),
                pl.BlockSpec((1, c_pad), lambda i, j, idx, cnt: (0, 0)),
            ],
            out_specs=pl.BlockSpec((tm, c_pad), lambda i, j, idx, cnt: (i, 0)),
            scratch_shapes=[pltpu.VMEM((tm, c_pad), jnp.float32)],
        ),
        compiler_params=pltpu.CompilerParams(
            dimension_semantics=("parallel", "arbitrary"),
            vmem_limit_bytes=_vmem_limit(resident)),
        cost_estimate=pl.CostEstimate(
            flops=2 * nrt * max_blocks * tm * tk * c_pad,
            transcendentals=n_pad * c_pad,
            bytes_accessed=nrt * max_blocks * tm * tk * 2
            + hw.size * 2 + n_pad * c_pad * 4),
    )(blk_idx, blk_cnt, a, hw, b2)


# ---------------------------------------------------------------------------
# Forward on pre-padded operands (all hot-path work in Pallas kernels).
# ---------------------------------------------------------------------------
@functools.partial(jax.jit, static_argnames=("tm", "tk"))
def gcn_cora_forward_padded(a_hat, x, w1, b1, w2, b2, blk_idx, blk_cnt,
                            *, tm, tk):
    xw = _linear(x, w1, tm=tm)                                  # (Np,128) bf16
    # Fused layer 1: HW = relu(A_hat @ XW + b1) @ W2.
    # TODO(synk): dropout between layers is identity in eval mode; training
    # dropout would use pltpu.prng_seed + pltpu.prng_random_bits in-kernel.
    hw = _agg_project(blk_idx, blk_cnt, a_hat, xw, b1, w2, tm=tm, tk=tk)
    # Layer 2: out = log_softmax(A_hat @ HW + b2).
    return _agg_softmax(blk_idx, blk_cnt, a_hat, hw, b2, tm=tm, tk=tk)


# ---------------------------------------------------------------------------
# One-time preprocessing (hoisted out of the forward path).
# ---------------------------------------------------------------------------
def build_norm_adj(edge_index, num_nodes):
    src, dst = edge_index[0], edge_index[1]
    a = jnp.zeros((num_nodes, num_nodes), jnp.float32)
    a = a.at[dst, src].set(1.0)                  # message flows src -> dst
    idx = jnp.arange(num_nodes)
    a = a.at[idx, idx].set(1.0)                  # self loops
    deg = jnp.sum(a, axis=1)
    d = jnp.where(deg > 0, 1.0 / jnp.sqrt(deg), 0.0)
    return d[:, None] * a * d[None, :]


def _build_block_table(a_np, tm, tk):
    """Per row tile, list of column blocks of A with any nonzero entry."""
    n_pad = a_np.shape[0]
    nrt, nkb = n_pad // tm, n_pad // tk
    occ = np.abs(a_np).reshape(nrt, tm, nkb, tk).sum(axis=(1, 3)) > 0
    counts = occ.sum(axis=1).astype(np.int32)
    max_blocks = max(int(counts.max()), 1)
    idx = np.zeros((nrt, max_blocks), np.int32)
    for r in range(nrt):
        nz = np.nonzero(occ[r])[0].astype(np.int32)
        if nz.size:
            idx[r, :nz.size] = nz
            idx[r, nz.size:] = nz[-1]   # repeat last valid block -> no re-DMA
    return idx, counts


def prepare_inputs(x, edge_index, w1, b1, w2, b2, *, tm_max=512):
    n, f = x.shape
    h = w1.shape[1]
    c = w2.shape[1]
    n_pad, tm, tk = _choose_tiles(n, tm_max)
    f_pad = _round_up(f, _LANE)
    h_pad = _round_up(h, _LANE)
    c_pad = _round_up(c, _LANE)

    a_np = np.zeros((n_pad, n_pad), np.float32)
    a_np[:n, :n] = np.asarray(build_norm_adj(edge_index, n))
    blk_idx, blk_cnt = _build_block_table(a_np, tm, tk)

    a_pad = jnp.asarray(a_np, dtype=jnp.bfloat16)
    x_pad = jnp.zeros((n_pad, f_pad), jnp.bfloat16)
    x_pad = x_pad.at[:n, :f].set(x.astype(jnp.bfloat16))
    w1_pad = jnp.zeros((f_pad, h_pad), jnp.bfloat16)
    w1_pad = w1_pad.at[:f, :h].set(w1.astype(jnp.bfloat16))
    w2_pad = jnp.zeros((h_pad, c_pad), jnp.bfloat16)
    w2_pad = w2_pad.at[:h, :c].set(w2.astype(jnp.bfloat16))
    b1_pad = jnp.zeros((1, h_pad), jnp.float32).at[0, :h].set(b1)
    # Padded class lanes get a huge negative bias so the in-kernel full-lane
    # log_softmax ignores them (exp(-1e30) == 0). Output stays f32.
    b2_pad = jnp.full((1, c_pad), -1e30, jnp.float32).at[0, :c].set(b2)
    return (a_pad, x_pad, w1_pad, b1_pad, w2_pad, b2_pad,
            jnp.asarray(blk_idx), jnp.asarray(blk_cnt), tm, tk)


# ---------------------------------------------------------------------------
# Parameter init (deterministic Glorot-uniform weights, zero bias like PyG).
# ---------------------------------------------------------------------------
def init_params(key, num_in_features, num_hidden, num_classes):
    k1, k2 = jax.random.split(key)

    def glorot(k, fan_in, fan_out):
        lim = jnp.sqrt(6.0 / (fan_in + fan_out))
        return jax.random.uniform(k, (fan_in, fan_out), jnp.float32, -lim, lim)

    w1 = glorot(k1, num_in_features, num_hidden)
    b1 = jnp.zeros((num_hidden,), jnp.float32)
    w2 = glorot(k2, num_hidden, num_classes)
    b2 = jnp.zeros((num_classes,), jnp.float32)
    return w1, b1, w2, b2


if __name__ == "__main__":
    # Small shapes consistent with GCN_CORA (scaled down from 2708/1433/16/7).
    NUM_NODES = 300
    NUM_IN_FEATURES = 128
    NUM_HIDDEN = 16
    NUM_CLASSES = 7
    NUM_EDGES = 1200

    key = jax.random.PRNGKey(0)
    kx, ke, kp = jax.random.split(key, 3)

    x = jax.random.normal(kx, (NUM_NODES, NUM_IN_FEATURES), jnp.float32)
    edge_index = jax.random.randint(ke, (2, NUM_EDGES), 0, NUM_NODES, jnp.int32)
    w1, b1, w2, b2 = init_params(kp, NUM_IN_FEATURES, NUM_HIDDEN, NUM_CLASSES)

    # One-time graph / parameter preprocessing (hoisted out of the hot path).
    (a_pad, x_pad, w1_p, b1_p, w2_p, b2_p,
     blk_idx, blk_cnt, tm, tk) = prepare_inputs(x, edge_index, w1, b1, w2, b2)
    jax.block_until_ready((a_pad, x_pad, w1_p, b1_p, w2_p, b2_p,
                           blk_idx, blk_cnt))

    out_pad = gcn_cora_forward_padded(a_pad, x_pad, w1_p, b1_p, w2_p, b2_p,
                                      blk_idx, blk_cnt, tm=tm, tk=tk)
    out_pad = jax.block_until_ready(out_pad)
    out = out_pad[:NUM_NODES, :NUM_CLASSES]

    # Pure-JAX f32 reference for the same forward semantics.
    a_ref = build_norm_adj(edge_index, NUM_NODES)
    h1_ref = jnp.maximum(a_ref @ (x @ w1) + b1, 0.0)
    h2_ref = a_ref @ (h1_ref @ w2) + b2
    ref = jax.nn.log_softmax(h2_ref, axis=1)

    assert out.shape == (NUM_NODES, NUM_CLASSES)
    assert bool(jnp.all(jnp.isfinite(out)))
    assert bool(jnp.allclose(jnp.sum(jnp.exp(out), axis=1), 1.0, atol=1e-3))
    max_err = float(jnp.max(jnp.abs(out - ref)))
    assert max_err < 0.15, f"max abs error {max_err}"  # bf16 operands, f32 acc

    print("KERNEL_OK")
</pallas_src>

<mosaic_0001>
module attributes {stable_mosaic.version = 11 : i64} {
  func.func @_linear_kernel(%arg0: i32, %arg1: memref<256x128xbf16, #tpu.memory_space<vmem>>, %arg2: memref<128x128xbf16, #tpu.memory_space<vmem>>, %arg3: memref<256x128xbf16, #tpu.memory_space<vmem>>) attributes {dimension_semantics = [#tpu.dimension_semantics<parallel>], iteration_bounds = array<i64: 2>, scalar_prefetch = 0 : i64, scratch_operands = 0 : i64, tpu.core_type = #tpu.core_type<tc>, window_params = [{transform_indices = @transform_0, window_bounds = array<i64: 256, 128>}, {pipeline_mode = #tpu.pipeline_mode<synchronous>, transform_indices = @transform_1, window_bounds = array<i64: 128, 128>}, {transform_indices = @transform_2, window_bounds = array<i64: 256, 128>}]} {
    %c0 = arith.constant 0 : index
    %c0_0 = arith.constant 0 : index
    %0 = vector.load %arg1[%c0, %c0_0] : memref<256x128xbf16, #tpu.memory_space<vmem>>, vector<256x128xbf16>
    %c0_1 = arith.constant 0 : index
    %c0_2 = arith.constant 0 : index
    %1 = vector.load %arg2[%c0_1, %c0_2] : memref<128x128xbf16, #tpu.memory_space<vmem>>, vector<128x128xbf16>
    %cst = arith.constant dense<0.000000e+00> : vector<256x128xf32>
    %2 = tpu.matmul %0, %1, %cst {dimension_numbers = #tpu.dot_dimension_numbers<[1], [0], [0], [1], [0, 0, 1, 1], [], []>} : vector<256x128xbf16>, vector<128x128xbf16>, vector<256x128xf32> -> vector<256x128xf32>
    %3 = arith.truncf %2 : vector<256x128xf32> to vector<256x128xbf16>
    %c0_3 = arith.constant 0 : index
    %c0_4 = arith.constant 0 : index
    %4 = vector.load %arg3[%c0_3, %c0_4] : memref<256x128xbf16, #tpu.memory_space<vmem>>, vector<256x128xbf16>
    tpu.vector_store %arg3[%c0_3, %c0_4], %3 {strides = array<i32>} : memref<256x128xbf16, #tpu.memory_space<vmem>>, vector<256x128xbf16>,
    return
  }
  func.func @transform_0(%arg0: i32) -> (i32, i32) {
    %c0_i32 = arith.constant 0 : i32
    %c0_i32_0 = arith.constant 0 : i32
    return %arg0, %c0_i32 : i32, i32
  }
  func.func @transform_1(%arg0: i32) -> (i32, i32) {
    %c0_i32 = arith.constant 0 : i32
    %c0_i32_0 = arith.constant 0 : i32
    %c0_i32_1 = arith.constant 0 : i32
    return %c0_i32, %c0_i32_0 : i32, i32
  }
  func.func @transform_2(%arg0: i32) -> (i32, i32) {
    %c0_i32 = arith.constant 0 : i32
    %c0_i32_0 = arith.constant 0 : i32
    return %arg0, %c0_i32 : i32, i32
  }
}

module attributes {stable_mosaic.version = 11 : i64} {
  func.func @_agg_project_kernel(%arg0: i32, %arg1: i32, %arg2: memref<2x2xi32, #tpu.memory_space<smem>>, %arg3: memref<2xi32, #tpu.memory_space<smem>>, %arg4: memref<256x256xbf16, #tpu.memory_space<vmem>>, %arg5: memref<512x128xbf16, #tpu.memory_space<vmem>>, %arg6: memref<1x128xf32, #tpu.memory_space<vmem>>, %arg7: memref<128x128xbf16, #tpu.memory_space<vmem>>, %arg8: memref<256x128xbf16, #tpu.memory_space<vmem>>, %arg9: memref<256x128xf32, #tpu.memory_space<vmem>>) attributes {dimension_semantics = [#tpu.dimension_semantics<parallel>, #tpu.dimension_semantics<arbitrary>], iteration_bounds = array<i64: 2, 2>, scalar_prefetch = 2 : i64, scratch_operands = 1 : i64, tpu.core_type = #tpu.core_type<tc>, window_params = [{transform_indices = @transform_0, window_bounds = array<i64: 256, 256>}, {pipeline_mode = #tpu.pipeline_mode<synchronous>, transform_indices = @transform_1, window_bounds = array<i64: 512, 128>}, {pipeline_mode = #tpu.pipeline_mode<synchronous>, transform_indices = @transform_2, window_bounds = array<i64: 1, 128>}, {pipeline_mode = #tpu.pipeline_mode<synchronous>, transform_indices = @transform_3, window_bounds = array<i64: 128, 128>}, {transform_indices = @transform_4, window_bounds = array<i64: 256, 128>}]} {
    %c0_i32 = arith.constant 0 : i32
    %0 = arith.cmpi eq, %arg1, %c0_i32 : i32
    %1 = arith.extui %0 : i1 to i32
    %c0_i32_0 = arith.constant 0 : i32
    %2 = arith.cmpi ne, %1, %c0_i32_0 : i32
    scf.if %2 {
      %cst = arith.constant 0.000000e+00 : f32
      %11 = vector.broadcast %cst : f32 to vector<256x128xf32>
      %c0 = arith.constant 0 : index
      %c0_3 = arith.constant 0 : index
      %12 = vector.load %arg9[%c0, %c0_3] : memref<256x128xf32, #tpu.memory_space<vmem>>, vector<256x128xf32>
      tpu.vector_store %arg9[%c0, %c0_3], %11 {strides = array<i32>} : memref<256x128xf32, #tpu.memory_space<vmem>>, vector<256x128xf32>,
    } else {
    }
    %3 = arith.index_cast %arg0 : i32 to index
    %4 = memref.load %arg3[%3] : memref<2xi32, #tpu.memory_space<smem>>
    %5 = arith.cmpi slt, %arg1, %4 : i32
    %6 = arith.extui %5 : i1 to i32
    %c0_i32_1 = arith.constant 0 : i32
    %7 = arith.cmpi ne, %6, %c0_i32_1 : i32
    scf.if %7 {
      %11 = arith.index_cast %arg0 : i32 to index
      %12 = arith.index_cast %arg1 : i32 to index
      %13 = memref.load %arg2[%11, %12] : memref<2x2xi32, #tpu.memory_space<smem>>
      %c256_i32 = arith.constant 256 : i32
      %14 = arith.muli %13, %c256_i32 : i32
      %15 = tpu.assume_multiple %14, 256 : i32
      %c0 = arith.constant 0 : index
      %c0_3 = arith.constant 0 : index
      %16 = vector.load %arg9[%c0, %c0_3] : memref<256x128xf32, #tpu.memory_space<vmem>>, vector<256x128xf32>
      %c0_4 = arith.constant 0 : index
      %c0_5 = arith.constant 0 : index
      %17 = vector.load %arg4[%c0_4, %c0_5] : memref<256x256xbf16, #tpu.memory_space<vmem>>, vector<256x256xbf16>
      %18 = arith.index_cast %15 : i32 to index
      %c0_6 = arith.constant 0 : index
      %19 = vector.load %arg5[%18, %c0_6] : memref<512x128xbf16, #tpu.memory_space<vmem>>, vector<256x128xbf16>
      %cst = arith.constant dense<0.000000e+00> : vector<256x128xf32>
      %20 = tpu.matmul %17, %19, %cst {dimension_numbers = #tpu.dot_dimension_numbers<[1], [0], [0], [1], [0, 0, 1, 1], [], []>} : vector<256x256xbf16>, vector<256x128xbf16>, vector<256x128xf32> -> vector<256x128xf32>
      %21 = arith.addf %16, %20 : vector<256x128xf32>
      %c0_7 = arith.constant 0 : index
      %c0_8 = arith.constant 0 : index
      %22 = vector.load %arg9[%c0_7, %c0_8] : memref<256x128xf32, #tpu.memory_space<vmem>>, vector<256x128xf32>
      tpu.vector_store %arg9[%c0_7, %c0_8], %21 {strides = array<i32>} : memref<256x128xf32, #tpu.memory_space<vmem>>, vector<256x128xf32>,
    } else {
    }
    %c1_i32 = arith.constant 1 : i32
    %8 = arith.cmpi eq, %arg1, %c1_i32 : i32
    %9 = arith.extui %8 : i1 to i32
    %c0_i32_2 = arith.constant 0 : i32
    %10 = arith.cmpi ne, %9, %c0_i32_2 : i32
    scf.if %10 {
      %c0 = arith.constant 0 : index
      %c0_3 = arith.constant 0 : index
      %11 = vector.load %arg9[%c0, %c0_3] : memref<256x128xf32, #tpu.memory_space<vmem>>, vector<256x128xf32>
      %c0_4 = arith.constant 0 : index
      %c0_5 = arith.constant 0 : index
      %12 = vector.load %arg6[%c0_4, %c0_5] : memref<1x128xf32, #tpu.memory_space<vmem>>, vector<1x128xf32>
      %13 = vector.broadcast %12 : vector<1x128xf32> to vector<256x128xf32>
      %14 = arith.addf %11, %13 : vector<256x128xf32>
      %cst = arith.constant 0.000000e+00 : f32
      %15 = vector.broadcast %cst : f32 to vector<256x128xf32>
      %16 = arith.maximumf %14, %15 : vector<256x128xf32>
      %17 = arith.truncf %16 : vector<256x128xf32> to vector<256x128xbf16>
      %c0_6 = arith.constant 0 : index
      %c0_7 = arith.constant 0 : index
      %18 = vector.load %arg7[%c0_6, %c0_7] : memref<128x128xbf16, #tpu.memory_space<vmem>>, vector<128x128xbf16>
      %cst_8 = arith.constant dense<0.000000e+00> : vector<256x128xf32>
      %19 = tpu.matmul %17, %18, %cst_8 {dimension_numbers = #tpu.dot_dimension_numbers<[1], [0], [0], [1], [0, 0, 1, 1], [], []>} : vector<256x128xbf16>, vector<128x128xbf16>, vector<256x128xf32> -> vector<256x128xf32>
      %20 = arith.truncf %19 : vector<256x128xf32> to vector<256x128xbf16>
      %c0_9 = arith.constant 0 : index
      %c0_10 = arith.constant 0 : index
      %21 = vector.load %arg8[%c0_9, %c0_10] : memref<256x128xbf16, #tpu.memory_space<vmem>>, vector<256x128xbf16>
      tpu.vector_store %arg8[%c0_9, %c0_10], %20 {strides = array<i32>} : memref<256x128xbf16, #tpu.memory_space<vmem>>, vector<256x128xbf16>,
    } else {
    }
    return
  }
  func.func @transform_0(%arg0: i32, %arg1: i32, %arg2: memref<2x2xi32, #tpu.memory_space<smem>>, %arg3: memref<2xi32, #tpu.memory_space<smem>>) -> (i32, i32) {
    %0 = arith.index_cast %arg0 : i32 to index
    %1 = arith.index_cast %arg1 : i32 to index
    %2 = memref.load %arg2[%0, %1] : memref<2x2xi32, #tpu.memory_space<smem>>
    %c0_i32 = arith.constant 0 : i32
    return %arg0, %2 : i32, i32
  }
  func.func @transform_1(%arg0: i32, %arg1: i32, %arg2: memref<2x2xi32, #tpu.memory_space<smem>>, %arg3: memref<2xi32, #tpu.memory_space<smem>>) -> (i32, i32) {
    %c0_i32 = arith.constant 0 : i32
    %c0_i32_0 = arith.constant 0 : i32
    %c0_i32_1 = arith.constant 0 : i32
    return %c0_i32, %c0_i32_0 : i32, i32
  }
  func.func @transform_2(%arg0: i32, %arg1: i32, %arg2: memref<2x2xi32, #tpu.memory_space<smem>>, %arg3: memref<2xi32, #tpu.memory_space<smem>>) -> (i32, i32) {
    %c0_i32 = arith.constant 0 : i32
    %c0_i32_0 = arith.constant 0 : i32
    %c0_i32_1 = arith.constant 0 : i32
    return %c0_i32, %c0_i32_0 : i32, i32
  }
  func.func @transform_3(%arg0: i32, %arg1: i32, %arg2: memref<2x2xi32, #tpu.memory_space<smem>>, %arg3: memref<2xi32, #tpu.memory_space<smem>>) -> (i32, i32) {
    %c0_i32 = arith.constant 0 : i32
    %c0_i32_0 = arith.constant 0 : i32
    %c0_i32_1 = arith.constant 0 : i32
    return %c0_i32, %c0_i32_0 : i32, i32
  }
  func.func @transform_4(%arg0: i32, %arg1: i32, %arg2: memref<2x2xi32, #tpu.memory_space<smem>>, %arg3: memref<2xi32, #tpu.memory_space<smem>>) -> (i32, i32) {
    %c0_i32 = arith.constant 0 : i32
    %c0_i32_0 = arith.constant 0 : i32
    return %arg0, %c0_i32 : i32, i32
  }
}

module attributes {stable_mosaic.version = 11 : i64} {
  func.func @_agg_softmax_kernel(%arg0: i32, %arg1: i32, %arg2: memref<2x2xi32, #tpu.memory_space<smem>>, %arg3: memref<2xi32, #tpu.memory_space<smem>>, %arg4: memref<256x256xbf16, #tpu.memory_space<vmem>>, %arg5: memref<512x128xbf16, #tpu.memory_space<vmem>>, %arg6: memref<1x128xf32, #tpu.memory_space<vmem>>, %arg7: memref<256x128xf32, #tpu.memory_space<vmem>>, %arg8: memref<256x128xf32, #tpu.memory_space<vmem>>) attributes {dimension_semantics = [#tpu.dimension_semantics<parallel>, #tpu.dimension_semantics<arbitrary>], iteration_bounds = array<i64: 2, 2>, scalar_prefetch = 2 : i64, scratch_operands = 1 : i64, tpu.core_type = #tpu.core_type<tc>, window_params = [{transform_indices = @transform_0, window_bounds = array<i64: 256, 256>}, {pipeline_mode = #tpu.pipeline_mode<synchronous>, transform_indices = @transform_1, window_bounds = array<i64: 512, 128>}, {pipeline_mode = #tpu.pipeline_mode<synchronous>, transform_indices = @transform_2, window_bounds = array<i64: 1, 128>}, {transform_indices = @transform_3, window_bounds = array<i64: 256, 128>}]} {
    %c0_i32 = arith.constant 0 : i32
    %0 = arith.cmpi eq, %arg1, %c0_i32 : i32
    %1 = arith.extui %0 : i1 to i32
    %c0_i32_0 = arith.constant 0 : i32
    %2 = arith.cmpi ne, %1, %c0_i32_0 : i32
    scf.if %2 {
      %cst = arith.constant 0.000000e+00 : f32
      %11 = vector.broadcast %cst : f32 to vector<256x128xf32>
      %c0 = arith.constant 0 : index
      %c0_3 = arith.constant 0 : index
      %12 = vector.load %arg8[%c0, %c0_3] : memref<256x128xf32, #tpu.memory_space<vmem>>, vector<256x128xf32>
      tpu.vector_store %arg8[%c0, %c0_3], %11 {strides = array<i32>} : memref<256x128xf32, #tpu.memory_space<vmem>>, vector<256x128xf32>,
    } else {
    }
    %3 = arith.index_cast %arg0 : i32 to index
    %4 = memref.load %arg3[%3] : memref<2xi32, #tpu.memory_space<smem>>
    %5 = arith.cmpi slt, %arg1, %4 : i32
    %6 = arith.extui %5 : i1 to i32
    %c0_i32_1 = arith.constant 0 : i32
    %7 = arith.cmpi ne, %6, %c0_i32_1 : i32
    scf.if %7 {
      %11 = arith.index_cast %arg0 : i32 to index
      %12 = arith.index_cast %arg1 : i32 to index
      %13 = memref.load %arg2[%11, %12] : memref<2x2xi32, #tpu.memory_space<smem>>
      %c256_i32 = arith.constant 256 : i32
      %14 = arith.muli %13, %c256_i32 : i32
      %15 = tpu.assume_multiple %14, 256 : i32
      %c0 = arith.constant 0 : index
      %c0_3 = arith.constant 0 : index
      %16 = vector.load %arg8[%c0, %c0_3] : memref<256x128xf32, #tpu.memory_space<vmem>>, vector<256x128xf32>
      %c0_4 = arith.constant 0 : index
      %c0_5 = arith.constant 0 : index
      %17 = vector.load %arg4[%c0_4, %c0_5] : memref<256x256xbf16, #tpu.memory_space<vmem>>, vector<256x256xbf16>
      %18 = arith.index_cast %15 : i32 to index
      %c0_6 = arith.constant 0 : index
      %19 = vector.load %arg5[%18, %c0_6] : memref<512x128xbf16, #tpu.memory_space<vmem>>, vector<256x128xbf16>
      %cst = arith.constant dense<0.000000e+00> : vector<256x128xf32>
      %20 = tpu.matmul %17, %19, %cst {dimension_numbers = #tpu.dot_dimension_numbers<[1], [0], [0], [1], [0, 0, 1, 1], [], []>} : vector<256x256xbf16>, vector<256x128xbf16>, vector<256x128xf32> -> vector<256x128xf32>
      %21 = arith.addf %16, %20 : vector<256x128xf32>
      %c0_7 = arith.constant 0 : index
      %c0_8 = arith.constant 0 : index
      %22 = vector.load %arg8[%c0_7, %c0_8] : memref<256x128xf32, #tpu.memory_space<vmem>>, vector<256x128xf32>
      tpu.vector_store %arg8[%c0_7, %c0_8], %21 {strides = array<i32>} : memref<256x128xf32, #tpu.memory_space<vmem>>, vector<256x128xf32>,
    } else {
    }
    %c1_i32 = arith.constant 1 : i32
    %8 = arith.cmpi eq, %arg1, %c1_i32 : i32
    %9 = arith.extui %8 : i1 to i32
    %c0_i32_2 = arith.constant 0 : i32
    %10 = arith.cmpi ne, %9, %c0_i32_2 : i32
    scf.if %10 {
      %c0 = arith.constant 0 : index
      %c0_3 = arith.constant 0 : index
      %11 = vector.load %arg8[%c0, %c0_3] : memref<256x128xf32, #tpu.memory_space<vmem>>, vector<256x128xf32>
      %c0_4 = arith.constant 0 : index
      %c0_5 = arith.constant 0 : index
      %12 = vector.load %arg6[%c0_4, %c0_5] : memref<1x128xf32, #tpu.memory_space<vmem>>, vector<1x128xf32>
      %13 = vector.broadcast %12 : vector<1x128xf32> to vector<256x128xf32>
      %14 = arith.addf %11, %13 : vector<256x128xf32>
      %cst = arith.constant dense<0xFF800000> : vector<256xf32>
      %15 = vector.multi_reduction <maximumf>, %14, %cst [1] : vector<256x128xf32> to vector<256xf32>
      %16 = vector.shape_cast %15 : vector<256xf32> to vector<256x1xf32>
      %17 = vector.broadcast %16 : vector<256x1xf32> to vector<256x128xf32>
      %18 = arith.subf %14, %17 : vector<256x128xf32>
      %19 = math.exp %18 : vector<256x128xf32>
      %cst_6 = arith.constant dense<0.000000e+00> : vector<256xf32>
      %20 = vector.multi_reduction <add>, %19, %cst_6 [1] : vector<256x128xf32> to vector<256xf32>
      %21 = vector.shape_cast %20 : vector<256xf32> to vector<256x1xf32>
      %22 = math.log %21 : vector<256x1xf32>
      %23 = vector.broadcast %22 : vector<256x1xf32> to vector<256x128xf32>
      %24 = arith.subf %18, %23 : vector<256x128xf32>
      %c0_7 = arith.constant 0 : index
      %c0_8 = arith.constant 0 : index
      %25 = vector.load %arg7[%c0_7, %c0_8] : memref<256x128xf32, #tpu.memory_space<vmem>>, vector<256x128xf32>
      tpu.vector_store %arg7[%c0_7, %c0_8], %24 {strides = array<i32>} : memref<256x128xf32, #tpu.memory_space<vmem>>, vector<256x128xf32>,
    } else {
    }
    return
  }
  func.func @transform_0(%arg0: i32, %arg1: i32, %arg2: memref<2x2xi32, #tpu.memory_space<smem>>, %arg3: memref<2xi32, #tpu.memory_space<smem>>) -> (i32, i32) {
    %0 = arith.index_cast %arg0 : i32 to index
    %1 = arith.index_cast %arg1 : i32 to index
    %2 = memref.load %arg2[%0, %1] : memref<2x2xi32, #tpu.memory_space<smem>>
    %c0_i32 = arith.constant 0 : i32
    return %arg0, %2 : i32, i32
  }
  func.func @transform_1(%arg0: i32, %arg1: i32, %arg2: memref<2x2xi32, #tpu.memory_space<smem>>, %arg3: memref<2xi32, #tpu.memory_space<smem>>) -> (i32, i32) {
    %c0_i32 = arith.constant 0 : i32
    %c0_i32_0 = arith.constant 0 : i32
    %c0_i32_1 = arith.constant 0 : i32
    return %c0_i32, %c0_i32_0 : i32, i32
  }
  func.func @transform_2(%arg0: i32, %arg1: i32, %arg2: memref<2x2xi32, #tpu.memory_space<smem>>, %arg3: memref<2xi32, #tpu.memory_space<smem>>) -> (i32, i32) {
    %c0_i32 = arith.constant 0 : i32
    %c0_i32_0 = arith.constant 0 : i32
    %c0_i32_1 = arith.constant 0 : i32
    return %c0_i32, %c0_i32_0 : i32, i32
  }
  func.func @transform_3(%arg0: i32, %arg1: i32, %arg2: memref<2x2xi32, #tpu.memory_space<smem>>, %arg3: memref<2xi32, #tpu.memory_space<smem>>) -> (i32, i32) {
    %c0_i32 = arith.constant 0 : i32
    %c0_i32_0 = arith.constant 0 : i32
    return %arg0, %c0_i32 : i32, i32
  }
}

</mosaic_0001>

<bundles_post_ra>
// kernel: gcn_cora_forward_padded.3
= control target key start
LH: loop header
LB: loop body
LE: loop exit
PB: predicated region body
PF: predicated region fallthrough
CT: control target
= control target key end

     0   :  { %7 = vsyncpa [#allocation3], 0  ;;  %s1439_s0 = inlined_call_operand.hbm [shape: bf16[512,128], index: 0, kind: input, shape index: {}]   ;;  %s1440_s1 = inlined_call_operand.hbm [shape: bf16[128,128], index: 1, kind: input, shape index: {}]   ;;  %s1441_s2 = inlined_call_operand.vmem [shape: bf16[512,128], index: 2, kind: output, shape index: {}]  }
   0x1   :  { %9 = vsyncpa [#allocation3 + $0x1], 0 }
   0x2   :  { %10 = vsyncpa [#allocation5], 0  ;;  %s1252_s9 = smov 0   ;;  %s1254_s10 = smov 0  }
   0x3   :  { %s1256_s11 = smov 0   ;;  %s1258_s12 = smov 0  }
   0x4 LB: > { %s772_s13 = sadd.s32 4294967295, %s1231_s12   ;;  %p36_p0 = scmp.ne.s32.totalorder %s1223_s10, %s1219_s9  ;;  %s1231_s12 = sphi %s1258_s12, %s1457_s12   ;;  %s1227_s11 = sphi %s1256_s11, %s1456_s11   ;;  %s1223_s10 = sphi %s1254_s10, %s1455_s10   ;;  %s1219_s9 = sphi %s1252_s9, %s1454_s9  }
   0x5   : > { %p1274_p1 = scmp.eq.s32.totalorder %s772_s13, 0  ;;  %p774_p2 = scmp.ge.s32.totalorder %s1231_s12, 1 }
   0x6   : > { %p94_p3 = scmp.lt.s32.totalorder %s1231_s12, 3  ;;  %s1233_s17 = smov [#allocation4]  }
   0x7   : > { %s1446_s14 = scalar_select %p1274_p1, 1, 0 }
   0x8   : > { %p1282_p4 = por %p1274_p1, %p36_p0  ;;  %p1286_p5 = pnand %p774_p2, %p94_p3 }
   0x9   : > { %s106_s18 = sshll.u32 %s1233_s17, 4  ;;  %s1299_s20 = sadd.s32 1, %s1231_s12   ;;  %s107_s18 = int_to_ptr.vmem [resolvable:$true] %s106_s18 }
   0xa   : > { %s1447_s15 = scalar_select %p1282_p4, 1, 0 }
   0xb   : > { %s1448_s16 = scalar_select %p1286_p5, 1, 0 }
   0xc   : > { %p1065_p6 = pneg %p1286_p5  ;;  %s23_s21 = sadd.s32 1, %s1227_s11 }
   0xd   : > { %s20_s22 = ssub.s32 %s1231_s12, %s1299_s20  ;;  %s1135_s25 = scalar_lea.hbm %s1440_s1, 1024 }
   0xe   : > { %p1294_p7 = pnand %p1065_p6, %p1274_p1  ;;  %p1136_p8 = scmp.ne.s32.totalorder %s1440_s1, %s1135_s25 }
   0xf   : > { %p1142_p12 = scmp.lt.u32.totalorder %s1135_s25, %s1440_s1 }
  0x10   : > { %p1137_p9 = pneg %p1294_p7 }
  0x12   : > { %p1138_p10 = pnand %p1137_p9, %p1136_p8 }
  0x14   : > { %p1139_p11 = pneg %p1138_p10 }
  0x16   : > { %p1144_p13 = pnand %p1142_p12, %p1139_p11 }
  0x18   : > { %1147 = shalt.err (!%p1144_p13)
}
  0x19   : > { %s1148_s30 = scalar_lea.vmem %s107_s18, 1024  ;;  %p1156_p6 = scmp.lt.s32.totalorder %s107_s18, %s107_s18 }
  0x1a   : > { %p1149_p0 = scmp.ne.s32.totalorder %s107_s18, %s1148_s30  ;;  %p1157_p1 = scmp.lt.s32.totalorder %s1148_s30, %s1148_s30 }
  0x1c   : > { %p1151_p2 = pnand %p1149_p0, %p1137_p9  ;;  %p1158_p4 = por %p1157_p1, %p1156_p6 }
  0x1e   : > { %p1152_p3 = pneg %p1151_p2 }
  0x20   : > { %p1159_p5 = pnand %p1158_p4, %p1152_p3 }
  0x22   : > { %1162 = shalt.err (!%p1159_p5)
}
  0x23   : > { %s1234_s3 = smov 64   ;;  %s1235_s4 = smov 4  }
  0x24   : > { %1068 = dma.hbm_to_vmem [thread:$0]  (!%p1294_p7), %s1440_s1, 1024, %s107_s18, [#allocation5], %s1234_s3, %s1234_s3, %s1235_s4  }
  0x25   : > { %p21_p1 = scmp.eq.s32.totalorder %s20_s22, 0  ;;  %p30_p4 = scmp.ne.s32.totalorder %s1227_s11, %s1223_s10 }
  0x26   : > { %p31_p5 = scmp.eq.s32.totalorder %s1231_s12, 0  ;;  %p1074_p8 = scmp.lt.s32.totalorder %s1231_s12, 2 }
  0x27   : > { %s1328_s7 = scalar_select %p21_p1, %s1227_s11, %s23_s21  }
  0x28   : > { %p32_p9 = por %p31_p5, %p30_p4  ;;  %s120_s8 = sand.u32 1, %s1227_s11  }
  0x29   : > { %s777_s9 = sshll.u32 %s120_s8, 7  ;;  %s843_s17 = sshll.u32 %s1231_s12, 11 }
  0x2a   : > { %s1335_s19 = scalar_lea.hbm %s1439_s0, %s843_s17  ;;  %s124_s18 = scalar_lea.vmem [#allocation2], %s777_s9 }
  0x2b   : > { %s131_s22 = sshll.u32 %s124_s18, 4  ;;  %p1339_p7 = pnand %p1074_p8, %p32_p9  ;;  %s1337_s22 = int_to_ptr.vmem [resolvable:$true] %s131_s22 }
  0x2c   : > { %s1343_s25 = scalar_lea.sflag [#allocation3], %s120_s8  ;;  %s1163_s26 = scalar_lea.hbm %s1335_s19, 2048 }
  0x2d   : > { %p1164_p10 = scmp.ne.s32.totalorder %s1335_s19, %s1163_s26  ;;  %p1165_p11 = pneg %p1339_p7 }
  0x2e   : > { %s1168_s29 = scalar_lea.hbm %s1439_s0, 4096  ;;  %p1169_p0 = scmp.lt.u32.totalorder %s1335_s19, %s1439_s0 }
  0x2f   : > { %p1166_p12 = pnand %p1165_p11, %p1164_p10  ;;  %p1170_p2 = scmp.lt.u32.totalorder %s1168_s29, %s1163_s26 }
  0x30   : > { %p1172_p6 = scmp.lt.u32.totalorder %s1163_s26, %s1335_s19 }
  0x31   : > { %p1167_p13 = pneg %p1166_p12  ;;  %p1171_p3 = por %p1170_p2, %p1169_p0 }
  0x33   : > { %p1173_p1 = por %p1172_p6, %p1171_p3 }
  0x35   : > { %p1174_p4 = pnand %p1173_p1, %p1167_p13 }
  0x37   : > { %1177 = shalt.err (!%p1174_p4)
}
  0x38   : > { %s1178_s6 = scalar_lea.vmem %s1337_s22, 2048  ;;  %s1236_s8 = smov [#allocation2]  }
  0x39   : > { %p1179_p5 = scmp.ne.s32.totalorder %s1337_s22, %s1178_s6  ;;  %s1183_s9 = sshll.u32 %s1236_s8, 4  ;;  %s1184_s9 = int_to_ptr.vmem [resolvable:$false] %s1183_s9 }
  0x3a   : > { %s1185_s17 = scalar_lea.vmem %s1184_s9, 4096  ;;  %p1186_p10 = scmp.lt.s32.totalorder %s1337_s22, %s1184_s9 }
  0x3b   : > { %p1181_p8 = pnand %p1179_p5, %p1165_p11  ;;  %p1187_p12 = scmp.lt.s32.totalorder %s1185_s17, %s1178_s6 }
  0x3d   : > { %p1182_p9 = pneg %p1181_p8  ;;  %p1188_p0 = por %p1187_p12, %p1186_p10 }
  0x3f   : > { %p1189_p2 = pnand %p1188_p0, %p1182_p9 }
  0x41   : > { %1192 = shalt.err (!%p1189_p2)
}
  0x42   : > { %1072 = dma.hbm_to_vmem [thread:$0]  (!%p1339_p7), %s1335_s19, 2048, %s1337_s22, %s1343_s25, %s1234_s3, %s1234_s3, %s1235_s4  }
  0x43   : > { %p1451_p11 = scmp.ne.s32.totalorder %s1448_s16, 0 }
  0x44   : > { %s145_s23 = sand.u32 (!%p1451_p11), 1, %s1223_s10   ;;  %p1452_p13 = scmp.ne.s32.totalorder (!%p1451_p11), %s1447_s15, 0 }
  0x45   : > { %143 = sbr.rel (%p1451_p11) target bundleno = 355 (0x163), region = 28  ;;  %s781_s24 = sshll.u32 (!%p1451_p11), %s145_s23, 7 }
  0x46   : > { %s146_s18 = scalar_lea.sflag (!%p1451_p11), [#allocation3], %s145_s23  ;;  %s1377_s26 = scalar_lea.vmem (!%p1451_p11), [#allocation2], %s781_s24 }
  0x4c   : > { %1210 = dma.done.wait (%p1452_p13), %s146_s18, 2048  }
  0x4d   : > { %1212 = vsyncadd (%p1452_p13), %s146_s18, 4294965248  ;;  %p1453_p3 = scmp.ne.s32.totalorder %s1446_s14, 0 }
  0x4f   : > { %1214 = dma.done.wait (%p1453_p3), [#allocation5], 1024  }
  0x50   : > { %1216 = vsyncadd (%p1453_p3), [#allocation5], 4294966272  ;;  %v1111_v0 = vld [vmem:[#allocation4] sm:$0xff]   ;;  %v1112_v1 = vld [vmem:[#allocation4 + $0x8] sm:$0xff]   ;;  %s783_s14 = sshll.u32 %s772_s13, 5 }
  0x51   : > { %995 = vmatprep.subr.bf16.mxu0 %v1111_v0  ;;  %1043 = vmatprep.subr.bf16.mxu1 %v1111_v0  ;;  %v1113_v2 = vld [vmem:[#allocation4 + $0x10] sm:$0xff]   ;;  %v1114_v3 = vld [vmem:[#allocation4 + $0x18] sm:$0xff]   ;;  %v1119_v4 = vld [vmem:[%s1377_s26] sm:$0xff]   ;;  %p176_p7 = scmp.lt.s32.totalorder %s783_s14, 63 }
  0x52   : > { %996 = vmatpush3.bf16.msra.mxu0 %v1111_v0  ;;  %1051 = vmatpush3.bf16.msra.mxu1 %v1111_v0  ;;  %v1120_v5 = vld [vmem:[%s1377_s26 + $0x40] sm:$0xff]   ;;  %v1116_v7 = vld [vmem:[#allocation4 + $0x28] sm:$0xff]   ;;  %v1117_v8 = vld [vmem:[#allocation4 + $0x30] sm:$0xff]  }
  0x53   : > { %997 = vmatprep.subr.bf16.mxu0 %v1112_v1  ;;  %1044 = vmatprep.subr.bf16.mxu1 %v1112_v1  ;;  %v1115_v6 = vld [vmem:[#allocation4 + $0x20] sm:$0xff]   ;;  %v1118_v9 = vld [vmem:[#allocation4 + $0x38] sm:$0xff]   ;;  %v1121_v10 = vld [vmem:[%s1377_s26 + $0x8] sm:$0xff]   ;;  %s1459_s14 = smov (!%p176_p7, %s783_s14), 63 }
  0x54   : > { %1011 = vmatprep.mubr.bf16.mxu0 %v1119_v4  ;;  %1027 = vmatprep.mubr.bf16.mxu1 %v1120_v5  ;;  %v1122_v11 = vld [vmem:[%s1377_s26 + $0x48] sm:$0xff]   ;;  %v1123_v12 = vld [vmem:[%s1377_s26 + $0x10] sm:$0xff]   ;;  %v1125_v14 = vld [vmem:[%s1377_s26 + $0x18] sm:$0xff]   ;;  %s784_s15 = sshll.u32 %s1459_s14, 2 }
  0x55   : > { %v1124_v13 = vld [vmem:[%s1377_s26 + $0x50] sm:$0xff]   ;;  %v1126_v15 = vld [vmem:[%s1377_s26 + $0x58] sm:$0xff]   ;;  %v1127_v16 = vld [vmem:[%s1377_s26 + $0x20] sm:$0xff]   ;;  %s1408_s4 = scalar_lea.vmem %s1441_s2, %s784_s15 }
  0x56   : > { %998 = vmatpush3.bf16.msra.mxu0 %v1112_v1  ;;  %1052 = vmatpush3.bf16.msra.mxu1 %v1112_v1  ;;  %v1128_v17 = vld [vmem:[%s1377_s26 + $0x60] sm:$0xff]   ;;  %v1129_v18 = vld [vmem:[%s1377_s26 + $0x28] sm:$0xff]   ;;  %v1131_v20 = vld [vmem:[%s1377_s26 + $0x30] sm:$0xff]  }
  0x57   : > { %999 = vmatprep.subr.bf16.mxu0 %v1113_v2  ;;  %1045 = vmatprep.subr.bf16.mxu1 %v1113_v2  ;;  %v1130_v19 = vld [vmem:[%s1377_s26 + $0x68] sm:$0xff]   ;;  %v1132_v21 = vld [vmem:[%s1377_s26 + $0x70] sm:$0xff]   ;;  %v1133_v22 = vld [vmem:[%s1377_s26 + $0x38] sm:$0xff]  }
  0x58   : > { %v1134_v23 = vld [vmem:[%s1377_s26 + $0x78] sm:$0xff]  }
  0x5a   : > { %1000 = vmatpush3.bf16.msra.mxu0 %v1113_v2  ;;  %1053 = vmatpush3.bf16.msra.mxu1 %v1113_v2 }
  0x5b   : > { %1001 = vmatprep.subr.bf16.mxu0 %v1114_v3  ;;  %1046 = vmatprep.subr.bf16.mxu1 %v1114_v3 }
  0x5e   : > { %1002 = vmatpush3.bf16.msra.mxu0 %v1114_v3  ;;  %1054 = vmatpush3.bf16.msra.mxu1 %v1114_v3 }
  0x5f   : > { %1003 = vmatprep.subr.bf16.mxu0 %v1115_v6  ;;  %1047 = vmatprep.subr.bf16.mxu1 %v1115_v6 }
  0x62   : > { %1004 = vmatpush3.bf16.msra.mxu0 %v1115_v6  ;;  %1055 = vmatpush3.bf16.msra.mxu1 %v1115_v6 }
  0x63   : > { %1005 = vmatprep.subr.bf16.mxu0 %v1116_v7  ;;  %1048 = vmatprep.subr.bf16.mxu1 %v1116_v7 }
  0x66   : > { %1006 = vmatpush3.bf16.msra.mxu0 %v1116_v7  ;;  %1056 = vmatpush3.bf16.msra.mxu1 %v1116_v7 }
  0x67   : > { %1007 = vmatprep.subr.bf16.mxu0 %v1117_v8  ;;  %1049 = vmatprep.subr.bf16.mxu1 %v1117_v8 }
  0x6a   : > { %1008 = vmatpush3.bf16.msra.mxu0 %v1117_v8  ;;  %1057 = vmatpush3.bf16.msra.mxu1 %v1117_v8 }
  0x6b   : > { %1009 = vmatprep.subr.bf16.mxu0 %v1118_v9  ;;  %1050 = vmatprep.subr.bf16.mxu1 %v1118_v9 }
  0x6e   : > { %1010 = vmatpush3.bf16.msra.mxu0 %v1118_v9  ;;  %1058 = vmatpush3.bf16.msra.mxu1 %v1118_v9 }
  0x71   : > { %1012 = vmatmul.mubr.bf16.vlgmr.msra.gmra.mrb[0].mxu0 %v1121_v10  ;;  %1028 = vmatmul.mubr.bf16.vlgmr.msra.gmra.mrb[0].mxu1 %v1122_v11 }
  0x72   : > { %1015 = vmatprep.mubr.bf16.mxu0 %v1123_v12  ;;  %1031 = vmatprep.mubr.bf16.mxu1 %v1124_v13 }
  0x79   : > { %1016 = vmatmul.mubr.bf16.gmra.mrb[4].mxu0 %v1125_v14  ;;  %1032 = vmatmul.mubr.bf16.gmra.mrb[4].mxu1 %v1126_v15 }
  0x7a   : > { %1019 = vmatprep.mubr.bf16.mxu0 %v1127_v16  ;;  %1035 = vmatprep.mubr.bf16.mxu1 %v1128_v17 }
  0x81   : > { %1020 = vmatmul.mubr.bf16.gmra.mrb[8].mxu0 %v1129_v18  ;;  %1036 = vmatmul.mubr.bf16.gmra.mrb[8].mxu1 %v1130_v19 }
  0x82   : > { %1023 = vmatprep.mubr.bf16.mxu0 %v1131_v20  ;;  %1039 = vmatprep.mubr.bf16.mxu1 %v1132_v21 }
  0x89   : > { %1024 = vmatmul.mubr.bf16.gmra.mrb[12].mxu0 %v1133_v22  ;;  %1040 = vmatmul.mubr.bf16.gmra.mrb[12].mxu1 %v1134_v23 }
 0x144   : > { %v1013_v24 = vpop.f32.mrb[0].mxu0  ;;  %v1029_v25 = vpop.f32.mrb[0].mxu1 }
 0x145   : > { %v408_v26 = vpop.f32.mrb[1].mxu0  ;;  %v472_v27 = vpop.f32.mrb[1].mxu1 }
 0x146   : > { %v1014_v28 = vpop.f32.mrb[2].mxu0  ;;  %v1030_v29 = vpop.f32.mrb[2].mxu1 }
 0x147   : > { %v884_v30 = vpack.c.bf16 %v1014_v28, %v1013_v24  ;;  %v924_v31 = vpack.c.bf16 %v1030_v29, %v1029_v25  ;;  %v411_v32 = vpop.f32.mrb[3].mxu0  ;;  %v475_v33 = vpop.f32.mrb[3].mxu1 }
 0x148   : > { %v879_v34 = vpack.c.bf16 %v411_v32, %v408_v26  ;;  %v919_v35 = vpack.c.bf16 %v475_v33, %v472_v27 }
 0x149   : > { %956 = vst [vmem:[%s1408_s4 + $0x8] sm:$0xff] %v884_v30   ;;  %964 = vst [vmem:[%s1408_s4 + $0x48] sm:$0xff] %v924_v31  }
 0x14a   : > { %880 = vst [vmem:[%s1408_s4] sm:$0xff] %v879_v34   ;;  %963 = vst [vmem:[%s1408_s4 + $0x40] sm:$0xff] %v919_v35  }
 0x14c   : > { %v1017_v36 = vpop.f32.mrb[4].mxu0  ;;  %v1033_v37 = vpop.f32.mrb[4].mxu1 }
 0x14d   : > { %v424_v38 = vpop.f32.mrb[5].mxu0  ;;  %v488_v39 = vpop.f32.mrb[5].mxu1 }
 0x14e   : > { %v1018_v40 = vpop.f32.mrb[6].mxu0  ;;  %v1034_v41 = vpop.f32.mrb[6].mxu1 }
 0x14f   : > { %v894_v42 = vpack.c.bf16 %v1018_v40, %v1017_v36  ;;  %v934_v43 = vpack.c.bf16 %v1034_v41, %v1033_v37  ;;  %v427_v44 = vpop.f32.mrb[7].mxu0  ;;  %v491_v45 = vpop.f32.mrb[7].mxu1 }
 0x150   : > { %v889_v46 = vpack.c.bf16 %v427_v44, %v424_v38  ;;  %v929_v47 = vpack.c.bf16 %v491_v45, %v488_v39 }
 0x151   : > { %958 = vst [vmem:[%s1408_s4 + $0x18] sm:$0xff] %v894_v42   ;;  %966 = vst [vmem:[%s1408_s4 + $0x58] sm:$0xff] %v934_v43  }
 0x152   : > { %957 = vst [vmem:[%s1408_s4 + $0x10] sm:$0xff] %v889_v46   ;;  %965 = vst [vmem:[%s1408_s4 + $0x50] sm:$0xff] %v929_v47  }
 0x154   : > { %v1021_v48 = vpop.f32.mrb[8].mxu0  ;;  %v1037_v49 = vpop.f32.mrb[8].mxu1 }
 0x155   : > { %v440_v50 = vpop.f32.mrb[9].mxu0  ;;  %v504_v51 = vpop.f32.mrb[9].mxu1 }
 0x156   : > { %v1022_v52 = vpop.f32.mrb[10].mxu0  ;;  %v1038_v53 = vpop.f32.mrb[10].mxu1 }
 0x157   : > { %v904_v54 = vpack.c.bf16 %v1022_v52, %v1021_v48  ;;  %v944_v55 = vpack.c.bf16 %v1038_v53, %v1037_v49  ;;  %v443_v56 = vpop.f32.mrb[11].mxu0  ;;  %v507_v57 = vpop.f32.mrb[11].mxu1 }
 0x158   : > { %v899_v58 = vpack.c.bf16 %v443_v56, %v440_v50  ;;  %v939_v59 = vpack.c.bf16 %v507_v57, %v504_v51 }
 0x159   : > { %960 = vst [vmem:[%s1408_s4 + $0x28] sm:$0xff] %v904_v54   ;;  %968 = vst [vmem:[%s1408_s4 + $0x68] sm:$0xff] %v944_v55  }
 0x15a   : > { %959 = vst [vmem:[%s1408_s4 + $0x20] sm:$0xff] %v899_v58   ;;  %967 = vst [vmem:[%s1408_s4 + $0x60] sm:$0xff] %v939_v59  }
 0x15c   : > { %v1025_v60 = vpop.f32.mrb[12].mxu0  ;;  %v1041_v61 = vpop.f32.mrb[12].mxu1 }
 0x15d   : > { %v456_v62 = vpop.f32.mrb[13].mxu0  ;;  %v520_v63 = vpop.f32.mrb[13].mxu1 }
 0x15e   : > { %v1026_v0 = vpop.f32.mrb[14].mxu0  ;;  %v1042_v1 = vpop.f32.mrb[14].mxu1 }
 0x15f   : > { %v914_v2 = vpack.c.bf16 %v1026_v0, %v1025_v60  ;;  %v954_v3 = vpack.c.bf16 %v1042_v1, %v1041_v61  ;;  %v459_v4 = vpop.f32.mrb[15].mxu0  ;;  %v523_v5 = vpop.f32.mrb[15].mxu1 }
 0x160   : > { %v909_v6 = vpack.c.bf16 %v459_v4, %v456_v62  ;;  %v949_v7 = vpack.c.bf16 %v523_v5, %v520_v63 }
 0x161   : > { %962 = vst [vmem:[%s1408_s4 + $0x38] sm:$0xff] %v914_v2   ;;  %970 = vst [vmem:[%s1408_s4 + $0x78] sm:$0xff] %v954_v3  }
 0x162   : > { %961 = vst [vmem:[%s1408_s4 + $0x30] sm:$0xff] %v909_v6   ;;  %969 = vst [vmem:[%s1408_s4 + $0x70] sm:$0xff] %v949_v7  }
 0x163 PF: > { %p13_p6 = scmp.ge.s32.totalorder %s1299_s20, 4   ;;  %s1454_s9 = smov %s1223_s10 }
 0x164   : > { %s1455_s10 = smov %s1227_s11  ;;  %s1456_s11 = smov %s1328_s7 }
 0x165   : > { %s1457_s12 = smov %s1299_s20  ;;  %15 = sbr.rel (!%p13_p6) target bundleno = 4 (0x4), region = 72 }
 0x16c   :  { %717 = vsyncpa [#allocation3], 1 }
 0x16d   :  { %719 = vsyncpa [#allocation3 + $0x1], 1 }
 0x16e   :  { %720 = vsyncpa [#allocation5], 1 }

// kernel: gcn_cora_forward_padded.5
= control target key start
LH: loop header
LB: loop body
LE: loop exit
PB: predicated region body
PF: predicated region fallthrough
CT: control target
= control target key end

     0   :  { %s2854_s0 = inlined_call_operand.vmem [shape: s32[2,2], index: 0, kind: input, shape index: {}]   ;;  %s2855_s2 = inlined_call_operand.vmem [shape: bf16[512,512], index: 2, kind: input, shape index: {}]   ;;  %s2856_s3 = inlined_call_operand.vmem [shape: bf16[512,128], index: 3, kind: input, shape index: {}]   ;;  %s2857_s4 = inlined_call_operand.vmem [shape: f32[1,128], index: 4, kind: input, shape index: {}]   ;;  %s2858_s5 = inlined_call_operand.hbm [shape: f32[512,128], index: 5, kind: output, shape index: {}]   ;;  %s2859_s1 = inlined_call_operand.vmem [shape: s32[2], index: 1, kind: input, shape index: {}]  }
   0x1   :  { %s10_s20 = sshll.u32 %s2854_s0, 4  ;;  %s14_s23 = sshll.u32 %s2859_s1, 4  ;;  %s11_s20 = int_to_ptr.vmem [resolvable:$true] %s10_s20  ;;  %s15_s23 = int_to_ptr.vmem [resolvable:$true] %s14_s23 }
   0x2   :  { %s2038_s24 = scalar_lea.vmem %s11_s20, 32  ;;  %p2043_p1 = scmp.lt.s32.totalorder %s11_s20, %s11_s20 }
   0x3   :  { %p2039_p0 = scmp.ne.s32.totalorder %s11_s20, %s2038_s24  ;;  %p2044_p2 = scmp.lt.s32.totalorder %s2038_s24, %s2038_s24 }
   0x5   :  { %p2045_p3 = por %p2044_p2, %p2043_p1 }
   0x7   :  { %p2046_p4 = pnand %p2045_p3, %p2039_p0 }
   0x9   :  { %2049 = shalt.err (!%p2046_p4)  }
   0xa   :  { %s2176_s25 = smov [#allocation4]   ;;  %s2050_s26 = scalar_lea.vmem %s15_s23, 16 }
   0xb   :  { %13 = dma.vmem_to_smem %s11_s20, 32, %s2176_s25, [#allocation3] }
   0xc   :  { %p2051_p5 = scmp.ne.s32.totalorder %s15_s23, %s2050_s26  ;;  %p2055_p6 = scmp.lt.s32.totalorder %s15_s23, %s15_s23 }
   0xd   :  { %p2056_p7 = scmp.lt.s32.totalorder %s2050_s26, %s2050_s26 }
   0xf   :  { %p2057_p8 = por %p2056_p7, %p2055_p6 }
  0x11   :  { %p2058_p9 = pnand %p2057_p8, %p2051_p5 }
  0x13   :  { %2061 = shalt.err (!%p2058_p9)  }
  0x14   :  { %s2177_s0 = smov [#allocation5]  }
  0x15   :  { %17 = dma.vmem_to_smem %s15_s23, 16, %s2177_s0, [#allocation3] }
  0x16   :  { %2130 = dma.done.wait [#allocation3], 48 }
  0x17   :  { %2131 = vsyncadd [#allocation3], 4294967248 }
  0x18   :  { %19 = sfence }
  0x19   :  { %20 = vsyncpa [#allocation8], 0 }
  0x1a   :  { %22 = vsyncpa [#allocation8 + $0x1], 0  ;;  %s2218_s1 = smov 0   ;;  %s2220_s27 = smov 0  }
  0x1b   :  { %s2222_s28 = smov 0   ;;  %s2224_s29 = smov 0  }
  0x1c   :  { %s2226_s30 = smov 0   ;;  %s2228_s6 = smov 0  }
  0x1d   :  { %s2230_s7 = smov 0   ;;  %s2232_s8 = smov 0  }
  0x1e   :  { %s2234_s9 = smov 0   ;;  %s2236_s10 = smov 0  }
  0x1f LB: > { %s1549_s11 = sadd.s32 4294967295, %s2174_s10   ;;  %s37_s12 = sadd.s32 1, %s2166_s8  ;;  %s2174_s10 = sphi %s2236_s10, %s28_s10   ;;  %s2170_s9 = sphi %s2234_s9, %s2879_s9   ;;  %s2166_s8 = sphi %s2232_s8, %s2878_s8   ;;  %s2162_s7 = sphi %s2230_s7, %s2877_s7   ;;  %s2158_s6 = sphi %s2228_s6, %s2876_s6   ;;  %s2154_s30 = sphi %s2226_s30, %s2875_s30   ;;  %s2150_s29 = sphi %s2224_s29, %s2874_s29   ;;  %s2146_s28 = sphi %s2222_s28, %s2873_s28   ;;  %s2142_s27 = sphi %s2220_s27, %s2872_s27   ;;  %s2138_s1 = sphi %s2218_s1, %s2871_s1  }
  0x20   : > { %s40_s13 = sadd.s32 1, %s2170_s9  ;;  %p38_p10 = scmp.ge.s32.totalorder %s37_s12, 2 }
  0x21   : > { %s44_s14 = sshra.s32 %s2166_s8, 7  ;;  %s49_s16 = sand.u32 127, %s2166_s8 }
  0x22   : > { %s46_s15 = sadd.s32 %s2170_s9, %s44_s14  ;;  %s2881_s12 = smov (%p38_p10, %s37_s12), 0 }
  0x23   : > { %2863 = sst [smem:[#allocation11_spill]] %s2881_s12  ;;  %s2883_s13 = smov (!%p38_p10, %s40_s13), %s2170_s9 }
  0x24   : > { %s1550_s17 = sadd.s32 4294967294, %s2174_s10   ;;  %s1551_s18 = sshll.u32 %s46_s15, 7 }
  0x25   : > { %p42_p11 = scmp.ge.s32.totalorder %s2883_s13, 2  ;;  %s50_s19 = sadd.s32 %s1551_s18, %s49_s16 }
  0x26   : > { %s51_s20 = sld [smem:[#allocation4 + %s50_s19]]  ;;  %s52_s21 = sshra.s32 %s2881_s12, 7 }
  0x27   : > { %s2885_s13 = smov (%p42_p11, %s2883_s13), 0  ;;  %s57_s22 = sand.u32 127, %s2881_s12 }
  0x28   : > { %2864 = sst [smem:[#allocation12_spill]] %s2885_s13  ;;  %p72_p12 = scmp.ne.s32.totalorder %s2154_s30, %s2150_s29 }
  0x29   : > { %s54_s23 = sadd.s32 %s52_s21, %s2885_s13  ;;  %s60_s24 = ssub.s32 %s2170_s9, %s2885_s13 }
  0x2a   : > { %s1552_s25 = sshll.u32 %s54_s23, 7  ;;  %p73_p13 = scmp.eq.s32.totalorder %s2174_s10, 0 }
  0x2b   : > { %s58_s26 = sadd.s32 %s1552_s25, %s57_s22  ;;  %p131_p0 = scmp.eq.s32.totalorder %s60_s24, 0 }
  0x2c   : > { %s59_s0 = sld [smem:[#allocation4 + %s58_s26]]  ;;  %p2288_p1 = por %p73_p13, %p72_p12 }
  0x2d   : > { %s133_s15 = sadd.s32 1, %s2146_s28  ;;  %p143_p2 = scmp.ne.s32.totalorder %s2146_s28, %s2142_s27 }
  0x2e   : > { %s2296_s16 = scalar_select %p131_p0, %s2146_s28, %s133_s15  }
  0x2f   : > { %p144_p3 = scmp.eq.s32.totalorder %s1549_s11, 3  ;;  %p149_p4 = scmp.ne.s32.totalorder %s2142_s27, %s2138_s1 }
  0x30   : > { %p150_p5 = scmp.eq.s32.totalorder %s1550_s17, 3  ;;  %s65_s25 = sadd.s32 1, %s2154_s30 }
  0x31   : > { %p2302_p6 = por %p144_p3, %p143_p2  ;;  %p1554_p9 = scmp.ge.s32.totalorder %s2174_s10, 4 }
  0x32   : > { %s61_s21 = ssub.s32 %s51_s20, %s59_s0  ;;  %p2306_p7 = por %p150_p5, %p149_p4 }
  0x33   : > { %s62_s23 = sor.u32 %s61_s21, %s60_s24  ;;  %172 = sbr.rel (%p1554_p9) target bundleno = 85 (0x55), region = 24 }
  0x34   : > { %p63_p8 = scmp.eq.s32.totalorder %s62_s23, 0 }
  0x36   : > { %s2312_s26 = scalar_select %p63_p8, %s2154_s30, %s65_s25  }
  0x3a   : > { %175 = sbr.rel (!%p2288_p1) target bundleno = 85 (0x55), region = 28  ;;  %s187_s11 = sld [smem:[#allocation4 + %s50_s19]] (%p2288_p1) }
  0x3b   : > { %s177_s17 = sand.u32 (%p2288_p1), 1, %s2154_s30   ;;  %s1624_s20 = sshll.u32 (%p2288_p1), %s2170_s9, 7 }
  0x3c   : > { %s1555_s0 = sshll.u32 (%p2288_p1), %s177_s17, 8 }
  0x3d   : > { %s2327_s19 = scalar_lea.vmem (%p2288_p1), [#allocation6], %s1555_s0 }
  0x40   : > { %s1558_s15 = sshll.u32 (%p2288_p1), %s187_s11, 1 }
  0x41   : > { %s191_s13 = sadd.s32 %s1624_s20, %s1558_s15 }
  0x42   : > { %s1560_s12 = sshll.u32 %s191_s13, 2 }
  0x43   : > { %s2322_s23 = scalar_lea.vmem %s2855_s2, %s1560_s12 }
  0x44   : > { %v283_v0 = vld [vmem:[%s2322_s23] sm:$0xff]  ;;  %v285_v1 = vld [vmem:[%s2322_s23 + $0x10] sm:$0xff] }
  0x45   : > { %v287_v2 = vld [vmem:[%s2322_s23 + $0x20] sm:$0xff]  ;;  %284 = vst [vmem:[%s2327_s19] sm:$0xff] %v283_v0  ;;  %286 = vst [vmem:[%s2327_s19 + $0x8] sm:$0xff] %v285_v1  ;;  %v289_v3 = vld [vmem:[%s2322_s23 + $0x30] sm:$0xff] }
  0x46   : > { %288 = vst [vmem:[%s2327_s19 + $0x10] sm:$0xff] %v287_v2  ;;  %v291_v4 = vld [vmem:[%s2322_s23 + $0x40] sm:$0xff]  ;;  %v293_v5 = vld [vmem:[%s2322_s23 + $0x50] sm:$0xff]  ;;  %290 = vst [vmem:[%s2327_s19 + $0x18] sm:$0xff] %v289_v3 }
  0x47   : > { %292 = vst [vmem:[%s2327_s19 + $0x20] sm:$0xff] %v291_v4  ;;  %294 = vst [vmem:[%s2327_s19 + $0x28] sm:$0xff] %v293_v5  ;;  %v295_v6 = vld [vmem:[%s2322_s23 + $0x60] sm:$0xff]  ;;  %v297_v7 = vld [vmem:[%s2322_s23 + $0x70] sm:$0xff] }
  0x48   : > { %v299_v8 = vld [vmem:[%s2322_s23 + $0x80] sm:$0xff]  ;;  %296 = vst [vmem:[%s2327_s19 + $0x30] sm:$0xff] %v295_v6  ;;  %298 = vst [vmem:[%s2327_s19 + $0x38] sm:$0xff] %v297_v7  ;;  %v301_v9 = vld [vmem:[%s2322_s23 + $0x90] sm:$0xff] }
  0x49   : > { %300 = vst [vmem:[%s2327_s19 + $0x40] sm:$0xff] %v299_v8  ;;  %v303_v10 = vld [vmem:[%s2322_s23 + $0xa0] sm:$0xff]  ;;  %v305_v11 = vld [vmem:[%s2322_s23 + $0xb0] sm:$0xff]  ;;  %302 = vst [vmem:[%s2327_s19 + $0x48] sm:$0xff] %v301_v9 }
  0x4a   : > { %304 = vst [vmem:[%s2327_s19 + $0x50] sm:$0xff] %v303_v10  ;;  %306 = vst [vmem:[%s2327_s19 + $0x58] sm:$0xff] %v305_v11  ;;  %v307_v12 = vld [vmem:[%s2322_s23 + $0xc0] sm:$0xff]  ;;  %v309_v13 = vld [vmem:[%s2322_s23 + $0xd0] sm:$0xff] }
  0x4b   : > { %v311_v14 = vld [vmem:[%s2322_s23 + $0xe0] sm:$0xff]  ;;  %308 = vst [vmem:[%s2327_s19 + $0x60] sm:$0xff] %v307_v12  ;;  %310 = vst [vmem:[%s2327_s19 + $0x68] sm:$0xff] %v309_v13  ;;  %v313_v15 = vld [vmem:[%s2322_s23 + $0xf0] sm:$0xff] }
  0x4c   : > { %312 = vst [vmem:[%s2327_s19 + $0x70] sm:$0xff] %v311_v14  ;;  %v315_v16 = vld [vmem:[%s2322_s23 + $0x100] sm:$0xff]  ;;  %v317_v17 = vld [vmem:[%s2322_s23 + $0x110] sm:$0xff]  ;;  %314 = vst [vmem:[%s2327_s19 + $0x78] sm:$0xff] %v313_v15 }
  0x4d   : > { %316 = vst [vmem:[%s2327_s19 + $0x80] sm:$0xff] %v315_v16  ;;  %318 = vst [vmem:[%s2327_s19 + $0x88] sm:$0xff] %v317_v17  ;;  %v319_v18 = vld [vmem:[%s2322_s23 + $0x120] sm:$0xff]  ;;  %v321_v19 = vld [vmem:[%s2322_s23 + $0x130] sm:$0xff] }
  0x4e   : > { %v323_v20 = vld [vmem:[%s2322_s23 + $0x140] sm:$0xff]  ;;  %320 = vst [vmem:[%s2327_s19 + $0x90] sm:$0xff] %v319_v18  ;;  %322 = vst [vmem:[%s2327_s19 + $0x98] sm:$0xff] %v321_v19  ;;  %v325_v21 = vld [vmem:[%s2322_s23 + $0x150] sm:$0xff] }
  0x4f   : > { %324 = vst [vmem:[%s2327_s19 + $0xa0] sm:$0xff] %v323_v20  ;;  %v327_v22 = vld [vmem:[%s2322_s23 + $0x160] sm:$0xff]  ;;  %v329_v23 = vld [vmem:[%s2322_s23 + $0x170] sm:$0xff]  ;;  %326 = vst [vmem:[%s2327_s19 + $0xa8] sm:$0xff] %v325_v21 }
  0x50   : > { %328 = vst [vmem:[%s2327_s19 + $0xb0] sm:$0xff] %v327_v22  ;;  %330 = vst [vmem:[%s2327_s19 + $0xb8] sm:$0xff] %v329_v23  ;;  %v331_v24 = vld [vmem:[%s2322_s23 + $0x180] sm:$0xff]  ;;  %v333_v25 = vld [vmem:[%s2322_s23 + $0x190] sm:$0xff] }
  0x51   : > { %v335_v26 = vld [vmem:[%s2322_s23 + $0x1a0] sm:$0xff]  ;;  %332 = vst [vmem:[%s2327_s19 + $0xc0] sm:$0xff] %v331_v24  ;;  %334 = vst [vmem:[%s2327_s19 + $0xc8] sm:$0xff] %v333_v25  ;;  %v337_v27 = vld [vmem:[%s2322_s23 + $0x1b0] sm:$0xff] }
  0x52   : > { %336 = vst [vmem:[%s2327_s19 + $0xd0] sm:$0xff] %v335_v26  ;;  %v339_v28 = vld [vmem:[%s2322_s23 + $0x1c0] sm:$0xff]  ;;  %v341_v29 = vld [vmem:[%s2322_s23 + $0x1d0] sm:$0xff]  ;;  %338 = vst [vmem:[%s2327_s19 + $0xd8] sm:$0xff] %v337_v27 }
  0x53   : > { %340 = vst [vmem:[%s2327_s19 + $0xe0] sm:$0xff] %v339_v28  ;;  %342 = vst [vmem:[%s2327_s19 + $0xe8] sm:$0xff] %v341_v29  ;;  %v343_v30 = vld [vmem:[%s2322_s23 + $0x1e0] sm:$0xff]  ;;  %v345_v31 = vld [vmem:[%s2322_s23 + $0x1f0] sm:$0xff] }
  0x54   : > { %344 = vst [vmem:[%s2327_s19 + $0xf0] sm:$0xff] %v343_v30  ;;  %346 = vst [vmem:[%s2327_s19 + $0xf8] sm:$0xff] %v345_v31 }
  0x55 PF: > { %p1561_p10 = scmp.ge.s32.totalorder %s2174_s10, 1  ;;  %p351_p11 = scmp.lt.s32.totalorder %s2174_s10, 5 }
  0x57   : > { %p352_p12 = pnand %p1561_p10, %p351_p11 }
  0x58   : > { %s358_s12 = sand.u32 (!%p352_p12), 1, %s2150_s29   ;;  %s2862_s13 = sand.u32 (!%p352_p12), 1, %s2142_s27  }
  0x59   : > { %355 = sbr.rel (%p352_p12) target bundleno = 853 (0x355), region = 66  ;;  %s1562_s14 = sshll.u32 (!%p352_p12), %s358_s12, 8 }
  0x5a   : > { %s1563_s25 = sshll.u32 (!%p352_p12), %s2862_s13, 8  ;;  %s2396_s11 = scalar_lea.vmem (!%p352_p12), [#allocation6], %s1562_s14 }
  0x5b   : > { %s2398_s17 = scalar_lea.vmem (!%p352_p12), [#allocation7], %s1563_s25  ;;  %p1564_p13 = scmp.ne.s32.totalorder (!%p352_p12), %s2158_s6, 0 }
  0x60   : > { %396 = sbr.rel (%p1564_p13) target bundleno = 113 (0x71), region = 74  ;;  %v2178_v32 = vmov (!%p1564_p13), 0.0  }
  0x61   : > { %397 = vst [vmem:[#allocation2] sm:$0xff] (!%p1564_p13), %v2178_v32  ;;  %398 = vst [vmem:[#allocation2 + $0x8] sm:$0xff] (!%p1564_p13), %v2178_v32 }
  0x62   : > { %399 = vst [vmem:[#allocation2 + $0x10] sm:$0xff] (!%p1564_p13), %v2178_v32  ;;  %400 = vst [vmem:[#allocation2 + $0x18] sm:$0xff] (!%p1564_p13), %v2178_v32 }
  0x63   : > { %401 = vst [vmem:[#allocation2 + $0x20] sm:$0xff] (!%p1564_p13), %v2178_v32  ;;  %402 = vst [vmem:[#allocation2 + $0x28] sm:$0xff] (!%p1564_p13), %v2178_v32 }
  0x64   : > { %403 = vst [vmem:[#allocation2 + $0x30] sm:$0xff] (!%p1564_p13), %v2178_v32  ;;  %404 = vst [vmem:[#allocation2 + $0x38] sm:$0xff] (!%p1564_p13), %v2178_v32 }
  0x65   : > { %405 = vst [vmem:[#allocation2 + $0x40] sm:$0xff] (!%p1564_p13), %v2178_v32  ;;  %406 = vst [vmem:[#allocation2 + $0x48] sm:$0xff] (!%p1564_p13), %v2178_v32 }
  0x66   : > { %407 = vst [vmem:[#allocation2 + $0x50] sm:$0xff] (!%p1564_p13), %v2178_v32  ;;  %408 = vst [vmem:[#allocation2 + $0x58] sm:$0xff] (!%p1564_p13), %v2178_v32 }
  0x67   : > { %409 = vst [vmem:[#allocation2 + $0x60] sm:$0xff] %v2178_v32  ;;  %410 = vst [vmem:[#allocation2 + $0x68] sm:$0xff] %v2178_v32 }
  0x68   : > { %411 = vst [vmem:[#allocation2 + $0x70] sm:$0xff] %v2178_v32  ;;  %412 = vst [vmem:[#allocation2 + $0x78] sm:$0xff] %v2178_v32 }
  0x69   : > { %413 = vst [vmem:[#allocation2 + $0x80] sm:$0xff] %v2178_v32  ;;  %414 = vst [vmem:[#allocation2 + $0x88] sm:$0xff] %v2178_v32 }
  0x6a   : > { %415 = vst [vmem:[#allocation2 + $0x90] sm:$0xff] %v2178_v32  ;;  %416 = vst [vmem:[#allocation2 + $0x98] sm:$0xff] %v2178_v32 }
  0x6b   : > { %417 = vst [vmem:[#allocation2 + $0xa0] sm:$0xff] %v2178_v32  ;;  %418 = vst [vmem:[#allocation2 + $0xa8] sm:$0xff] %v2178_v32 }
  0x6c   : > { %419 = vst [vmem:[#allocation2 + $0xb0] sm:$0xff] %v2178_v32  ;;  %420 = vst [vmem:[#allocation2 + $0xb8] sm:$0xff] %v2178_v32 }
  0x6d   : > { %421 = vst [vmem:[#allocation2 + $0xc0] sm:$0xff] %v2178_v32  ;;  %422 = vst [vmem:[#allocation2 + $0xc8] sm:$0xff] %v2178_v32 }
  0x6e   : > { %423 = vst [vmem:[#allocation2 + $0xd0] sm:$0xff] %v2178_v32  ;;  %424 = vst [vmem:[#allocation2 + $0xd8] sm:$0xff] %v2178_v32 }
  0x6f   : > { %425 = vst [vmem:[#allocation2 + $0xe0] sm:$0xff] %v2178_v32  ;;  %426 = vst [vmem:[#allocation2 + $0xe8] sm:$0xff] %v2178_v32 }
  0x70   : > { %427 = vst [vmem:[#allocation2 + $0xf0] sm:$0xff] %v2178_v32  ;;  %428 = vst [vmem:[#allocation2 + $0xf8] sm:$0xff] %v2178_v32 }
  0x71 PF: > { %s429_s29 = sld [smem:[#allocation5 + %s2162_s7]] }
  0x77   : > { %p1565_p0 = scmp.ge.s32.totalorder %s2158_s6, %s429_s29 }
  0x78   : > { %s434_s20 = sshra.s32 (!%p1565_p0), %s2158_s6, 7  ;;  %s439_s0 = sand.u32 (!%p1565_p0), 127, %s2158_s6  ;;  %v1864_v33 = vld [vmem:[%s2396_s11 + $0x4] ss:$8 sps:$4 sm:$0xff] (!%p1565_p0)   ;;  %v1862_v51 = vld [vmem:[%s2396_s11] ss:$8 sps:$4 sm:$0xff] (!%p1565_p0)  }
  0x79   : > { %433 = sbr.rel (%p1565_p0) target bundleno = 443 (0x1bb), region = 78  ;;  %s436_s15 = sadd.s32 (!%p1565_p0), %s2162_s7, %s434_s20  ;;  %v1867_v34 = vld [vmem:[%s2396_s11 + $0x84] ss:$8 sps:$4 sm:$0xff] (!%p1565_p0)   ;;  %831 = vmatprep.mubr.bf16.mxu0 (!%p1565_p0), %v1864_v33  ;;  %v1865_v52 = vld [vmem:[%s2396_s11 + $0x80] ss:$8 sps:$4 sm:$0xff] (!%p1565_p0)  }
  0x7a   : > { %s1566_s24 = sshll.u32 (!%p1565_p0), %s436_s15, 7  ;;  %895 = vmatprep.mubr.bf16.mxu1 (!%p1565_p0), %v1867_v34  ;;  %v1868_v53 = vld [vmem:[%s2396_s11 + $0x14] ss:$8 sps:$4 sm:$0xff] (!%p1565_p0)   ;;  %v1872_v55 = vld [vmem:[%s2396_s11 + $0x10] ss:$8 sps:$4 sm:$0xff] (!%p1565_p0)   ;;  %v443_v19 = vld [vmem:[#allocation2] sm:$0xff] (!%p1565_p0) }
  0x7b   : > { %s440_s21 = sadd.s32 (!%p1565_p0), %s1566_s24, %s439_s0  ;;  %v1870_v54 = vld [vmem:[%s2396_s11 + $0x94] ss:$8 sps:$4 sm:$0xff] (!%p1565_p0)   ;;  %v1873_v56 = vld [vmem:[%s2396_s11 + $0x90] ss:$8 sps:$4 sm:$0xff] (!%p1565_p0)   ;;  %v1874_v57 = vld [vmem:[%s2396_s11 + $0x24] ss:$8 sps:$4 sm:$0xff] (!%p1565_p0)  }
  0x7c   : > { %s441_s23 = sld [smem:[#allocation4 + %s440_s21]] (!%p1565_p0)  ;;  %v1876_v58 = vld [vmem:[%s2396_s11 + $0xa4] ss:$8 sps:$4 sm:$0xff] (!%p1565_p0)   ;;  %v1878_v59 = vld [vmem:[%s2396_s11 + $0x20] ss:$8 sps:$4 sm:$0xff] (!%p1565_p0)  }
  0x7d   : > { %v1879_v60 = vld [vmem:[%s2396_s11 + $0xa0] ss:$8 sps:$4 sm:$0xff] (!%p1565_p0)   ;;  %v1880_v61 = vld [vmem:[%s2396_s11 + $0x34] ss:$8 sps:$4 sm:$0xff] (!%p1565_p0)   ;;  %v1884_v63 = vld [vmem:[%s2396_s11 + $0x30] ss:$8 sps:$4 sm:$0xff] (!%p1565_p0)  }
  0x7e   : > { %v1882_v62 = vld [vmem:[%s2396_s11 + $0xb4] ss:$8 sps:$4 sm:$0xff] (!%p1565_p0)   ;;  %v1885_v0 = vld [vmem:[%s2396_s11 + $0xb0] ss:$8 sps:$4 sm:$0xff] (!%p1565_p0)   ;;  %v1886_v1 = vld [vmem:[%s2396_s11 + $0x44] ss:$8 sps:$4 sm:$0xff] (!%p1565_p0)  }
  0x7f   : > { %v1888_v2 = vld [vmem:[%s2396_s11 + $0xc4] ss:$8 sps:$4 sm:$0xff] (!%p1565_p0)   ;;  %v1890_v3 = vld [vmem:[%s2396_s11 + $0x40] ss:$8 sps:$4 sm:$0xff] (!%p1565_p0)   ;;  %v1892_v5 = vld [vmem:[%s2396_s11 + $0x54] ss:$8 sps:$4 sm:$0xff] (!%p1565_p0)  }
  0x80   : > { %v1891_v4 = vld [vmem:[%s2396_s11 + $0xc0] ss:$8 sps:$4 sm:$0xff]   ;;  %v1894_v6 = vld [vmem:[%s2396_s11 + $0xd4] ss:$8 sps:$4 sm:$0xff]   ;;  %v1896_v7 = vld [vmem:[%s2396_s11 + $0x50] ss:$8 sps:$4 sm:$0xff]  }
  0x81   : > { %v1897_v8 = vld [vmem:[%s2396_s11 + $0xd0] ss:$8 sps:$4 sm:$0xff]   ;;  %v1898_v9 = vld [vmem:[%s2396_s11 + $0x64] ss:$8 sps:$4 sm:$0xff]   ;;  %v1902_v11 = vld [vmem:[%s2396_s11 + $0x60] ss:$8 sps:$4 sm:$0xff]  }
  0x82   : > { %s1567_s19 = sshll.u32 %s441_s23, 8  ;;  %v1900_v10 = vld [vmem:[%s2396_s11 + $0xe4] ss:$8 sps:$4 sm:$0xff]   ;;  %v1903_v12 = vld [vmem:[%s2396_s11 + $0xe0] ss:$8 sps:$4 sm:$0xff]  }
  0x83   : > { %s507_s12 = sshra.s32 %s1567_s19, 3  ;;  %v1904_v13 = vld [vmem:[%s2396_s11 + $0x74] ss:$8 sps:$4 sm:$0xff]   ;;  %v1908_v15 = vld [vmem:[%s2396_s11 + $0x70] ss:$8 sps:$4 sm:$0xff]   ;;  %v459_v21 = vld [vmem:[#allocation2 + $0x80] sm:$0xff] }
  0x84   : > { %s1568_s14 = sshll.u32 %s507_s12, 2  ;;  %v1906_v14 = vld [vmem:[%s2396_s11 + $0xf4] ss:$8 sps:$4 sm:$0xff]   ;;  %v1909_v16 = vld [vmem:[%s2396_s11 + $0xf0] ss:$8 sps:$4 sm:$0xff]   ;;  %v444_v27 = vld [vmem:[#allocation2 + $0x8] sm:$0xff] }
  0x85   : > { %s2411_s13 = scalar_lea.vmem %s2856_s3, %s1568_s14  ;;  %v460_v29 = vld [vmem:[#allocation2 + $0x88] sm:$0xff] }
  0x86   : > { %v1846_v35 = vld [vmem:[%s2411_s13 + $0x40] sm:$0xff]   ;;  %v1848_v37 = vld [vmem:[%s2411_s13 + $0x48] sm:$0xff]   ;;  %v1850_v39 = vld [vmem:[%s2411_s13 + $0x50] sm:$0xff]  }
  0x87   : > { %v1847_v36 = vld [vmem:[%s2411_s13] sm:$0xff]   ;;  %1626 = vmatprep.subr.bf16.mxu0 %v1846_v35  ;;  %1738 = vmatprep.subr.bf16.mxu1 %v1846_v35  ;;  %v1849_v38 = vld [vmem:[%s2411_s13 + $0x8] sm:$0xff]   ;;  %v1851_v40 = vld [vmem:[%s2411_s13 + $0x10] sm:$0xff]  }
  0x88   : > { %1627 = vmatpush3.bf16.msra.mxu0 %v1847_v36  ;;  %1746 = vmatpush3.bf16.msra.mxu1 %v1847_v36  ;;  %v1852_v41 = vld [vmem:[%s2411_s13 + $0x58] sm:$0xff]   ;;  %v1854_v43 = vld [vmem:[%s2411_s13 + $0x60] sm:$0xff]   ;;  %v1856_v45 = vld [vmem:[%s2411_s13 + $0x68] sm:$0xff]  }
  0x89   : > { %1628 = vmatprep.subr.bf16.mxu0 %v1848_v37  ;;  %1739 = vmatprep.subr.bf16.mxu1 %v1848_v37  ;;  %v1853_v42 = vld [vmem:[%s2411_s13 + $0x18] sm:$0xff]   ;;  %v1855_v44 = vld [vmem:[%s2411_s13 + $0x20] sm:$0xff]   ;;  %v1857_v46 = vld [vmem:[%s2411_s13 + $0x28] sm:$0xff]  }
  0x8a   : > { %v1858_v47 = vld [vmem:[%s2411_s13 + $0x70] sm:$0xff]   ;;  %v1860_v49 = vld [vmem:[%s2411_s13 + $0x78] sm:$0xff]  }
  0x8b   : > { %v1859_v48 = vld [vmem:[%s2411_s13 + $0x30] sm:$0xff]   ;;  %v1861_v50 = vld [vmem:[%s2411_s13 + $0x38] sm:$0xff]  }
  0x8c   : > { %1629 = vmatpush3.bf16.msra.mxu0 %v1849_v38  ;;  %1747 = vmatpush3.bf16.msra.mxu1 %v1849_v38 }
  0x8d   : > { %1630 = vmatprep.subr.bf16.mxu0 %v1850_v39  ;;  %1740 = vmatprep.subr.bf16.mxu1 %v1850_v39  ;;  %v445_v39 = vld [vmem:[#allocation2 + $0x10] sm:$0xff] }
  0x90   : > { %1631 = vmatpush3.bf16.msra.mxu0 %v1851_v40  ;;  %1748 = vmatpush3.bf16.msra.mxu1 %v1851_v40 }
  0x91   : > { %1632 = vmatprep.subr.bf16.mxu0 %v1852_v41  ;;  %1741 = vmatprep.subr.bf16.mxu1 %v1852_v41  ;;  %v461_v41 = vld [vmem:[#allocation2 + $0x90] sm:$0xff] }
  0x94   : > { %1633 = vmatpush3.bf16.msra.mxu0 %v1853_v42  ;;  %1749 = vmatpush3.bf16.msra.mxu1 %v1853_v42 }
  0x95   : > { %1634 = vmatprep.subr.bf16.mxu0 %v1854_v43  ;;  %1742 = vmatprep.subr.bf16.mxu1 %v1854_v43 }
  0x98   : > { %1635 = vmatpush3.bf16.msra.mxu0 %v1855_v44  ;;  %1750 = vmatpush3.bf16.msra.mxu1 %v1855_v44 }
  0x99   : > { %1636 = vmatprep.subr.bf16.mxu0 %v1856_v45  ;;  %1743 = vmatprep.subr.bf16.mxu1 %v1856_v45 }
  0x9c   : > { %1637 = vmatpush3.bf16.msra.mxu0 %v1857_v46  ;;  %1751 = vmatpush3.bf16.msra.mxu1 %v1857_v46 }
  0x9d   : > { %1638 = vmatprep.subr.bf16.mxu0 %v1858_v47  ;;  %1744 = vmatprep.subr.bf16.mxu1 %v1858_v47  ;;  %v446_v47 = vld [vmem:[#allocation2 + $0x18] sm:$0xff] }
  0xa0   : > { %1639 = vmatpush3.bf16.msra.mxu0 %v1859_v48  ;;  %1752 = vmatpush3.bf16.msra.mxu1 %v1859_v48 }
  0xa1   : > { %1640 = vmatprep.subr.bf16.mxu0 %v1860_v49  ;;  %1745 = vmatprep.subr.bf16.mxu1 %v1860_v49  ;;  %v462_v49 = vld [vmem:[#allocation2 + $0x98] sm:$0xff] }
  0xa4   : > { %1641 = vmatpush3.bf16.msra.mxu0 %v1861_v50  ;;  %1753 = vmatpush3.bf16.msra.mxu1 %v1861_v50 }
  0xa7   : > { %832 = vmatmul.mubr.bf16.vlgmr.msra.gmra.mrb[0].mxu0 %v1862_v51  ;;  %896 = vmatmul.mubr.bf16.vlgmr.msra.gmra.mrb[0].mxu1 %v1865_v52 }
  0xa8   : > { %839 = vmatprep.mubr.bf16.mxu0 %v1868_v53  ;;  %903 = vmatprep.mubr.bf16.mxu1 %v1870_v54 }
  0xaf   : > { %840 = vmatmul.mubr.bf16.gmra.mrb[4].mxu0 %v1872_v55  ;;  %904 = vmatmul.mubr.bf16.gmra.mrb[4].mxu1 %v1873_v56 }
  0xb0   : > { %847 = vmatprep.mubr.bf16.mxu0 %v1874_v57  ;;  %911 = vmatprep.mubr.bf16.mxu1 %v1876_v58 }
  0xb7   : > { %848 = vmatmul.mubr.bf16.gmra.mrb[8].mxu0 %v1878_v59  ;;  %912 = vmatmul.mubr.bf16.gmra.mrb[8].mxu1 %v1879_v60  ;;  %v447_v59 = vld [vmem:[#allocation2 + $0x20] sm:$0xff] }
  0xb8   : > { %855 = vmatprep.mubr.bf16.mxu0 %v1880_v61  ;;  %919 = vmatprep.mubr.bf16.mxu1 %v1882_v62  ;;  %v463_v61 = vld [vmem:[#allocation2 + $0xa0] sm:$0xff] }
  0xbf   : > { %856 = vmatmul.mubr.bf16.gmra.mrb[12].mxu0 %v1884_v63  ;;  %920 = vmatmul.mubr.bf16.gmra.mrb[12].mxu1 %v1885_v0 }
  0xc0   : > { %863 = vmatprep.mubr.bf16.mxu0 %v1886_v1  ;;  %927 = vmatprep.mubr.bf16.mxu1 %v1888_v2 }
  0xc7   : > { %864 = vmatmul.mubr.bf16.gmra.mrb[16].mxu0 %v1890_v3  ;;  %928 = vmatmul.mubr.bf16.gmra.mrb[16].mxu1 %v1891_v4  ;;  %v448_v3 = vld [vmem:[#allocation2 + $0x28] sm:$0xff] }
  0xc8   : > { %871 = vmatprep.mubr.bf16.mxu0 %v1892_v5  ;;  %935 = vmatprep.mubr.bf16.mxu1 %v1894_v6  ;;  %v464_v5 = vld [vmem:[#allocation2 + $0xa8] sm:$0xff] }
  0xcf   : > { %872 = vmatmul.mubr.bf16.gmra.mrb[20].mxu0 %v1896_v7  ;;  %936 = vmatmul.mubr.bf16.gmra.mrb[20].mxu1 %v1897_v8 }
  0xd0   : > { %879 = vmatprep.mubr.bf16.mxu0 %v1898_v9  ;;  %943 = vmatprep.mubr.bf16.mxu1 %v1900_v10 }
  0xd7   : > { %880 = vmatmul.mubr.bf16.gmra.mrb[24].mxu0 %v1902_v11  ;;  %944 = vmatmul.mubr.bf16.gmra.mrb[24].mxu1 %v1903_v12 }
  0xd8   : > { %887 = vmatprep.mubr.bf16.mxu0 %v1904_v13  ;;  %951 = vmatprep.mubr.bf16.mxu1 %v1906_v14 }
  0xdf   : > { %888 = vmatmul.mubr.bf16.gmra.mrb[28].mxu0 %v1908_v15  ;;  %952 = vmatmul.mubr.bf16.gmra.mrb[28].mxu1 %v1909_v16  ;;  %v449_v15 = vld [vmem:[#allocation2 + $0x30] sm:$0xff] }
 0x17a   : > { %v1642_v17 = vpop.f32.mrb[0].mxu0  ;;  %v1690_v18 = vpop.f32.mrb[0].mxu1 }
 0x17b   : > { %v1643_v20 = vpop.f32.mrb[1].mxu0  ;;  %v1691_v22 = vpop.f32.mrb[1].mxu1 }
 0x17c   : > { %v1644_v23 = vadd.f32 %v1643_v20, %v1642_v17  ;;  %v1692_v24 = vadd.f32 %v1691_v22, %v1690_v18  ;;  %v1645_v25 = vpop.f32.mrb[2].mxu0  ;;  %v1693_v26 = vpop.f32.mrb[2].mxu1  ;;  %v465_v17 = vld [vmem:[#allocation2 + $0xb0] sm:$0xff] }
 0x17d   : > { %v1646_v28 = vpop.f32.mrb[3].mxu0  ;;  %v1694_v30 = vpop.f32.mrb[3].mxu1 }
 0x17e   : > { %v960_v31 = vadd.f32 %v1644_v23, %v443_v19  ;;  %v976_v32 = vadd.f32 %v1692_v24, %v459_v21  ;;  %v1647_v33 = vadd.f32 %v1646_v28, %v1645_v25  ;;  %v1695_v34 = vadd.f32 %v1694_v30, %v1693_v26  ;;  %v450_v23 = vld [vmem:[#allocation2 + $0x38] sm:$0xff] }
 0x17f   : > { %v466_v25 = vld [vmem:[#allocation2 + $0xb8] sm:$0xff] }
 0x180   : > { %992 = vst [vmem:[#allocation2] sm:$0xff] %v960_v31  ;;  %1008 = vst [vmem:[#allocation2 + $0x80] sm:$0xff] %v976_v32  ;;  %v961_v35 = vadd.f32 %v1647_v33, %v444_v27  ;;  %v977_v36 = vadd.f32 %v1695_v34, %v460_v29 }
 0x182   : > { %993 = vst [vmem:[#allocation2 + $0x8] sm:$0xff] %v961_v35  ;;  %1009 = vst [vmem:[#allocation2 + $0x88] sm:$0xff] %v977_v36  ;;  %v1648_v37 = vpop.f32.mrb[4].mxu0  ;;  %v1696_v38 = vpop.f32.mrb[4].mxu1  ;;  %v451_v35 = vld [vmem:[#allocation2 + $0x40] sm:$0xff] }
 0x183   : > { %v1649_v40 = vpop.f32.mrb[5].mxu0  ;;  %v1697_v42 = vpop.f32.mrb[5].mxu1 }
 0x184   : > { %v1650_v43 = vadd.f32 %v1649_v40, %v1648_v37  ;;  %v1698_v44 = vadd.f32 %v1697_v42, %v1696_v38  ;;  %v1651_v45 = vpop.f32.mrb[6].mxu0  ;;  %v1699_v46 = vpop.f32.mrb[6].mxu1  ;;  %v467_v37 = vld [vmem:[#allocation2 + $0xc0] sm:$0xff] }
 0x185   : > { %v1652_v48 = vpop.f32.mrb[7].mxu0  ;;  %v1700_v50 = vpop.f32.mrb[7].mxu1 }
 0x186   : > { %v962_v51 = vadd.f32 %v1650_v43, %v445_v39  ;;  %v978_v52 = vadd.f32 %v1698_v44, %v461_v41  ;;  %v1653_v53 = vadd.f32 %v1652_v48, %v1651_v45  ;;  %v1701_v54 = vadd.f32 %v1700_v50, %v1699_v46  ;;  %v452_v43 = vld [vmem:[#allocation2 + $0x48] sm:$0xff] }
 0x187   : > { %v468_v45 = vld [vmem:[#allocation2 + $0xc8] sm:$0xff] }
 0x188   : > { %994 = vst [vmem:[#allocation2 + $0x10] sm:$0xff] %v962_v51  ;;  %1010 = vst [vmem:[#allocation2 + $0x90] sm:$0xff] %v978_v52  ;;  %v963_v55 = vadd.f32 %v1653_v53, %v446_v47  ;;  %v979_v56 = vadd.f32 %v1701_v54, %v462_v49 }
 0x18a   : > { %995 = vst [vmem:[#allocation2 + $0x18] sm:$0xff] %v963_v55  ;;  %1011 = vst [vmem:[#allocation2 + $0x98] sm:$0xff] %v979_v56  ;;  %v1654_v57 = vpop.f32.mrb[8].mxu0  ;;  %v1702_v58 = vpop.f32.mrb[8].mxu1  ;;  %v453_v55 = vld [vmem:[#allocation2 + $0x50] sm:$0xff] }
 0x18b   : > { %v1655_v60 = vpop.f32.mrb[9].mxu0  ;;  %v1703_v62 = vpop.f32.mrb[9].mxu1 }
 0x18c   : > { %v1656_v63 = vadd.f32 %v1655_v60, %v1654_v57  ;;  %v1704_v0 = vadd.f32 %v1703_v62, %v1702_v58  ;;  %v1657_v1 = vpop.f32.mrb[10].mxu0  ;;  %v1705_v2 = vpop.f32.mrb[10].mxu1  ;;  %v469_v57 = vld [vmem:[#allocation2 + $0xd0] sm:$0xff] }
 0x18d   : > { %v1658_v4 = vpop.f32.mrb[11].mxu0  ;;  %v1706_v6 = vpop.f32.mrb[11].mxu1 }
 0x18e   : > { %v964_v7 = vadd.f32 %v1656_v63, %v447_v59  ;;  %v980_v8 = vadd.f32 %v1704_v0, %v463_v61  ;;  %v1659_v9 = vadd.f32 %v1658_v4, %v1657_v1  ;;  %v1707_v10 = vadd.f32 %v1706_v6, %v1705_v2  ;;  %v454_v63 = vld [vmem:[#allocation2 + $0x58] sm:$0xff] }
 0x18f   : > { %v470_v1 = vld [vmem:[#allocation2 + $0xd8] sm:$0xff] }
 0x190   : > { %996 = vst [vmem:[#allocation2 + $0x20] sm:$0xff] %v964_v7  ;;  %1012 = vst [vmem:[#allocation2 + $0xa0] sm:$0xff] %v980_v8  ;;  %v965_v11 = vadd.f32 %v1659_v9, %v448_v3  ;;  %v981_v12 = vadd.f32 %v1707_v10, %v464_v5 }
 0x192   : > { %997 = vst [vmem:[#allocation2 + $0x28] sm:$0xff] %v965_v11  ;;  %1013 = vst [vmem:[#allocation2 + $0xa8] sm:$0xff] %v981_v12  ;;  %v1660_v13 = vpop.f32.mrb[12].mxu0  ;;  %v1708_v14 = vpop.f32.mrb[12].mxu1  ;;  %v455_v11 = vld [vmem:[#allocation2 + $0x60] sm:$0xff] }
 0x193   : > { %v1661_v16 = vpop.f32.mrb[13].mxu0  ;;  %v1709_v18 = vpop.f32.mrb[13].mxu1 }
 0x194   : > { %v1662_v19 = vadd.f32 %v1661_v16, %v1660_v13  ;;  %v1710_v20 = vadd.f32 %v1709_v18, %v1708_v14  ;;  %v1663_v21 = vpop.f32.mrb[14].mxu0  ;;  %v1711_v22 = vpop.f32.mrb[14].mxu1  ;;  %v471_v13 = vld [vmem:[#allocation2 + $0xe0] sm:$0xff] }
 0x195   : > { %v1664_v24 = vpop.f32.mrb[15].mxu0  ;;  %v1712_v26 = vpop.f32.mrb[15].mxu1 }
 0x196   : > { %v966_v27 = vadd.f32 %v1662_v19, %v449_v15  ;;  %v982_v28 = vadd.f32 %v1710_v20, %v465_v17  ;;  %v1665_v29 = vadd.f32 %v1664_v24, %v1663_v21  ;;  %v1713_v30 = vadd.f32 %v1712_v26, %v1711_v22  ;;  %v456_v19 = vld [vmem:[#allocation2 + $0x68] sm:$0xff] }
 0x197   : > { %v472_v21 = vld [vmem:[#allocation2 + $0xe8] sm:$0xff] }
 0x198   : > { %998 = vst [vmem:[#allocation2 + $0x30] sm:$0xff] %v966_v27  ;;  %1014 = vst [vmem:[#allocation2 + $0xb0] sm:$0xff] %v982_v28  ;;  %v967_v31 = vadd.f32 %v1665_v29, %v450_v23  ;;  %v983_v32 = vadd.f32 %v1713_v30, %v466_v25 }
 0x19a   : > { %999 = vst [vmem:[#allocation2 + $0x38] sm:$0xff] %v967_v31  ;;  %1015 = vst [vmem:[#allocation2 + $0xb8] sm:$0xff] %v983_v32  ;;  %v1666_v33 = vpop.f32.mrb[16].mxu0  ;;  %v1714_v34 = vpop.f32.mrb[16].mxu1  ;;  %v457_v31 = vld [vmem:[#allocation2 + $0x70] sm:$0xff] }
 0x19b   : > { %v1667_v36 = vpop.f32.mrb[17].mxu0  ;;  %v1715_v38 = vpop.f32.mrb[17].mxu1 }
 0x19c   : > { %v1668_v39 = vadd.f32 %v1667_v36, %v1666_v33  ;;  %v1716_v40 = vadd.f32 %v1715_v38, %v1714_v34  ;;  %v1669_v41 = vpop.f32.mrb[18].mxu0  ;;  %v1717_v42 = vpop.f32.mrb[18].mxu1  ;;  %v473_v33 = vld [vmem:[#allocation2 + $0xf0] sm:$0xff] }
 0x19d   : > { %v1670_v44 = vpop.f32.mrb[19].mxu0  ;;  %v1718_v46 = vpop.f32.mrb[19].mxu1 }
 0x19e   : > { %v968_v47 = vadd.f32 %v1668_v39, %v451_v35  ;;  %v984_v48 = vadd.f32 %v1716_v40, %v467_v37  ;;  %v1671_v49 = vadd.f32 %v1670_v44, %v1669_v41  ;;  %v1719_v50 = vadd.f32 %v1718_v46, %v1717_v42  ;;  %v458_v39 = vld [vmem:[#allocation2 + $0x78] sm:$0xff] }
 0x19f   : > { %v474_v41 = vld [vmem:[#allocation2 + $0xf8] sm:$0xff] }
 0x1a0   : > { %1000 = vst [vmem:[#allocation2 + $0x40] sm:$0xff] %v968_v47  ;;  %1016 = vst [vmem:[#allocation2 + $0xc0] sm:$0xff] %v984_v48  ;;  %v969_v51 = vadd.f32 %v1671_v49, %v452_v43  ;;  %v985_v52 = vadd.f32 %v1719_v50, %v468_v45 }
 0x1a2   : > { %1001 = vst [vmem:[#allocation2 + $0x48] sm:$0xff] %v969_v51  ;;  %1017 = vst [vmem:[#allocation2 + $0xc8] sm:$0xff] %v985_v52  ;;  %v1672_v53 = vpop.f32.mrb[20].mxu0  ;;  %v1720_v54 = vpop.f32.mrb[20].mxu1 }
 0x1a3   : > { %v1673_v56 = vpop.f32.mrb[21].mxu0  ;;  %v1721_v58 = vpop.f32.mrb[21].mxu1 }
 0x1a4   : > { %v1674_v59 = vadd.f32 %v1673_v56, %v1672_v53  ;;  %v1722_v60 = vadd.f32 %v1721_v58, %v1720_v54  ;;  %v1675_v61 = vpop.f32.mrb[22].mxu0  ;;  %v1723_v62 = vpop.f32.mrb[22].mxu1 }
 0x1a5   : > { %v1676_v0 = vpop.f32.mrb[23].mxu0  ;;  %v1724_v2 = vpop.f32.mrb[23].mxu1 }
 0x1a6   : > { %v970_v3 = vadd.f32 %v1674_v59, %v453_v55  ;;  %v986_v4 = vadd.f32 %v1722_v60, %v469_v57  ;;  %v1677_v5 = vadd.f32 %v1676_v0, %v1675_v61  ;;  %v1725_v6 = vadd.f32 %v1724_v2, %v1723_v62 }
 0x1a8   : > { %1002 = vst [vmem:[#allocation2 + $0x50] sm:$0xff] %v970_v3  ;;  %1018 = vst [vmem:[#allocation2 + $0xd0] sm:$0xff] %v986_v4  ;;  %v971_v7 = vadd.f32 %v1677_v5, %v454_v63  ;;  %v987_v8 = vadd.f32 %v1725_v6, %v470_v1 }
 0x1aa   : > { %1003 = vst [vmem:[#allocation2 + $0x58] sm:$0xff] %v971_v7  ;;  %1019 = vst [vmem:[#allocation2 + $0xd8] sm:$0xff] %v987_v8  ;;  %v1678_v9 = vpop.f32.mrb[24].mxu0  ;;  %v1726_v10 = vpop.f32.mrb[24].mxu1 }
 0x1ab   : > { %v1679_v12 = vpop.f32.mrb[25].mxu0  ;;  %v1727_v14 = vpop.f32.mrb[25].mxu1 }
 0x1ac   : > { %v1680_v15 = vadd.f32 %v1679_v12, %v1678_v9  ;;  %v1728_v16 = vadd.f32 %v1727_v14, %v1726_v10  ;;  %v1681_v17 = vpop.f32.mrb[26].mxu0  ;;  %v1729_v18 = vpop.f32.mrb[26].mxu1 }
 0x1ad   : > { %v1682_v20 = vpop.f32.mrb[27].mxu0  ;;  %v1730_v22 = vpop.f32.mrb[27].mxu1 }
 0x1ae   : > { %v972_v23 = vadd.f32 %v1680_v15, %v455_v11  ;;  %v988_v24 = vadd.f32 %v1728_v16, %v471_v13  ;;  %v1683_v25 = vadd.f32 %v1682_v20, %v1681_v17  ;;  %v1731_v26 = vadd.f32 %v1730_v22, %v1729_v18 }
 0x1b0   : > { %1004 = vst [vmem:[#allocation2 + $0x60] sm:$0xff] %v972_v23  ;;  %1020 = vst [vmem:[#allocation2 + $0xe0] sm:$0xff] %v988_v24  ;;  %v973_v27 = vadd.f32 %v1683_v25, %v456_v19  ;;  %v989_v28 = vadd.f32 %v1731_v26, %v472_v21 }
 0x1b2   : > { %1005 = vst [vmem:[#allocation2 + $0x68] sm:$0xff] %v973_v27  ;;  %1021 = vst [vmem:[#allocation2 + $0xe8] sm:$0xff] %v989_v28  ;;  %v1684_v29 = vpop.f32.mrb[28].mxu0  ;;  %v1732_v30 = vpop.f32.mrb[28].mxu1 }
 0x1b3   : > { %v1685_v32 = vpop.f32.mrb[29].mxu0  ;;  %v1733_v34 = vpop.f32.mrb[29].mxu1 }
 0x1b4   : > { %v1686_v35 = vadd.f32 %v1685_v32, %v1684_v29  ;;  %v1734_v36 = vadd.f32 %v1733_v34, %v1732_v30  ;;  %v1687_v37 = vpop.f32.mrb[30].mxu0  ;;  %v1735_v38 = vpop.f32.mrb[30].mxu1 }
 0x1b5   : > { %v1688_v40 = vpop.f32.mrb[31].mxu0  ;;  %v1736_v42 = vpop.f32.mrb[31].mxu1 }
 0x1b6   : > { %v974_v43 = vadd.f32 %v1686_v35, %v457_v31  ;;  %v990_v44 = vadd.f32 %v1734_v36, %v473_v33  ;;  %v1689_v45 = vadd.f32 %v1688_v40, %v1687_v37  ;;  %v1737_v46 = vadd.f32 %v1736_v42, %v1735_v38 }
 0x1b8   : > { %1006 = vst [vmem:[#allocation2 + $0x70] sm:$0xff] %v974_v43  ;;  %1022 = vst [vmem:[#allocation2 + $0xf0] sm:$0xff] %v990_v44  ;;  %v975_v47 = vadd.f32 %v1689_v45, %v458_v39  ;;  %v991_v48 = vadd.f32 %v1737_v46, %v474_v41 }
 0x1ba   : > { %1007 = vst [vmem:[#allocation2 + $0x78] sm:$0xff] %v975_v47  ;;  %1023 = vst [vmem:[#allocation2 + $0xf8] sm:$0xff] %v991_v48 }
 0x1bb PF: > { %p1617_p1 = scmp.ne.s32.totalorder %s2158_s6, 1 }
 0x1bc   : > { %v1028_v49 = vld [vmem:[#allocation2] sm:$0xff] (!%p1617_p1)  ;;  %v1030_v51 = vld [vmem:[#allocation2 + $0x10] sm:$0xff] (!%p1617_p1)  ;;  %v1029_v54 = vld [vmem:[#allocation2 + $0x8] sm:$0xff] (!%p1617_p1) }
 0x1bd   : > { %1027 = sbr.rel (%p1617_p1) target bundleno = 827 (0x33b), region = 82  ;;  %v2463_v50 = vld [vmem:[%s2857_s4] ss:$0 sm:$0xff] (!%p1617_p1)  ;;  %v1031_v55 = vld [vmem:[#allocation2 + $0x18] sm:$0xff] (!%p1617_p1)  ;;  %v1033_v59 = vld [vmem:[#allocation2 + $0x28] sm:$0xff] (!%p1617_p1) }
 0x1be   : > { %v2466_v52 = vadd.f32 (!%p1617_p1), %v2463_v50, %v1028_v49  ;;  %v2469_v53 = vadd.f32 (!%p1617_p1), %v2463_v50, %v1030_v51  ;;  %v2474_v56 = vadd.f32 (!%p1617_p1), %v2463_v50, %v1029_v54  ;;  %v2477_v57 = vadd.f32 (!%p1617_p1), %v2463_v50, %v1031_v55  ;;  %v1032_v58 = vld [vmem:[#allocation2 + $0x20] sm:$0xff] (!%p1617_p1)  ;;  %v1034_v62 = vld [vmem:[#allocation2 + $0x30] sm:$0xff] (!%p1617_p1)  ;;  %v1035_v63 = vld [vmem:[#allocation2 + $0x38] sm:$0xff] (!%p1617_p1) }
 0x1bf   : > { %v2482_v60 = vadd.f32 (!%p1617_p1), %v2463_v50, %v1032_v58  ;;  %v2485_v61 = vadd.f32 (!%p1617_p1), %v2463_v50, %v1033_v59  ;;  %v2490_v0 = vadd.f32 (!%p1617_p1), %v2463_v50, %v1034_v62  ;;  %v2493_v1 = vadd.f32 (!%p1617_p1), %v2463_v50, %v1035_v63  ;;  %v1036_v2 = vld [vmem:[#allocation2 + $0x40] sm:$0xff] (!%p1617_p1)  ;;  %v1037_v3 = vld [vmem:[#allocation2 + $0x48] sm:$0xff] (!%p1617_p1)  ;;  %v1038_v6 = vld [vmem:[#allocation2 + $0x50] sm:$0xff] (!%p1617_p1) }
 0x1c0   : > { %1099 = vmax.xlane.f32.xlu0 (!%p1617_p1), %v2466_v52  ;;  %1103 = vmax.xlane.f32.xlu1 (!%p1617_p1), %v2469_v53  ;;  %v2498_v4 = vadd.f32 (!%p1617_p1), %v2463_v50, %v1036_v2  ;;  %v2501_v5 = vadd.f32 (!%p1617_p1), %v2463_v50, %v1037_v3  ;;  %v1039_v7 = vld [vmem:[#allocation2 + $0x58] sm:$0xff] (!%p1617_p1)  ;;  %v2506_v8 = vadd.f32 (!%p1617_p1), %v2463_v50, %v1038_v6  ;;  %v1040_v10 = vld [vmem:[#allocation2 + $0x60] sm:$0xff] (!%p1617_p1)  ;;  %v1041_v11 = vld [vmem:[#allocation2 + $0x68] sm:$0xff] (!%p1617_p1) }
 0x1c1   : > { %v2509_v9 = vadd.f32 (!%p1617_p1), %v2463_v50, %v1039_v7  ;;  %v2514_v12 = vadd.f32 (!%p1617_p1), %v2463_v50, %v1040_v10  ;;  %v2517_v13 = vadd.f32 (!%p1617_p1), %v2463_v50, %v1041_v11  ;;  %v1042_v14 = vld [vmem:[#allocation2 + $0x70] sm:$0xff] (!%p1617_p1)  ;;  %v1043_v15 = vld [vmem:[#allocation2 + $0x78] sm:$0xff] (!%p1617_p1)  ;;  %v1044_v18 = vld [vmem:[#allocation2 + $0x80] sm:$0xff] (!%p1617_p1) }
 0x1c2   : > { %v2522_v16 = vadd.f32 (!%p1617_p1), %v2463_v50, %v1042_v14  ;;  %v2525_v17 = vadd.f32 (!%p1617_p1), %v2463_v50, %v1043_v15  ;;  %v1045_v19 = vld [vmem:[#allocation2 + $0x88] sm:$0xff] (!%p1617_p1)  ;;  %v2530_v20 = vadd.f32 (!%p1617_p1), %v2463_v50, %v1044_v18  ;;  %v1046_v22 = vld [vmem:[#allocation2 + $0x90] sm:$0xff] (!%p1617_p1)  ;;  %v1047_v23 = vld [vmem:[#allocation2 + $0x98] sm:$0xff] (!%p1617_p1) }
 0x1c3   : > { %v2533_v21 = vadd.f32 (!%p1617_p1), %v2463_v50, %v1045_v19  ;;  %v2538_v24 = vadd.f32 (!%p1617_p1), %v2463_v50, %v1046_v22  ;;  %v2541_v25 = vadd.f32 (!%p1617_p1), %v2463_v50, %v1047_v23  ;;  %v1048_v26 = vld [vmem:[#allocation2 + $0xa0] sm:$0xff] (!%p1617_p1)  ;;  %v1049_v27 = vld [vmem:[#allocation2 + $0xa8] sm:$0xff] (!%p1617_p1)  ;;  %v1050_v30 = vld [vmem:[#allocation2 + $0xb0] sm:$0xff] (!%p1617_p1) }
 0x1c4   : > { %1101 = vmax.xlane.f32.xlu0 %v2474_v56  ;;  %1105 = vmax.xlane.f32.xlu1 %v2477_v57  ;;  %v2546_v28 = vadd.f32 %v2463_v50, %v1048_v26  ;;  %v2549_v29 = vadd.f32 %v2463_v50, %v1049_v27  ;;  %v1051_v31 = vld [vmem:[#allocation2 + $0xb8] sm:$0xff]  ;;  %v2554_v32 = vadd.f32 %v2463_v50, %v1050_v30  ;;  %v1052_v34 = vld [vmem:[#allocation2 + $0xc0] sm:$0xff]  ;;  %v1053_v35 = vld [vmem:[#allocation2 + $0xc8] sm:$0xff] }
 0x1c5   : > { %v2557_v33 = vadd.f32 %v2463_v50, %v1051_v31  ;;  %v2562_v36 = vadd.f32 %v2463_v50, %v1052_v34  ;;  %v2565_v37 = vadd.f32 %v2463_v50, %v1053_v35  ;;  %v1054_v38 = vld [vmem:[#allocation2 + $0xd0] sm:$0xff]  ;;  %v1055_v39 = vld [vmem:[#allocation2 + $0xd8] sm:$0xff]  ;;  %v1056_v42 = vld [vmem:[#allocation2 + $0xe0] sm:$0xff] }
 0x1c6   : > { %v2570_v40 = vadd.f32 %v2463_v50, %v1054_v38  ;;  %v2573_v41 = vadd.f32 %v2463_v50, %v1055_v39  ;;  %v1057_v43 = vld [vmem:[#allocation2 + $0xe8] sm:$0xff]  ;;  %v2578_v44 = vadd.f32 %v2463_v50, %v1056_v42  ;;  %v1058_v46 = vld [vmem:[#allocation2 + $0xf0] sm:$0xff]  ;;  %v1059_v47 = vld [vmem:[#allocation2 + $0xf8] sm:$0xff] }
 0x1c7   : > { %v2581_v45 = vadd.f32 %v2463_v50, %v1057_v43  ;;  %v2586_v48 = vadd.f32 %v2463_v50, %v1058_v46  ;;  %v2589_v49 = vadd.f32 %v2463_v50, %v1059_v47 }
 0x1c8   : > { %1107 = vmax.xlane.f32.xlu0 %v2482_v60  ;;  %1109 = vmax.xlane.f32.xlu1 %v2485_v61 }
 0x1cc   : > { %1111 = vmax.xlane.f32.xlu0 %v2490_v0  ;;  %1113 = vmax.xlane.f32.xlu1 %v2493_v1 }
 0x1d0   : > { %1115 = vmax.xlane.f32.xlu0 %v2498_v4  ;;  %1117 = vmax.xlane.f32.xlu1 %v2501_v5 }
 0x1d4   : > { %1119 = vmax.xlane.f32.xlu0 %v2506_v8  ;;  %1121 = vmax.xlane.f32.xlu1 %v2509_v9 }
 0x1d8   : > { %1123 = vmax.xlane.f32.xlu0 %v2514_v12  ;;  %1125 = vmax.xlane.f32.xlu1 %v2517_v13 }
 0x1dc   : > { %1127 = vmax.xlane.f32.xlu0 %v2522_v16  ;;  %1129 = vmax.xlane.f32.xlu1 %v2525_v17 }
 0x1e0   : > { %1131 = vmax.xlane.f32.xlu0 %v2530_v20  ;;  %1133 = vmax.xlane.f32.xlu1 %v2533_v21 }
 0x1e4   : > { %1135 = vmax.xlane.f32.xlu0 %v2538_v24  ;;  %1137 = vmax.xlane.f32.xlu1 %v2541_v25 }
 0x1e8   : > { %1139 = vmax.xlane.f32.xlu0 %v2546_v28  ;;  %1141 = vmax.xlane.f32.xlu1 %v2549_v29 }
 0x1ec   : > { %1143 = vmax.xlane.f32.xlu0 %v2554_v32  ;;  %1145 = vmax.xlane.f32.xlu1 %v2557_v33 }
 0x1f0   : > { %1147 = vmax.xlane.f32.xlu0 %v2562_v36  ;;  %1149 = vmax.xlane.f32.xlu1 %v2565_v37 }
 0x1f4   : > { %1151 = vmax.xlane.f32.xlu0 %v2570_v40  ;;  %1153 = vmax.xlane.f32.xlu1 %v2573_v41 }
 0x1f8   : > { %1155 = vmax.xlane.f32.xlu0 %v2578_v44  ;;  %1157 = vmax.xlane.f32.xlu1 %v2581_v45 }
 0x1fc   : > { %1159 = vmax.xlane.f32.xlu0 %v2586_v48  ;;  %1161 = vmax.xlane.f32.xlu1 %v2589_v49 }
 0x24d   : > { %v1100_v51 = vpop.xlane.xlu0 %1099  ;;  %v1104_v54 = vpop.xlane.xlu1 %1103 }
 0x24e   : > { %v2594_v55 = vsub.f32 %v2466_v52, %v1100_v51  ;;  %v2597_v58 = vsub.f32 %v2469_v53, %v1104_v54 }
 0x250   : > { %v1195_v59 = vmul.f32 1.442695, %v2594_v55  ;;  %v1199_v62 = vmul.f32 1.442695, %v2597_v58 }
 0x251   : > { %v1102_v63 = vpop.xlane.xlu0 %1101  ;;  %v1106_v2 = vpop.xlane.xlu1 %1105 }
 0x252   : > { %1910 = vpow2.f32 %v1195_v59  ;;  %v2602_v50 = vsub.f32 %v2474_v56, %v1102_v63  ;;  %v2605_v3 = vsub.f32 %v2477_v57, %v1106_v2 }
 0x253   : > { %1912 = vpow2.f32 %v1199_v62 }
 0x254   : > { %v1197_v52 = vmul.f32 1.442695, %v2602_v50  ;;  %v1201_v6 = vmul.f32 1.442695, %v2605_v3 }
 0x255   : > { %v1108_v53 = vpop.xlane.xlu0 %1107  ;;  %v1110_v7 = vpop.xlane.xlu1 %1109 }
 0x256   : > { %1914 = vpow2.f32 %v1197_v52  ;;  %v2610_v10 = vsub.f32 %v2482_v60, %v1108_v53  ;;  %v2613_v11 = vsub.f32 %v2485_v61, %v1110_v7 }
 0x257   : > { %1916 = vpow2.f32 %v1201_v6 }
 0x258   : > { %v1203_v56 = vmul.f32 1.442695, %v2610_v10  ;;  %v1205_v57 = vmul.f32 1.442695, %v2613_v11 }
 0x259   : > { %v1112_v14 = vpop.xlane.xlu0 %1111  ;;  %v1114_v15 = vpop.xlane.xlu1 %1113 }
 0x25a   : > { %1918 = vpow2.f32 %v1203_v56  ;;  %v2618_v18 = vsub.f32 %v2490_v0, %v1112_v14  ;;  %v2621_v19 = vsub.f32 %v2493_v1, %v1114_v15 }
 0x25b   : > { %1920 = vpow2.f32 %v1205_v57 }
 0x25c   : > { %v1911_v22 = vpop.eup %1910  ;;  %v1207_v60 = vmul.f32 1.442695, %v2618_v18  ;;  %v1209_v61 = vmul.f32 1.442695, %v2621_v19 }
 0x25d   : > { %1259 = vadd.xlane.f32.xlu0 %v1911_v22  ;;  %v1116_v23 = vpop.xlane.xlu0 %1115  ;;  %v1118_v26 = vpop.xlane.xlu1 %1117 }
 0x25e   : > { %v1913_v27 = vpop.eup %1912  ;;  %1922 = vpow2.f32 %v1207_v60  ;;  %v2626_v30 = vsub.f32 %v2498_v4, %v1116_v23  ;;  %v2629_v0 = vsub.f32 %v2501_v5, %v1118_v26 }
 0x25f   : > { %1924 = vpow2.f32 %v1209_v61 }
 0x260   : > { %v1915_v31 = vpop.eup %1914  ;;  %v1211_v1 = vmul.f32 1.442695, %v2626_v30  ;;  %v1213_v34 = vmul.f32 1.442695, %v2629_v0 }
 0x261   : > { %1263 = vadd.xlane.f32.xlu0 %v1913_v27  ;;  %1261 = vadd.xlane.f32.xlu1 %v1915_v31  ;;  %v1120_v35 = vpop.xlane.xlu0 %1119  ;;  %v1122_v38 = vpop.xlane.xlu1 %1121 }
 0x262   : > { %v1917_v39 = vpop.eup %1916  ;;  %1926 = vpow2.f32 %v1211_v1  ;;  %v2634_v42 = vsub.f32 %v2506_v8, %v1120_v35  ;;  %v2637_v4 = vsub.f32 %v2509_v9, %v1122_v38 }
 0x263   : > { %1928 = vpow2.f32 %v1213_v34 }
 0x264   : > { %v1919_v5 = vpop.eup %1918  ;;  %v1215_v43 = vmul.f32 1.442695, %v2634_v42  ;;  %v1217_v46 = vmul.f32 1.442695, %v2637_v4 }
 0x265   : > { %1265 = vadd.xlane.f32.xlu1 %v1917_v39  ;;  %1267 = vadd.xlane.f32.xlu0 %v1919_v5  ;;  %v1124_v47 = vpop.xlane.xlu0 %1123  ;;  %v1126_v51 = vpop.xlane.xlu1 %1125 }
 0x266   : > { %v1921_v54 = vpop.eup %1920  ;;  %1930 = vpow2.f32 %v1215_v43  ;;  %v2642_v59 = vsub.f32 %v2514_v12, %v1124_v47  ;;  %v2645_v8 = vsub.f32 %v2517_v13, %v1126_v51 }
 0x267   : > { %1932 = vpow2.f32 %v1217_v46 }
 0x268   : > { %v1923_v9 = vpop.eup %1922  ;;  %v1219_v62 = vmul.f32 1.442695, %v2642_v59  ;;  %v1221_v63 = vmul.f32 1.442695, %v2645_v8 }
 0x269   : > { %1269 = vadd.xlane.f32.xlu1 %v1921_v54  ;;  %1271 = vadd.xlane.f32.xlu0 %v1923_v9  ;;  %v1128_v2 = vpop.xlane.xlu0 %1127  ;;  %v1130_v52 = vpop.xlane.xlu1 %1129 }
 0x26a   : > { %v1925_v6 = vpop.eup %1924  ;;  %1934 = vpow2.f32 %v1219_v62  ;;  %v2650_v53 = vsub.f32 %v2522_v16, %v1128_v2  ;;  %v2653_v12 = vsub.f32 %v2525_v17, %v1130_v52 }
 0x26b   : > { %1936 = vpow2.f32 %v1221_v63 }
 0x26c   : > { %v1927_v13 = vpop.eup %1926  ;;  %v1223_v7 = vmul.f32 1.442695, %v2650_v53  ;;  %v1225_v56 = vmul.f32 1.442695, %v2653_v12 }
 0x26d   : > { %1273 = vadd.xlane.f32.xlu1 %v1925_v6  ;;  %1275 = vadd.xlane.f32.xlu0 %v1927_v13  ;;  %v1132_v57 = vpop.xlane.xlu0 %1131  ;;  %v1134_v14 = vpop.xlane.xlu1 %1133 }
 0x26e   : > { %v1929_v15 = vpop.eup %1928  ;;  %1938 = vpow2.f32 %v1223_v7  ;;  %v2658_v22 = vsub.f32 %v2530_v20, %v1132_v57  ;;  %v2661_v16 = vsub.f32 %v2533_v21, %v1134_v14 }
 0x26f   : > { %1940 = vpow2.f32 %v1225_v56 }
 0x270   : > { %v1931_v17 = vpop.eup %1930  ;;  %v1227_v60 = vmul.f32 1.442695, %v2658_v22  ;;  %v1229_v61 = vmul.f32 1.442695, %v2661_v16 }
 0x271   : > { %1277 = vadd.xlane.f32.xlu1 %v1929_v15  ;;  %1279 = vadd.xlane.f32.xlu0 %v1931_v17  ;;  %v1136_v23 = vpop.xlane.xlu0 %1135  ;;  %v1138_v26 = vpop.xlane.xlu1 %1137 }
 0x272   : > { %v1933_v27 = vpop.eup %1932  ;;  %1942 = vpow2.f32 %v1227_v60  ;;  %v2666_v31 = vsub.f32 %v2538_v24, %v1136_v23  ;;  %v2669_v20 = vsub.f32 %v2541_v25, %v1138_v26 }
 0x273   : > { %1944 = vpow2.f32 %v1229_v61 }
 0x274   : > { %v1935_v21 = vpop.eup %1934  ;;  %v1231_v1 = vmul.f32 1.442695, %v2666_v31  ;;  %v1233_v34 = vmul.f32 1.442695, %v2669_v20 }
 0x275   : > { %1281 = vadd.xlane.f32.xlu1 %v1933_v27  ;;  %1283 = vadd.xlane.f32.xlu0 %v1935_v21  ;;  %v1140_v35 = vpop.xlane.xlu0 %1139  ;;  %v1142_v38 = vpop.xlane.xlu1 %1141 }
 0x276   : > { %v1937_v39 = vpop.eup %1936  ;;  %1946 = vpow2.f32 %v1231_v1  ;;  %v2674_v5 = vsub.f32 %v2546_v28, %v1140_v35  ;;  %v2677_v24 = vsub.f32 %v2549_v29, %v1142_v38 }
 0x277   : > { %1948 = vpow2.f32 %v1233_v34 }
 0x278   : > { %v1939_v25 = vpop.eup %1938  ;;  %v1235_v43 = vmul.f32 1.442695, %v2674_v5  ;;  %v1237_v46 = vmul.f32 1.442695, %v2677_v24 }
 0x279   : > { %1285 = vadd.xlane.f32.xlu1 %v1937_v39  ;;  %1287 = vadd.xlane.f32.xlu0 %v1939_v25  ;;  %v1144_v47 = vpop.xlane.xlu0 %1143  ;;  %v1146_v51 = vpop.xlane.xlu1 %1145 }
 0x27a   : > { %v1941_v54 = vpop.eup %1940  ;;  %1950 = vpow2.f32 %v1235_v43  ;;  %v2682_v9 = vsub.f32 %v2554_v32, %v1144_v47  ;;  %v2685_v28 = vsub.f32 %v2557_v33, %v1146_v51 }
 0x27b   : > { %1952 = vpow2.f32 %v1237_v46 }
 0x27c   : > { %v1943_v29 = vpop.eup %1942  ;;  %v1239_v62 = vmul.f32 1.442695, %v2682_v9  ;;  %v1241_v63 = vmul.f32 1.442695, %v2685_v28 }
 0x27d   : > { %1289 = vadd.xlane.f32.xlu1 %v1941_v54  ;;  %1291 = vadd.xlane.f32.xlu0 %v1943_v29  ;;  %v1148_v2 = vpop.xlane.xlu0 %1147  ;;  %v1150_v52 = vpop.xlane.xlu1 %1149 }
 0x27e   : > { %v1945_v6 = vpop.eup %1944  ;;  %1954 = vpow2.f32 %v1239_v62  ;;  %v2690_v13 = vsub.f32 %v2562_v36, %v1148_v2  ;;  %v2693_v32 = vsub.f32 %v2565_v37, %v1150_v52 }
 0x27f   : > { %1956 = vpow2.f32 %v1241_v63 }
 0x280   : > { %v1947_v33 = vpop.eup %1946  ;;  %v1243_v7 = vmul.f32 1.442695, %v2690_v13  ;;  %v1245_v56 = vmul.f32 1.442695, %v2693_v32 }
 0x281   : > { %1293 = vadd.xlane.f32.xlu1 %v1945_v6  ;;  %1295 = vadd.xlane.f32.xlu0 %v1947_v33  ;;  %v1152_v57 = vpop.xlane.xlu0 %1151  ;;  %v1154_v14 = vpop.xlane.xlu1 %1153 }
 0x282   : > { %v1949_v15 = vpop.eup %1948  ;;  %1958 = vpow2.f32 %v1243_v7  ;;  %v2698_v17 = vsub.f32 %v2570_v40, %v1152_v57  ;;  %v2701_v36 = vsub.f32 %v2573_v41, %v1154_v14 }
 0x283   : > { %1960 = vpow2.f32 %v1245_v56 }
 0x284   : > { %v1951_v37 = vpop.eup %1950  ;;  %v1247_v60 = vmul.f32 1.442695, %v2698_v17  ;;  %v1249_v61 = vmul.f32 1.442695, %v2701_v36 }
 0x285   : > { %1297 = vadd.xlane.f32.xlu1 %v1949_v15  ;;  %1299 = vadd.xlane.f32.xlu0 %v1951_v37  ;;  %v1156_v23 = vpop.xlane.xlu0 %1155  ;;  %v1158_v26 = vpop.xlane.xlu1 %1157 }
 0x286   : > { %v1953_v27 = vpop.eup %1952  ;;  %1962 = vpow2.f32 %v1247_v60  ;;  %v2706_v21 = vsub.f32 %v2578_v44, %v1156_v23  ;;  %v2709_v40 = vsub.f32 %v2581_v45, %v1158_v26 }
 0x287   : > { %1964 = vpow2.f32 %v1249_v61 }
 0x288   : > { %v1955_v41 = vpop.eup %1954  ;;  %v1251_v1 = vmul.f32 1.442695, %v2706_v21  ;;  %v1253_v34 = vmul.f32 1.442695, %v2709_v40 }
 0x289   : > { %1301 = vadd.xlane.f32.xlu1 %v1953_v27  ;;  %1303 = vadd.xlane.f32.xlu0 %v1955_v41  ;;  %v1160_v35 = vpop.xlane.xlu0 %1159  ;;  %v1162_v38 = vpop.xlane.xlu1 %1161 }
 0x28a   : > { %v1957_v39 = vpop.eup %1956  ;;  %1966 = vpow2.f32 %v1251_v1  ;;  %v2714_v25 = vsub.f32 %v2586_v48, %v1160_v35  ;;  %v2717_v44 = vsub.f32 %v2589_v49, %v1162_v38 }
 0x28b   : > { %1968 = vpow2.f32 %v1253_v34 }
 0x28c   : > { %v1959_v45 = vpop.eup %1958  ;;  %v1255_v43 = vmul.f32 1.442695, %v2714_v25  ;;  %v1257_v46 = vmul.f32 1.442695, %v2717_v44 }
 0x28d   : > { %1305 = vadd.xlane.f32.xlu1 %v1957_v39  ;;  %1307 = vadd.xlane.f32.xlu0 %v1959_v45  ;;  %v1961_v47 = vpop.eup %1960 }
 0x28e   : > { %1970 = vpow2.f32 %v1255_v43 }
 0x28f   : > { %1972 = vpow2.f32 %v1257_v46 }
 0x290   : > { %v1963_v51 = vpop.eup %1962 }
 0x291   : > { %1309 = vadd.xlane.f32.xlu1 %v1961_v47  ;;  %1311 = vadd.xlane.f32.xlu0 %v1963_v51  ;;  %v1965_v54 = vpop.eup %1964 }
 0x294   : > { %v1967_v48 = vpop.eup %1966 }
 0x295   : > { %1313 = vadd.xlane.f32.xlu1 %v1965_v54  ;;  %1315 = vadd.xlane.f32.xlu0 %v1967_v48  ;;  %v1969_v49 = vpop.eup %1968 }
 0x298   : > { %v1971_v29 = vpop.eup %1970 }
 0x299   : > { %1317 = vadd.xlane.f32.xlu1 %v1969_v49  ;;  %1319 = vadd.xlane.f32.xlu0 %v1971_v29  ;;  %v1973_v62 = vpop.eup %1972 }
 0x29d   : > { %1321 = vadd.xlane.f32.xlu1 %v1973_v62 }
 0x2ea   : > { %v1260_v63 = vpop.xlane.xlu0 %1259 }
 0x2eb   : > { %1974 = vlog2.f32 %v1260_v63 }
 0x2ee   : > { %v1262_v2 = vpop.xlane.xlu1 %1261  ;;  %v1264_v52 = vpop.xlane.xlu0 %1263 }
 0x2ef   : > { %1976 = vlog2.f32 %v1262_v2 }
 0x2f0   : > { %1978 = vlog2.f32 %v1264_v52 }
 0x2f2   : > { %v1266_v6 = vpop.xlane.xlu1 %1265  ;;  %v1268_v33 = vpop.xlane.xlu0 %1267 }
 0x2f3   : > { %1980 = vlog2.f32 %v1266_v6 }
 0x2f4   : > { %1982 = vlog2.f32 %v1268_v33 }
 0x2f5   : > { %v1975_v7 = vpop.eup %1974 }
 0x2f6   : > { %v1324_v56 = vmul.f32 0.6931472, %v1975_v7  ;;  %v1270_v57 = vpop.xlane.xlu1 %1269  ;;  %v1272_v14 = vpop.xlane.xlu0 %1271 }
 0x2f7   : > { %1984 = vlog2.f32 %v1270_v57 }
 0x2f8   : > { %v1387_v15 = vsub.f32 %v2594_v55, %v1324_v56  ;;  %1986 = vlog2.f32 %v1272_v14 }
 0x2f9   : > { %v1977_v37 = vpop.eup %1976 }
 0x2fa   : > { %v1979_v60 = vpop.eup %1978  ;;  %1419 = vst [vmem:[%s2398_s17] sm:$0xff] %v1387_v15  ;;  %v1326_v61 = vmul.f32 0.6931472, %v1977_v37  ;;  %v1274_v23 = vpop.xlane.xlu1 %1273 }
 0x2fb   : > { %v1276_v26 = vpop.xlane.xlu0 %1275  ;;  %v1328_v27 = vmul.f32 0.6931472, %v1979_v60  ;;  %1988 = vlog2.f32 %v1274_v23 }
 0x2fc   : > { %v1388_v41 = vsub.f32 %v2602_v50, %v1326_v61  ;;  %1990 = vlog2.f32 %v1276_v26 }
 0x2fd   : > { %v1981_v1 = vpop.eup %1980  ;;  %v1389_v34 = vsub.f32 %v2597_v58, %v1328_v27 }
 0x2fe   : > { %v1983_v35 = vpop.eup %1982  ;;  %1420 = vst [vmem:[%s2398_s17 + $0x8] sm:$0xff] %v1388_v41  ;;  %v1330_v55 = vmul.f32 0.6931472, %v1981_v1  ;;  %v1278_v38 = vpop.xlane.xlu1 %1277 }
 0x2ff   : > { %v1280_v39 = vpop.xlane.xlu0 %1279  ;;  %1421 = vst [vmem:[%s2398_s17 + $0x10] sm:$0xff] %v1389_v34  ;;  %v1332_v45 = vmul.f32 0.6931472, %v1983_v35  ;;  %1992 = vlog2.f32 %v1278_v38 }
 0x300   : > { %v1390_v43 = vsub.f32 %v2605_v3, %v1330_v55  ;;  %1994 = vlog2.f32 %v1280_v39 }
 0x301   : > { %v1985_v46 = vpop.eup %1984  ;;  %v1391_v50 = vsub.f32 %v2610_v10, %v1332_v45 }
 0x302   : > { %v1987_v47 = vpop.eup %1986  ;;  %1422 = vst [vmem:[%s2398_s17 + $0x18] sm:$0xff] %v1390_v43  ;;  %v1334_v58 = vmul.f32 0.6931472, %v1985_v46  ;;  %v1282_v51 = vpop.xlane.xlu1 %1281 }
 0x303   : > { %v1284_v54 = vpop.xlane.xlu0 %1283  ;;  %1423 = vst [vmem:[%s2398_s17 + $0x20] sm:$0xff] %v1391_v50  ;;  %v1336_v48 = vmul.f32 0.6931472, %v1987_v47  ;;  %1996 = vlog2.f32 %v1282_v51 }
 0x304   : > { %v1392_v49 = vsub.f32 %v2613_v11, %v1334_v58  ;;  %1998 = vlog2.f32 %v1284_v54 }
 0x305   : > { %v1989_v29 = vpop.eup %1988  ;;  %v1393_v3 = vsub.f32 %v2618_v18, %v1336_v48 }
 0x306   : > { %v1991_v62 = vpop.eup %1990  ;;  %1424 = vst [vmem:[%s2398_s17 + $0x28] sm:$0xff] %v1392_v49  ;;  %v1338_v10 = vmul.f32 0.6931472, %v1989_v29  ;;  %v1286_v63 = vpop.xlane.xlu1 %1285 }
 0x307   : > { %v1288_v2 = vpop.xlane.xlu0 %1287  ;;  %1425 = vst [vmem:[%s2398_s17 + $0x30] sm:$0xff] %v1393_v3  ;;  %v1340_v52 = vmul.f32 0.6931472, %v1991_v62  ;;  %2000 = vlog2.f32 %v1286_v63 }
 0x308   : > { %v1394_v6 = vsub.f32 %v2621_v19, %v1338_v10  ;;  %2002 = vlog2.f32 %v1288_v2 }
 0x309   : > { %v1993_v33 = vpop.eup %1992  ;;  %v1395_v11 = vsub.f32 %v2626_v30, %v1340_v52 }
 0x30a   : > { %v1995_v7 = vpop.eup %1994  ;;  %1426 = vst [vmem:[%s2398_s17 + $0x38] sm:$0xff] %v1394_v6  ;;  %v1342_v18 = vmul.f32 0.6931472, %v1993_v33  ;;  %v1290_v56 = vpop.xlane.xlu1 %1289 }
 0x30b   : > { %v1292_v57 = vpop.xlane.xlu0 %1291  ;;  %1427 = vst [vmem:[%s2398_s17 + $0x40] sm:$0xff] %v1395_v11  ;;  %v1344_v14 = vmul.f32 0.6931472, %v1995_v7  ;;  %2004 = vlog2.f32 %v1290_v56 }
 0x30c   : > { %v1396_v15 = vsub.f32 %v2629_v0, %v1342_v18  ;;  %2006 = vlog2.f32 %v1292_v57 }
 0x30d   : > { %v1997_v37 = vpop.eup %1996  ;;  %v1397_v19 = vsub.f32 %v2634_v42, %v1344_v14 }
 0x30e   : > { %v1999_v60 = vpop.eup %1998  ;;  %1428 = vst [vmem:[%s2398_s17 + $0x48] sm:$0xff] %v1396_v15  ;;  %v1346_v30 = vmul.f32 0.6931472, %v1997_v37  ;;  %v1294_v61 = vpop.xlane.xlu1 %1293 }
 0x30f   : > { %v1296_v23 = vpop.xlane.xlu0 %1295  ;;  %1429 = vst [vmem:[%s2398_s17 + $0x50] sm:$0xff] %v1397_v19  ;;  %v1348_v26 = vmul.f32 0.6931472, %v1999_v60  ;;  %2008 = vlog2.f32 %v1294_v61 }
 0x310   : > { %v1398_v27 = vsub.f32 %v2637_v4, %v1346_v30  ;;  %2010 = vlog2.f32 %v1296_v23 }
 0x311   : > { %v2001_v41 = vpop.eup %2000  ;;  %v1399_v0 = vsub.f32 %v2642_v59, %v1348_v26 }
 0x312   : > { %v2003_v1 = vpop.eup %2002  ;;  %1430 = vst [vmem:[%s2398_s17 + $0x58] sm:$0xff] %v1398_v27  ;;  %v1350_v42 = vmul.f32 0.6931472, %v2001_v41  ;;  %v1298_v34 = vpop.xlane.xlu1 %1297 }
 0x313   : > { %v1300_v35 = vpop.xlane.xlu0 %1299  ;;  %1431 = vst [vmem:[%s2398_s17 + $0x60] sm:$0xff] %v1399_v0  ;;  %v1352_v55 = vmul.f32 0.6931472, %v2003_v1  ;;  %2012 = vlog2.f32 %v1298_v34 }
 0x314   : > { %v1400_v38 = vsub.f32 %v2645_v8, %v1350_v42  ;;  %2014 = vlog2.f32 %v1300_v35 }
 0x315   : > { %v2005_v39 = vpop.eup %2004  ;;  %v1401_v4 = vsub.f32 %v2650_v53, %v1352_v55 }
 0x316   : > { %v2007_v45 = vpop.eup %2006  ;;  %1432 = vst [vmem:[%s2398_s17 + $0x68] sm:$0xff] %v1400_v38  ;;  %v1354_v59 = vmul.f32 0.6931472, %v2005_v39  ;;  %v1302_v43 = vpop.xlane.xlu1 %1301 }
 0x317   : > { %v1304_v46 = vpop.xlane.xlu0 %1303  ;;  %1433 = vst [vmem:[%s2398_s17 + $0x70] sm:$0xff] %v1401_v4  ;;  %v1356_v50 = vmul.f32 0.6931472, %v2007_v45  ;;  %2016 = vlog2.f32 %v1302_v43 }
 0x318   : > { %v1402_v47 = vsub.f32 %v2653_v12, %v1354_v59  ;;  %2018 = vlog2.f32 %v1304_v46 }
 0x319   : > { %v2009_v58 = vpop.eup %2008  ;;  %v1403_v8 = vsub.f32 %v2658_v22, %v1356_v50 }
 0x31a   : > { %v2011_v51 = vpop.eup %2010  ;;  %1434 = vst [vmem:[%s2398_s17 + $0x78] sm:$0xff] %v1402_v47  ;;  %v1358_v53 = vmul.f32 0.6931472, %v2009_v58  ;;  %v1306_v54 = vpop.xlane.xlu1 %1305 }
 0x31b   : > { %v1308_v48 = vpop.xlane.xlu0 %1307  ;;  %1435 = vst [vmem:[%s2398_s17 + $0x80] sm:$0xff] %v1403_v8  ;;  %v1360_v49 = vmul.f32 0.6931472, %v2011_v51  ;;  %2020 = vlog2.f32 %v1306_v54 }
 0x31c   : > { %v1404_v29 = vsub.f32 %v2661_v16, %v1358_v53  ;;  %2022 = vlog2.f32 %v1308_v48 }
 0x31d   : > { %v2013_v3 = vpop.eup %2012  ;;  %v1405_v12 = vsub.f32 %v2666_v31, %v1360_v49 }
 0x31e   : > { %v2015_v62 = vpop.eup %2014  ;;  %1436 = vst [vmem:[%s2398_s17 + $0x88] sm:$0xff] %v1404_v29  ;;  %v1362_v22 = vmul.f32 0.6931472, %v2013_v3  ;;  %v1310_v10 = vpop.xlane.xlu1 %1309 }
 0x31f   : > { %v1312_v63 = vpop.xlane.xlu0 %1311  ;;  %1437 = vst [vmem:[%s2398_s17 + $0x90] sm:$0xff] %v1405_v12  ;;  %v1364_v2 = vmul.f32 0.6931472, %v2015_v62  ;;  %2024 = vlog2.f32 %v1310_v10 }
 0x320   : > { %v1406_v52 = vsub.f32 %v2669_v20, %v1362_v22  ;;  %2026 = vlog2.f32 %v1312_v63 }
 0x321   : > { %v2017_v6 = vpop.eup %2016  ;;  %v1407_v16 = vsub.f32 %v2674_v5, %v1364_v2 }
 0x322   : > { %v2019_v33 = vpop.eup %2018  ;;  %1438 = vst [vmem:[%s2398_s17 + $0x98] sm:$0xff] %v1406_v52  ;;  %v1366_v31 = vmul.f32 0.6931472, %v2017_v6  ;;  %v1314_v11 = vpop.xlane.xlu1 %1313 }
 0x323   : > { %v1316_v7 = vpop.xlane.xlu0 %1315  ;;  %1439 = vst [vmem:[%s2398_s17 + $0xa0] sm:$0xff] %v1407_v16  ;;  %v1368_v18 = vmul.f32 0.6931472, %v2019_v33  ;;  %2028 = vlog2.f32 %v1314_v11 }
 0x324   : > { %v1408_v56 = vsub.f32 %v2677_v24, %v1366_v31  ;;  %2030 = vlog2.f32 %v1316_v7 }
 0x325   : > { %v2021_v57 = vpop.eup %2020  ;;  %v1409_v20 = vsub.f32 %v2682_v9, %v1368_v18 }
 0x326   : > { %v2023_v14 = vpop.eup %2022  ;;  %1440 = vst [vmem:[%s2398_s17 + $0xa8] sm:$0xff] %v1408_v56  ;;  %v1370_v5 = vmul.f32 0.6931472, %v2021_v57  ;;  %v1318_v15 = vpop.xlane.xlu1 %1317 }
 0x327   : > { %v1320_v37 = vpop.xlane.xlu0 %1319  ;;  %1441 = vst [vmem:[%s2398_s17 + $0xb0] sm:$0xff] %v1409_v20  ;;  %v1372_v19 = vmul.f32 0.6931472, %v2023_v14  ;;  %2032 = vlog2.f32 %v1318_v15 }
 0x328   : > { %v1410_v60 = vsub.f32 %v2685_v28, %v1370_v5  ;;  %2034 = vlog2.f32 %v1320_v37 }
 0x329   : > { %v2025_v24 = vpop.eup %2024  ;;  %v1411_v30 = vsub.f32 %v2690_v13, %v1372_v19 }
 0x32a   : > { %v2027_v61 = vpop.eup %2026  ;;  %1442 = vst [vmem:[%s2398_s17 + $0xb8] sm:$0xff] %v1410_v60  ;;  %v1374_v9 = vmul.f32 0.6931472, %v2025_v24  ;;  %v1322_v23 = vpop.xlane.xlu1 %1321 }
 0x32b   : > { %1443 = vst [vmem:[%s2398_s17 + $0xc0] sm:$0xff] %v1411_v30  ;;  %v1376_v26 = vmul.f32 0.6931472, %v2027_v61  ;;  %2036 = vlog2.f32 %v1322_v23 }
 0x32c   : > { %v1412_v27 = vsub.f32 %v2693_v32, %v1374_v9 }
 0x32d   : > { %v2029_v41 = vpop.eup %2028  ;;  %v1413_v0 = vsub.f32 %v2698_v17, %v1376_v26 }
 0x32e   : > { %v2031_v28 = vpop.eup %2030  ;;  %1444 = vst [vmem:[%s2398_s17 + $0xc8] sm:$0xff] %v1412_v27  ;;  %v1378_v1 = vmul.f32 0.6931472, %v2029_v41 }
 0x32f   : > { %1445 = vst [vmem:[%s2398_s17 + $0xd0] sm:$0xff] %v1413_v0  ;;  %v1380_v13 = vmul.f32 0.6931472, %v2031_v28 }
 0x330   : > { %v1414_v42 = vsub.f32 %v2701_v36, %v1378_v1 }
 0x331   : > { %v2033_v34 = vpop.eup %2032  ;;  %v1415_v35 = vsub.f32 %v2706_v21, %v1380_v13 }
 0x332   : > { %v2035_v55 = vpop.eup %2034  ;;  %1446 = vst [vmem:[%s2398_s17 + $0xd8] sm:$0xff] %v1414_v42  ;;  %v1382_v38 = vmul.f32 0.6931472, %v2033_v34 }
 0x333   : > { %1447 = vst [vmem:[%s2398_s17 + $0xe0] sm:$0xff] %v1415_v35  ;;  %v1384_v32 = vmul.f32 0.6931472, %v2035_v55 }
 0x334   : > { %v1416_v17 = vsub.f32 %v2709_v40, %v1382_v38 }
 0x335   : > { %v2037_v39 = vpop.eup %2036  ;;  %v1417_v4 = vsub.f32 %v2714_v25, %v1384_v32 }
 0x336   : > { %1448 = vst [vmem:[%s2398_s17 + $0xe8] sm:$0xff] %v1416_v17  ;;  %v1386_v45 = vmul.f32 0.6931472, %v2037_v39 }
 0x337   : > { %1449 = vst [vmem:[%s2398_s17 + $0xf0] sm:$0xff] %v1417_v4 }
 0x338   : > { %v1418_v59 = vsub.f32 %v2717_v44, %v1386_v45 }
 0x33a   : > { %1450 = vst [vmem:[%s2398_s17 + $0xf8] sm:$0xff] %v1418_v59 }
 0x33b PF: > { %s1625_s6 = sshll.u32 %s2162_s7, 12  ;;  %s1465_s24 = sshll.u32 %s2398_s17, 4  ;;  %s2792_s24 = int_to_ptr.vmem [resolvable:$true] %s1465_s24 }
 0x33c   : > { %s2789_s15 = scalar_lea.hbm %s2858_s5, %s1625_s6  ;;  %s2868_s21 = sand.u32 1, %s2142_s27  }
 0x33d   : > { %s2796_s23 = scalar_lea.sflag [#allocation8], %s2868_s21  ;;  %s2062_s19 = scalar_lea.vmem %s2792_s24, 4096 }
 0x33e   : > { %p2063_p2 = scmp.ne.s32.totalorder %s2792_s24, %s2062_s19  ;;  %s2179_s7 = smov [#allocation7]  }
 0x33f   : > { %s2066_s12 = sshll.u32 %s2179_s7, 4  ;;  %s2067_s12 = int_to_ptr.vmem [resolvable:$false] %s2066_s12 }
 0x340   : > { %p2064_p3 = pnand %p2063_p2, %p2302_p6  ;;  %s2068_s14 = scalar_lea.vmem %s2067_s12, 8192 }
 0x341   : > { %p2069_p5 = scmp.lt.s32.totalorder %s2792_s24, %s2067_s12  ;;  %p2070_p8 = scmp.lt.s32.totalorder %s2068_s14, %s2062_s19 }
 0x342   : > { %p2065_p4 = pneg %p2064_p3 }
 0x343   : > { %p2071_p9 = por %p2070_p8, %p2069_p5 }
 0x345   : > { %p2072_p10 = pnand %p2071_p9, %p2065_p4 }
 0x347   : > { %2075 = shalt.err (!%p2072_p10)
}
 0x348   : > { %s2076_s17 = scalar_lea.hbm %s2789_s15, 4096  ;;  %s2080_s13 = scalar_lea.hbm %s2858_s5, 8192 }
 0x349   : > { %p2077_p11 = scmp.ne.s32.totalorder %s2789_s15, %s2076_s17  ;;  %p2081_p0 = scmp.lt.u32.totalorder %s2789_s15, %s2858_s5 }
 0x34a   : > { %p2082_p1 = scmp.lt.u32.totalorder %s2080_s13, %s2076_s17  ;;  %p2084_p3 = scmp.lt.u32.totalorder %s2076_s17, %s2789_s15 }
 0x34b   : > { %p2078_p12 = pnand %p2077_p11, %p2302_p6 }
 0x34c   : > { %p2083_p2 = por %p2082_p1, %p2081_p0 }
 0x34d   : > { %p2079_p13 = pneg %p2078_p12 }
 0x34e   : > { %p2085_p4 = por %p2084_p3, %p2083_p2 }
 0x350   : > { %p2086_p5 = pnand %p2085_p4, %p2079_p13 }
 0x352   : > { %2089 = shalt.err (!%p2086_p5)
}
 0x353   : > { %s2180_s20 = smov 128   ;;  %s2181_s0 = smov 8  }
 0x354   : > { %1754 = dma.vmem_to_hbm [thread:$0]  (%p2302_p6), %s2792_s24, 4096, %s2789_s15, %s2796_s23, %s2180_s20, %s2180_s20, %s2181_s0  }
 0x355 PF: > { %p1760_p8 = scmp.ge.s32.totalorder %s2174_s10, 2  ;;  %s1480_s21 = sand.u32 1, %s2138_s1  }
 0x356   : > { %s1481_s19 = scalar_lea.sflag [#allocation8], %s1480_s21 }
 0x357   : > { %p1757_p9 = pnand %p1760_p8, %p2306_p7 }
 0x359   : > { %2133 = dma.done.wait (!%p1757_p9), %s1481_s19, 4096  }
 0x35a   : > { %2135 = vsyncadd (!%p1757_p9), %s1481_s19, 4294963200  ;;  %s28_s10 = sadd.s32 1, %s2174_s10   ;;  %s2869_s18 = sld [smem:[#allocation11_spill]] }
 0x35b   : > { %p25_p10 = scmp.ge.s32.totalorder %s28_s10, 6   ;;  %s2870_s15 = sld [smem:[#allocation12_spill]] }
 0x35c   : > { %s2871_s1 = smov %s2142_s27  ;;  %s2872_s27 = smov %s2146_s28 }
 0x35d   : > { %s2873_s28 = smov %s2296_s16  ;;  %s2874_s29 = smov %s2154_s30 }
 0x35e   : > { %s2875_s30 = smov %s2312_s26  ;;  %s2876_s6 = smov %s2166_s8 }
 0x35f   : > { %s2877_s7 = smov %s2170_s9  ;;  %27 = sbr.rel (!%p25_p10) target bundleno = 31 (0x1f), region = 123 }
 0x360   : > { %s2878_s8 = smov %s2869_s18 }
 0x361   : > { %s2879_s9 = smov %s2870_s15 }
 0x366   :  { %1486 = vsyncpa [#allocation8], 1 }
 0x367   :  { %1488 = vsyncpa [#allocation8 + $0x1], 1 }

// kernel: gcn_cora_forward_padded.4
= control target key start
LH: loop header
LB: loop body
LE: loop exit
PB: predicated region body
PF: predicated region fallthrough
CT: control target
= control target key end

     0   :  { %s2581_s0 = inlined_call_operand.vmem [shape: s32[2,2], index: 0, kind: input, shape index: {}]   ;;  %s2582_s2 = inlined_call_operand.hbm [shape: bf16[512,512], index: 2, kind: input, shape index: {}]   ;;  %s2583_s3 = inlined_call_operand.vmem [shape: bf16[512,128], index: 3, kind: input, shape index: {}]   ;;  %s2584_s4 = inlined_call_operand.vmem [shape: f32[1,128], index: 4, kind: input, shape index: {}]   ;;  %s2585_s5 = inlined_call_operand.vmem [shape: bf16[128,128], index: 5, kind: input, shape index: {}]   ;;  %s2586_s6 = inlined_call_operand.vmem [shape: bf16[512,128], index: 6, kind: output, shape index: {}]   ;;  %s2587_s1 = inlined_call_operand.vmem [shape: s32[2], index: 1, kind: input, shape index: {}]  }
   0x1   :  { %s11_s23 = sshll.u32 %s2581_s0, 4  ;;  %s15_s26 = sshll.u32 %s2587_s1, 4  ;;  %s12_s23 = int_to_ptr.vmem [resolvable:$true] %s11_s23  ;;  %s16_s26 = int_to_ptr.vmem [resolvable:$true] %s15_s26 }
   0x2   :  { %s2116_s27 = scalar_lea.vmem %s12_s23, 32  ;;  %p2121_p1 = scmp.lt.s32.totalorder %s12_s23, %s12_s23 }
   0x3   :  { %p2117_p0 = scmp.ne.s32.totalorder %s12_s23, %s2116_s27  ;;  %p2122_p2 = scmp.lt.s32.totalorder %s2116_s27, %s2116_s27 }
   0x5   :  { %p2123_p3 = por %p2122_p2, %p2121_p1 }
   0x7   :  { %p2124_p4 = pnand %p2123_p3, %p2117_p0 }
   0x9   :  { %2127 = shalt.err (!%p2124_p4)  }
   0xa   :  { %s2240_s28 = smov [#allocation4]   ;;  %s2128_s29 = scalar_lea.vmem %s16_s26, 16 }
   0xb   :  { %14 = dma.vmem_to_smem %s12_s23, 32, %s2240_s28, [#allocation3] }
   0xc   :  { %p2129_p5 = scmp.ne.s32.totalorder %s16_s26, %s2128_s29  ;;  %p2133_p6 = scmp.lt.s32.totalorder %s16_s26, %s16_s26 }
   0xd   :  { %p2134_p7 = scmp.lt.s32.totalorder %s2128_s29, %s2128_s29 }
   0xf   :  { %p2135_p8 = por %p2134_p7, %p2133_p6 }
  0x11   :  { %p2136_p9 = pnand %p2135_p8, %p2129_p5 }
  0x13   :  { %2139 = shalt.err (!%p2136_p9)  }
  0x14   :  { %s2241_s0 = smov [#allocation5]  }
  0x15   :  { %18 = dma.vmem_to_smem %s16_s26, 16, %s2241_s0, [#allocation3] }
  0x16   :  { %2202 = dma.done.wait [#allocation3], 48 }
  0x17   :  { %2203 = vsyncadd [#allocation3], 4294967248 }
  0x18   :  { %20 = sfence }
  0x19   :  { %21 = vsyncpa [#allocation7], 0 }
  0x1a   :  { %23 = vsyncpa [#allocation7 + $0x1], 0  ;;  %s2288_s1 = smov 0   ;;  %s2290_s30 = smov 0  }
  0x1b   :  { %s2292_s7 = smov 0   ;;  %s2294_s8 = smov 0  }
  0x1c   :  { %s2296_s9 = smov 0   ;;  %s2298_s10 = smov 0  }
  0x1d   :  { %s2300_s11 = smov 0   ;;  %s2302_s12 = smov 0  }
  0x1e LB: > { %s38_s13 = sadd.s32 1, %s2230_s10  ;;  %s41_s14 = sadd.s32 1, %s2234_s11  ;;  %s2238_s12 = sphi %s2302_s12, %s29_s12   ;;  %s2234_s11 = sphi %s2300_s11, %s2602_s11   ;;  %s2230_s10 = sphi %s2298_s10, %s2601_s10   ;;  %s2226_s9 = sphi %s2296_s9, %s2600_s9   ;;  %s2222_s8 = sphi %s2294_s8, %s2599_s8   ;;  %s2218_s7 = sphi %s2292_s7, %s2598_s7   ;;  %s2214_s30 = sphi %s2290_s30, %s2597_s30   ;;  %s2210_s1 = sphi %s2288_s1, %s2596_s1  }
  0x1f   : > { %p39_p10 = scmp.ge.s32.totalorder %s38_s13, 2  ;;  %s45_s15 = sshra.s32 %s2230_s10, 7 }
  0x20   : > { %s47_s16 = sadd.s32 %s2234_s11, %s45_s15  ;;  %s50_s17 = sand.u32 127, %s2230_s10 }
  0x21   : > { %s2604_s13 = smov (%p39_p10, %s38_s13), 0  ;;  %s2606_s14 = smov (!%p39_p10, %s41_s14), %s2234_s11 }
  0x22   : > { %p43_p11 = scmp.ge.s32.totalorder %s2606_s14, 2  ;;  %s1508_s18 = sshll.u32 %s47_s16, 7 }
  0x23   : > { %s53_s19 = sshra.s32 %s2604_s13, 7  ;;  %s1506_s20 = sadd.s32 4294967295, %s2238_s12  }
  0x24   : > { %s2608_s14 = smov (%p43_p11, %s2606_s14), 0  ;;  %s58_s21 = sand.u32 127, %s2604_s13 }
  0x25   : > { %2590 = sst [smem:[#allocation12_spill]] %s2608_s14  ;;  %s51_s22 = sadd.s32 %s1508_s18, %s50_s17 }
  0x26   : > { %s55_s23 = sadd.s32 %s53_s19, %s2608_s14  ;;  %s52_s24 = sld [smem:[#allocation4 + %s51_s22]] }
  0x27   : > { %s1509_s25 = sshll.u32 %s55_s23, 7  ;;  %p73_p12 = scmp.ne.s32.totalorder %s2218_s7, %s2214_s30 }
  0x28   : > { %s59_s26 = sadd.s32 %s1509_s25, %s58_s21  ;;  %p79_p13 = scmp.ne.s32.totalorder %s2214_s30, %s2210_s1 }
  0x29   : > { %s60_s27 = sld [smem:[#allocation4 + %s59_s26]]  ;;  %p74_p0 = scmp.eq.s32.totalorder %s2238_s12, 0 }
  0x2a   : > { %p80_p1 = scmp.eq.s32.totalorder %s1506_s20, 0  ;;  %s61_s29 = ssub.s32 %s2234_s11, %s2608_s14 }
  0x2b   : > { %s201_s0 = sand.u32 1, %s2218_s7   ;;  %s66_s15 = sadd.s32 1, %s2218_s7 }
  0x2c   : > { %p2347_p2 = por %p80_p1, %p79_p13  ;;  %p75_p3 = por %p74_p0, %p73_p12 }
  0x2d   : > { %p1973_p4 = scmp.lt.s32.totalorder %s2238_s12, 4  ;;  %s1512_s18 = sshll.u32 %s201_s0, 8 }
  0x2e   : > { %s2591_s28 = scalar_select %p2347_p2, 1, 0 }
  0x2f   : > { %s62_s16 = ssub.s32 %s52_s24, %s60_s27  ;;  %p2356_p6 = pnand %p1973_p4, %p75_p3 }
  0x30   : > { %s63_s17 = sor.u32 %s62_s16, %s61_s29  ;;  %s2610_s22 = smov (!%p75_p3, %s51_s22), 0 }
  0x31   : > { %p64_p5 = scmp.eq.s32.totalorder %s63_s17, 0  ;;  %s2614_s22 = smov (!%p1973_p4, %s2610_s22), 0 }
  0x32   : > { %s1963_s19 = scalar_select %p75_p3, [#allocation4], [#allocation8] }
  0x33   : > { %s2361_s20 = scalar_select %p64_p5, %s2218_s7, %s66_s15  }
  0x34   : > { %s2612_s19 = smov (!%p1973_p4, %s1963_s19), [#allocation9]  ;;  %p1518_p7 = scmp.ge.s32.totalorder %s2238_s12, 1 }
  0x35   : > { %s213_s21 = sld [smem:[%s2612_s19 + %s2614_s22]]  ;;  %s205_s23 = scalar_lea.vmem [#allocation6], %s1512_s18 }
  0x36   : > { %s223_s24 = sshll.u32 %s205_s23, 4  ;;  %p231_p8 = scmp.lt.s32.totalorder %s2238_s12, 5  ;;  %s2370_s24 = int_to_ptr.vmem [resolvable:$true] %s223_s24 }
  0x37   : > { %s1619_s25 = sshll.u32 %s2234_s11, 7  ;;  %s2377_s22 = scalar_lea.sflag [#allocation7], %s201_s0 }
  0x38   : > { %p2366_p9 = pnand %p1518_p7, %p231_p8  ;;  %p2142_p11 = pneg %p2356_p6 }
  0x39   : > { %s2145_s23 = scalar_lea.hbm %s2582_s2, 16384 }
  0x3b   : > { %s1515_s27 = sshll.u32 %s213_s21, 1 }
  0x3c   : > { %s220_s29 = sadd.s32 %s1619_s25, %s1515_s27 }
  0x3d   : > { %s1517_s15 = sshll.u32 %s220_s29, 6 }
  0x3e   : > { %s2375_s14 = scalar_lea.hbm %s2582_s2, %s1517_s15 }
  0x3f   : > { %s2140_s18 = scalar_lea.hbm %s2375_s14, 4096  ;;  %p2146_p0 = scmp.lt.u32.totalorder %s2375_s14, %s2582_s2 }
  0x40   : > { %p2141_p10 = scmp.ne.s32.totalorder %s2375_s14, %s2140_s18  ;;  %p2147_p1 = scmp.lt.u32.totalorder %s2145_s23, %s2140_s18 }
  0x41   : > { %p2149_p4 = scmp.lt.u32.totalorder %s2140_s18, %s2375_s14 }
  0x42   : > { %p2143_p12 = pnand %p2142_p11, %p2141_p10  ;;  %p2148_p3 = por %p2147_p1, %p2146_p0 }
  0x44   : > { %p2144_p13 = pneg %p2143_p12  ;;  %p2150_p5 = por %p2149_p4, %p2148_p3 }
  0x46   : > { %p2151_p7 = pnand %p2150_p5, %p2144_p13 }
  0x48   : > { %2154 = shalt.err (!%p2151_p7)
}
  0x49   : > { %s2155_s0 = scalar_lea.vmem %s2370_s24, 4096  ;;  %s2242_s29 = smov [#allocation6]  }
  0x4a   : > { %p2156_p8 = scmp.ne.s32.totalorder %s2370_s24, %s2155_s0  ;;  %s2160_s15 = sshll.u32 %s2242_s29, 4  ;;  %s2161_s15 = int_to_ptr.vmem [resolvable:$false] %s2160_s15 }
  0x4b   : > { %s2162_s16 = scalar_lea.vmem %s2161_s15, 8192  ;;  %p2163_p2 = scmp.lt.s32.totalorder %s2370_s24, %s2161_s15 }
  0x4c   : > { %p2158_p10 = pnand %p2156_p8, %p2142_p11  ;;  %p2164_p0 = scmp.lt.s32.totalorder %s2162_s16, %s2155_s0 }
  0x4e   : > { %p2159_p12 = pneg %p2158_p10  ;;  %p2165_p1 = por %p2164_p0, %p2163_p2 }
  0x50   : > { %p2166_p3 = pnand %p2165_p1, %p2159_p12 }
  0x52   : > { %2169 = shalt.err (!%p2166_p3)
}
  0x53   : > { %s2243_s17 = smov 256   ;;  %s2244_s18 = smov 128  }
  0x54   : > { %s2245_s19 = smov 8   ;;  %235 = sbr.rel (%p2366_p9) target bundleno = 716 (0x2cc), region = 36 }
  0x55   : > { %1972 = dma.hbm_to_vmem [thread:$0]  (!%p2356_p6), %s2375_s14, 4096, %s2370_s24, %s2377_s22, %s2243_s17, %s2244_s18, %s2245_s19  }
  0x56   : > { %s237_s21 = sand.u32 (!%p2366_p9), 1, %s2214_s30   ;;  %p2594_p2 = scmp.ne.s32.totalorder (!%p2366_p9), %s2591_s28, 0 }
  0x57   : > { %s1519_s23 = sshll.u32 (!%p2366_p9), %s237_s21, 8  ;;  %s238_s25 = scalar_lea.sflag (!%p2366_p9), [#allocation7], %s237_s21 }
  0x58   : > { %s2408_s27 = scalar_lea.vmem (!%p2366_p9), [#allocation6], %s1519_s23 }
  0x5b   : > { %2205 = dma.done.wait (%p2594_p2), %s238_s25, 4096  }
  0x5c   : > { %2207 = vsyncadd (%p2594_p2), %s238_s25, 4294963200  ;;  %s1520_s0 = sshll.u32 %s2226_s9, 5  ;;  %p1522_p6 = scmp.ne.s32.totalorder %s2222_s8, 0 }
  0x5d   : > { %p277_p11 = scmp.lt.s32.totalorder %s1520_s0, 63  ;;  %v2246_v0 = vmov (!%p1522_p6), 0.0  }
  0x5e   : > { %286 = sbr.rel (%p1522_p6) target bundleno = 110 (0x6e), region = 44  ;;  %287 = vst [vmem:[#allocation2] sm:$0xff] (!%p1522_p6), %v2246_v0  ;;  %288 = vst [vmem:[#allocation2 + $0x8] sm:$0xff] (!%p1522_p6), %v2246_v0 }
  0x5f   : > { %s2616_s0 = smov (!%p277_p11, %s1520_s0), 63  ;;  %289 = vst [vmem:[#allocation2 + $0x10] sm:$0xff] (!%p1522_p6), %v2246_v0  ;;  %290 = vst [vmem:[#allocation2 + $0x18] sm:$0xff] (!%p1522_p6), %v2246_v0 }
  0x60   : > { %s1521_s14 = sshll.u32 %s2616_s0, 2  ;;  %291 = vst [vmem:[#allocation2 + $0x20] sm:$0xff] (!%p1522_p6), %v2246_v0  ;;  %292 = vst [vmem:[#allocation2 + $0x28] sm:$0xff] (!%p1522_p6), %v2246_v0 }
  0x61   : > { %s2418_s26 = scalar_lea.vmem %s2586_s6, %s1521_s14  ;;  %293 = vst [vmem:[#allocation2 + $0x30] sm:$0xff] (!%p1522_p6), %v2246_v0  ;;  %294 = vst [vmem:[#allocation2 + $0x38] sm:$0xff] (!%p1522_p6), %v2246_v0 }
  0x62   : > { %295 = vst [vmem:[#allocation2 + $0x40] sm:$0xff] (!%p1522_p6), %v2246_v0  ;;  %296 = vst [vmem:[#allocation2 + $0x48] sm:$0xff] (!%p1522_p6), %v2246_v0 }
  0x63   : > { %297 = vst [vmem:[#allocation2 + $0x50] sm:$0xff] (!%p1522_p6), %v2246_v0  ;;  %298 = vst [vmem:[#allocation2 + $0x58] sm:$0xff] (!%p1522_p6), %v2246_v0 }
  0x64   : > { %299 = vst [vmem:[#allocation2 + $0x60] sm:$0xff] (!%p1522_p6), %v2246_v0  ;;  %300 = vst [vmem:[#allocation2 + $0x68] sm:$0xff] (!%p1522_p6), %v2246_v0 }
  0x65   : > { %301 = vst [vmem:[#allocation2 + $0x70] sm:$0xff] %v2246_v0  ;;  %302 = vst [vmem:[#allocation2 + $0x78] sm:$0xff] %v2246_v0 }
  0x66   : > { %303 = vst [vmem:[#allocation2 + $0x80] sm:$0xff] %v2246_v0  ;;  %304 = vst [vmem:[#allocation2 + $0x88] sm:$0xff] %v2246_v0 }
  0x67   : > { %305 = vst [vmem:[#allocation2 + $0x90] sm:$0xff] %v2246_v0  ;;  %306 = vst [vmem:[#allocation2 + $0x98] sm:$0xff] %v2246_v0 }
  0x68   : > { %307 = vst [vmem:[#allocation2 + $0xa0] sm:$0xff] %v2246_v0  ;;  %308 = vst [vmem:[#allocation2 + $0xa8] sm:$0xff] %v2246_v0 }
  0x69   : > { %309 = vst [vmem:[#allocation2 + $0xb0] sm:$0xff] %v2246_v0  ;;  %310 = vst [vmem:[#allocation2 + $0xb8] sm:$0xff] %v2246_v0 }
  0x6a   : > { %311 = vst [vmem:[#allocation2 + $0xc0] sm:$0xff] %v2246_v0  ;;  %312 = vst [vmem:[#allocation2 + $0xc8] sm:$0xff] %v2246_v0 }
  0x6b   : > { %313 = vst [vmem:[#allocation2 + $0xd0] sm:$0xff] %v2246_v0  ;;  %314 = vst [vmem:[#allocation2 + $0xd8] sm:$0xff] %v2246_v0 }
  0x6c   : > { %315 = vst [vmem:[#allocation2 + $0xe0] sm:$0xff] %v2246_v0  ;;  %316 = vst [vmem:[#allocation2 + $0xe8] sm:$0xff] %v2246_v0 }
  0x6d   : > { %317 = vst [vmem:[#allocation2 + $0xf0] sm:$0xff] %v2246_v0  ;;  %318 = vst [vmem:[#allocation2 + $0xf8] sm:$0xff] %v2246_v0 }
  0x6e PF: > { %s319_s28 = sld [smem:[#allocation5 + %s2226_s9]] }
  0x74   : > { %p1523_p9 = scmp.ge.s32.totalorder %s2222_s8, %s319_s28 }
  0x75   : > { %s324_s22 = sshra.s32 (!%p1523_p9), %s2222_s8, 7  ;;  %s329_s29 = sand.u32 (!%p1523_p9), 127, %s2222_s8  ;;  %v2062_v1 = vld [vmem:[%s2408_s27 + $0x4] ss:$8 sps:$4 sm:$0xff] (!%p1523_p9)   ;;  %v2060_v19 = vld [vmem:[%s2408_s27] ss:$8 sps:$4 sm:$0xff] (!%p1523_p9)  }
  0x76   : > { %323 = sbr.rel (%p1523_p9) target bundleno = 440 (0x1b8), region = 48  ;;  %s326_s15 = sadd.s32 (!%p1523_p9), %s2226_s9, %s324_s22  ;;  %v2065_v2 = vld [vmem:[%s2408_s27 + $0x84] ss:$8 sps:$4 sm:$0xff] (!%p1523_p9)   ;;  %721 = vmatprep.mubr.bf16.mxu0 (!%p1523_p9), %v2062_v1  ;;  %v2063_v20 = vld [vmem:[%s2408_s27 + $0x80] ss:$8 sps:$4 sm:$0xff] (!%p1523_p9)  }
  0x77   : > { %s1524_s16 = sshll.u32 (!%p1523_p9), %s326_s15, 7  ;;  %785 = vmatprep.mubr.bf16.mxu1 (!%p1523_p9), %v2065_v2  ;;  %v2066_v21 = vld [vmem:[%s2408_s27 + $0x14] ss:$8 sps:$4 sm:$0xff] (!%p1523_p9)   ;;  %v2070_v23 = vld [vmem:[%s2408_s27 + $0x10] ss:$8 sps:$4 sm:$0xff] (!%p1523_p9)   ;;  %v333_v51 = vld [vmem:[#allocation2] sm:$0xff] (!%p1523_p9) }
  0x78   : > { %s330_s17 = sadd.s32 (!%p1523_p9), %s1524_s16, %s329_s29  ;;  %v2068_v22 = vld [vmem:[%s2408_s27 + $0x94] ss:$8 sps:$4 sm:$0xff] (!%p1523_p9)   ;;  %v2071_v24 = vld [vmem:[%s2408_s27 + $0x90] ss:$8 sps:$4 sm:$0xff] (!%p1523_p9)   ;;  %v2072_v25 = vld [vmem:[%s2408_s27 + $0x24] ss:$8 sps:$4 sm:$0xff] (!%p1523_p9)  }
  0x79   : > { %s331_s18 = sld [smem:[#allocation4 + %s330_s17]] (!%p1523_p9)  ;;  %v2074_v26 = vld [vmem:[%s2408_s27 + $0xa4] ss:$8 sps:$4 sm:$0xff] (!%p1523_p9)   ;;  %v2076_v27 = vld [vmem:[%s2408_s27 + $0x20] ss:$8 sps:$4 sm:$0xff] (!%p1523_p9)  }
  0x7a   : > { %v2077_v28 = vld [vmem:[%s2408_s27 + $0xa0] ss:$8 sps:$4 sm:$0xff] (!%p1523_p9)   ;;  %v2078_v29 = vld [vmem:[%s2408_s27 + $0x34] ss:$8 sps:$4 sm:$0xff] (!%p1523_p9)   ;;  %v2082_v31 = vld [vmem:[%s2408_s27 + $0x30] ss:$8 sps:$4 sm:$0xff] (!%p1523_p9)  }
  0x7b   : > { %v2080_v30 = vld [vmem:[%s2408_s27 + $0xb4] ss:$8 sps:$4 sm:$0xff] (!%p1523_p9)   ;;  %v2083_v32 = vld [vmem:[%s2408_s27 + $0xb0] ss:$8 sps:$4 sm:$0xff] (!%p1523_p9)   ;;  %v2084_v33 = vld [vmem:[%s2408_s27 + $0x44] ss:$8 sps:$4 sm:$0xff] (!%p1523_p9)  }
  0x7c   : > { %v2086_v34 = vld [vmem:[%s2408_s27 + $0xc4] ss:$8 sps:$4 sm:$0xff] (!%p1523_p9)   ;;  %v2088_v35 = vld [vmem:[%s2408_s27 + $0x40] ss:$8 sps:$4 sm:$0xff] (!%p1523_p9)   ;;  %v2090_v37 = vld [vmem:[%s2408_s27 + $0x54] ss:$8 sps:$4 sm:$0xff] (!%p1523_p9)  }
  0x7d   : > { %v2089_v36 = vld [vmem:[%s2408_s27 + $0xc0] ss:$8 sps:$4 sm:$0xff]   ;;  %v2092_v38 = vld [vmem:[%s2408_s27 + $0xd4] ss:$8 sps:$4 sm:$0xff]   ;;  %v2094_v39 = vld [vmem:[%s2408_s27 + $0x50] ss:$8 sps:$4 sm:$0xff]  }
  0x7e   : > { %v2095_v40 = vld [vmem:[%s2408_s27 + $0xd0] ss:$8 sps:$4 sm:$0xff]   ;;  %v2096_v41 = vld [vmem:[%s2408_s27 + $0x64] ss:$8 sps:$4 sm:$0xff]   ;;  %v2100_v43 = vld [vmem:[%s2408_s27 + $0x60] ss:$8 sps:$4 sm:$0xff]  }
  0x7f   : > { %s1525_s19 = sshll.u32 %s331_s18, 8  ;;  %v2098_v42 = vld [vmem:[%s2408_s27 + $0xe4] ss:$8 sps:$4 sm:$0xff]   ;;  %v2101_v44 = vld [vmem:[%s2408_s27 + $0xe0] ss:$8 sps:$4 sm:$0xff]  }
  0x80   : > { %s397_s21 = sshra.s32 %s1525_s19, 3  ;;  %v2102_v45 = vld [vmem:[%s2408_s27 + $0x74] ss:$8 sps:$4 sm:$0xff]   ;;  %v2106_v47 = vld [vmem:[%s2408_s27 + $0x70] ss:$8 sps:$4 sm:$0xff]   ;;  %v349_v53 = vld [vmem:[#allocation2 + $0x80] sm:$0xff] }
  0x81   : > { %s1526_s23 = sshll.u32 %s397_s21, 2  ;;  %v2104_v46 = vld [vmem:[%s2408_s27 + $0xf4] ss:$8 sps:$4 sm:$0xff]   ;;  %v2107_v48 = vld [vmem:[%s2408_s27 + $0xf0] ss:$8 sps:$4 sm:$0xff]   ;;  %v334_v59 = vld [vmem:[#allocation2 + $0x8] sm:$0xff] }
  0x82   : > { %s2431_s14 = scalar_lea.vmem %s2583_s3, %s1526_s23  ;;  %v350_v61 = vld [vmem:[#allocation2 + $0x88] sm:$0xff] }
  0x83   : > { %v2044_v3 = vld [vmem:[%s2431_s14 + $0x40] sm:$0xff]   ;;  %v2046_v5 = vld [vmem:[%s2431_s14 + $0x48] sm:$0xff]   ;;  %v2048_v7 = vld [vmem:[%s2431_s14 + $0x50] sm:$0xff]  }
  0x84   : > { %v2045_v4 = vld [vmem:[%s2431_s14] sm:$0xff]   ;;  %1747 = vmatprep.subr.bf16.mxu0 %v2044_v3  ;;  %1931 = vmatprep.subr.bf16.mxu1 %v2044_v3  ;;  %v2047_v6 = vld [vmem:[%s2431_s14 + $0x8] sm:$0xff]   ;;  %v2049_v8 = vld [vmem:[%s2431_s14 + $0x10] sm:$0xff]  }
  0x85   : > { %1748 = vmatpush3.bf16.msra.mxu0 %v2045_v4  ;;  %1939 = vmatpush3.bf16.msra.mxu1 %v2045_v4  ;;  %v2050_v9 = vld [vmem:[%s2431_s14 + $0x58] sm:$0xff]   ;;  %v2052_v11 = vld [vmem:[%s2431_s14 + $0x60] sm:$0xff]   ;;  %v2054_v13 = vld [vmem:[%s2431_s14 + $0x68] sm:$0xff]  }
  0x86   : > { %1749 = vmatprep.subr.bf16.mxu0 %v2046_v5  ;;  %1932 = vmatprep.subr.bf16.mxu1 %v2046_v5  ;;  %v2051_v10 = vld [vmem:[%s2431_s14 + $0x18] sm:$0xff]   ;;  %v2053_v12 = vld [vmem:[%s2431_s14 + $0x20] sm:$0xff]   ;;  %v2055_v14 = vld [vmem:[%s2431_s14 + $0x28] sm:$0xff]  }
  0x87   : > { %v2056_v15 = vld [vmem:[%s2431_s14 + $0x70] sm:$0xff]   ;;  %v2058_v17 = vld [vmem:[%s2431_s14 + $0x78] sm:$0xff]  }
  0x88   : > { %v2057_v16 = vld [vmem:[%s2431_s14 + $0x30] sm:$0xff]   ;;  %v2059_v18 = vld [vmem:[%s2431_s14 + $0x38] sm:$0xff]  }
  0x89   : > { %1750 = vmatpush3.bf16.msra.mxu0 %v2047_v6  ;;  %1940 = vmatpush3.bf16.msra.mxu1 %v2047_v6 }
  0x8a   : > { %1751 = vmatprep.subr.bf16.mxu0 %v2048_v7  ;;  %1933 = vmatprep.subr.bf16.mxu1 %v2048_v7  ;;  %v335_v7 = vld [vmem:[#allocation2 + $0x10] sm:$0xff] }
  0x8d   : > { %1752 = vmatpush3.bf16.msra.mxu0 %v2049_v8  ;;  %1941 = vmatpush3.bf16.msra.mxu1 %v2049_v8 }
  0x8e   : > { %1753 = vmatprep.subr.bf16.mxu0 %v2050_v9  ;;  %1934 = vmatprep.subr.bf16.mxu1 %v2050_v9  ;;  %v351_v9 = vld [vmem:[#allocation2 + $0x90] sm:$0xff] }
  0x91   : > { %1754 = vmatpush3.bf16.msra.mxu0 %v2051_v10  ;;  %1942 = vmatpush3.bf16.msra.mxu1 %v2051_v10 }
  0x92   : > { %1755 = vmatprep.subr.bf16.mxu0 %v2052_v11  ;;  %1935 = vmatprep.subr.bf16.mxu1 %v2052_v11 }
  0x95   : > { %1756 = vmatpush3.bf16.msra.mxu0 %v2053_v12  ;;  %1943 = vmatpush3.bf16.msra.mxu1 %v2053_v12 }
  0x96   : > { %1757 = vmatprep.subr.bf16.mxu0 %v2054_v13  ;;  %1936 = vmatprep.subr.bf16.mxu1 %v2054_v13 }
  0x99   : > { %1758 = vmatpush3.bf16.msra.mxu0 %v2055_v14  ;;  %1944 = vmatpush3.bf16.msra.mxu1 %v2055_v14 }
  0x9a   : > { %1759 = vmatprep.subr.bf16.mxu0 %v2056_v15  ;;  %1937 = vmatprep.subr.bf16.mxu1 %v2056_v15  ;;  %v336_v15 = vld [vmem:[#allocation2 + $0x18] sm:$0xff] }
  0x9d   : > { %1760 = vmatpush3.bf16.msra.mxu0 %v2057_v16  ;;  %1945 = vmatpush3.bf16.msra.mxu1 %v2057_v16 }
  0x9e   : > { %1761 = vmatprep.subr.bf16.mxu0 %v2058_v17  ;;  %1938 = vmatprep.subr.bf16.mxu1 %v2058_v17  ;;  %v352_v17 = vld [vmem:[#allocation2 + $0x98] sm:$0xff] }
  0xa1   : > { %1762 = vmatpush3.bf16.msra.mxu0 %v2059_v18  ;;  %1946 = vmatpush3.bf16.msra.mxu1 %v2059_v18 }
  0xa4   : > { %722 = vmatmul.mubr.bf16.vlgmr.msra.gmra.mrb[0].mxu0 %v2060_v19  ;;  %786 = vmatmul.mubr.bf16.vlgmr.msra.gmra.mrb[0].mxu1 %v2063_v20 }
  0xa5   : > { %729 = vmatprep.mubr.bf16.mxu0 %v2066_v21  ;;  %793 = vmatprep.mubr.bf16.mxu1 %v2068_v22 }
  0xac   : > { %730 = vmatmul.mubr.bf16.gmra.mrb[4].mxu0 %v2070_v23  ;;  %794 = vmatmul.mubr.bf16.gmra.mrb[4].mxu1 %v2071_v24 }
  0xad   : > { %737 = vmatprep.mubr.bf16.mxu0 %v2072_v25  ;;  %801 = vmatprep.mubr.bf16.mxu1 %v2074_v26 }
  0xb4   : > { %738 = vmatmul.mubr.bf16.gmra.mrb[8].mxu0 %v2076_v27  ;;  %802 = vmatmul.mubr.bf16.gmra.mrb[8].mxu1 %v2077_v28  ;;  %v337_v27 = vld [vmem:[#allocation2 + $0x20] sm:$0xff] }
  0xb5   : > { %745 = vmatprep.mubr.bf16.mxu0 %v2078_v29  ;;  %809 = vmatprep.mubr.bf16.mxu1 %v2080_v30  ;;  %v353_v29 = vld [vmem:[#allocation2 + $0xa0] sm:$0xff] }
  0xbc   : > { %746 = vmatmul.mubr.bf16.gmra.mrb[12].mxu0 %v2082_v31  ;;  %810 = vmatmul.mubr.bf16.gmra.mrb[12].mxu1 %v2083_v32 }
  0xbd   : > { %753 = vmatprep.mubr.bf16.mxu0 %v2084_v33  ;;  %817 = vmatprep.mubr.bf16.mxu1 %v2086_v34 }
  0xc4   : > { %754 = vmatmul.mubr.bf16.gmra.mrb[16].mxu0 %v2088_v35  ;;  %818 = vmatmul.mubr.bf16.gmra.mrb[16].mxu1 %v2089_v36  ;;  %v338_v35 = vld [vmem:[#allocation2 + $0x28] sm:$0xff] }
  0xc5   : > { %761 = vmatprep.mubr.bf16.mxu0 %v2090_v37  ;;  %825 = vmatprep.mubr.bf16.mxu1 %v2092_v38  ;;  %v354_v37 = vld [vmem:[#allocation2 + $0xa8] sm:$0xff] }
  0xcc   : > { %762 = vmatmul.mubr.bf16.gmra.mrb[20].mxu0 %v2094_v39  ;;  %826 = vmatmul.mubr.bf16.gmra.mrb[20].mxu1 %v2095_v40 }
  0xcd   : > { %769 = vmatprep.mubr.bf16.mxu0 %v2096_v41  ;;  %833 = vmatprep.mubr.bf16.mxu1 %v2098_v42 }
  0xd4   : > { %770 = vmatmul.mubr.bf16.gmra.mrb[24].mxu0 %v2100_v43  ;;  %834 = vmatmul.mubr.bf16.gmra.mrb[24].mxu1 %v2101_v44 }
  0xd5   : > { %777 = vmatprep.mubr.bf16.mxu0 %v2102_v45  ;;  %841 = vmatprep.mubr.bf16.mxu1 %v2104_v46 }
  0xdc   : > { %778 = vmatmul.mubr.bf16.gmra.mrb[28].mxu0 %v2106_v47  ;;  %842 = vmatmul.mubr.bf16.gmra.mrb[28].mxu1 %v2107_v48  ;;  %v339_v47 = vld [vmem:[#allocation2 + $0x30] sm:$0xff] }
 0x177   : > { %v1763_v49 = vpop.f32.mrb[0].mxu0  ;;  %v1811_v50 = vpop.f32.mrb[0].mxu1 }
 0x178   : > { %v1764_v52 = vpop.f32.mrb[1].mxu0  ;;  %v1812_v54 = vpop.f32.mrb[1].mxu1 }
 0x179   : > { %v1765_v55 = vadd.f32 %v1764_v52, %v1763_v49  ;;  %v1813_v56 = vadd.f32 %v1812_v54, %v1811_v50  ;;  %v1766_v57 = vpop.f32.mrb[2].mxu0  ;;  %v1814_v58 = vpop.f32.mrb[2].mxu1  ;;  %v355_v49 = vld [vmem:[#allocation2 + $0xb0] sm:$0xff] }
 0x17a   : > { %v1767_v60 = vpop.f32.mrb[3].mxu0  ;;  %v1815_v62 = vpop.f32.mrb[3].mxu1 }
 0x17b   : > { %v850_v63 = vadd.f32 %v1765_v55, %v333_v51  ;;  %v866_v0 = vadd.f32 %v1813_v56, %v349_v53  ;;  %v1768_v1 = vadd.f32 %v1767_v60, %v1766_v57  ;;  %v1816_v2 = vadd.f32 %v1815_v62, %v1814_v58  ;;  %v340_v55 = vld [vmem:[#allocation2 + $0x38] sm:$0xff] }
 0x17c   : > { %v356_v57 = vld [vmem:[#allocation2 + $0xb8] sm:$0xff] }
 0x17d   : > { %882 = vst [vmem:[#allocation2] sm:$0xff] %v850_v63  ;;  %898 = vst [vmem:[#allocation2 + $0x80] sm:$0xff] %v866_v0  ;;  %v851_v3 = vadd.f32 %v1768_v1, %v334_v59  ;;  %v867_v4 = vadd.f32 %v1816_v2, %v350_v61 }
 0x17f   : > { %883 = vst [vmem:[#allocation2 + $0x8] sm:$0xff] %v851_v3  ;;  %899 = vst [vmem:[#allocation2 + $0x88] sm:$0xff] %v867_v4  ;;  %v1769_v5 = vpop.f32.mrb[4].mxu0  ;;  %v1817_v6 = vpop.f32.mrb[4].mxu1  ;;  %v341_v3 = vld [vmem:[#allocation2 + $0x40] sm:$0xff] }
 0x180   : > { %v1770_v8 = vpop.f32.mrb[5].mxu0  ;;  %v1818_v10 = vpop.f32.mrb[5].mxu1 }
 0x181   : > { %v1771_v11 = vadd.f32 %v1770_v8, %v1769_v5  ;;  %v1819_v12 = vadd.f32 %v1818_v10, %v1817_v6  ;;  %v1772_v13 = vpop.f32.mrb[6].mxu0  ;;  %v1820_v14 = vpop.f32.mrb[6].mxu1  ;;  %v357_v5 = vld [vmem:[#allocation2 + $0xc0] sm:$0xff] }
 0x182   : > { %v1773_v16 = vpop.f32.mrb[7].mxu0  ;;  %v1821_v18 = vpop.f32.mrb[7].mxu1 }
 0x183   : > { %v852_v19 = vadd.f32 %v1771_v11, %v335_v7  ;;  %v868_v20 = vadd.f32 %v1819_v12, %v351_v9  ;;  %v1774_v21 = vadd.f32 %v1773_v16, %v1772_v13  ;;  %v1822_v22 = vadd.f32 %v1821_v18, %v1820_v14  ;;  %v342_v11 = vld [vmem:[#allocation2 + $0x48] sm:$0xff] }
 0x184   : > { %v358_v13 = vld [vmem:[#allocation2 + $0xc8] sm:$0xff] }
 0x185   : > { %884 = vst [vmem:[#allocation2 + $0x10] sm:$0xff] %v852_v19  ;;  %900 = vst [vmem:[#allocation2 + $0x90] sm:$0xff] %v868_v20  ;;  %v853_v23 = vadd.f32 %v1774_v21, %v336_v15  ;;  %v869_v24 = vadd.f32 %v1822_v22, %v352_v17 }
 0x187   : > { %885 = vst [vmem:[#allocation2 + $0x18] sm:$0xff] %v853_v23  ;;  %901 = vst [vmem:[#allocation2 + $0x98] sm:$0xff] %v869_v24  ;;  %v1775_v25 = vpop.f32.mrb[8].mxu0  ;;  %v1823_v26 = vpop.f32.mrb[8].mxu1  ;;  %v343_v23 = vld [vmem:[#allocation2 + $0x50] sm:$0xff] }
 0x188   : > { %v1776_v28 = vpop.f32.mrb[9].mxu0  ;;  %v1824_v30 = vpop.f32.mrb[9].mxu1 }
 0x189   : > { %v1777_v31 = vadd.f32 %v1776_v28, %v1775_v25  ;;  %v1825_v32 = vadd.f32 %v1824_v30, %v1823_v26  ;;  %v1778_v33 = vpop.f32.mrb[10].mxu0  ;;  %v1826_v34 = vpop.f32.mrb[10].mxu1  ;;  %v359_v25 = vld [vmem:[#allocation2 + $0xd0] sm:$0xff] }
 0x18a   : > { %v1779_v36 = vpop.f32.mrb[11].mxu0  ;;  %v1827_v38 = vpop.f32.mrb[11].mxu1 }
 0x18b   : > { %v854_v39 = vadd.f32 %v1777_v31, %v337_v27  ;;  %v870_v40 = vadd.f32 %v1825_v32, %v353_v29  ;;  %v1780_v41 = vadd.f32 %v1779_v36, %v1778_v33  ;;  %v1828_v42 = vadd.f32 %v1827_v38, %v1826_v34  ;;  %v344_v31 = vld [vmem:[#allocation2 + $0x58] sm:$0xff] }
 0x18c   : > { %v360_v33 = vld [vmem:[#allocation2 + $0xd8] sm:$0xff] }
 0x18d   : > { %886 = vst [vmem:[#allocation2 + $0x20] sm:$0xff] %v854_v39  ;;  %902 = vst [vmem:[#allocation2 + $0xa0] sm:$0xff] %v870_v40  ;;  %v855_v43 = vadd.f32 %v1780_v41, %v338_v35  ;;  %v871_v44 = vadd.f32 %v1828_v42, %v354_v37 }
 0x18f   : > { %887 = vst [vmem:[#allocation2 + $0x28] sm:$0xff] %v855_v43  ;;  %903 = vst [vmem:[#allocation2 + $0xa8] sm:$0xff] %v871_v44  ;;  %v1781_v45 = vpop.f32.mrb[12].mxu0  ;;  %v1829_v46 = vpop.f32.mrb[12].mxu1  ;;  %v345_v43 = vld [vmem:[#allocation2 + $0x60] sm:$0xff] }
 0x190   : > { %v1782_v48 = vpop.f32.mrb[13].mxu0  ;;  %v1830_v50 = vpop.f32.mrb[13].mxu1 }
 0x191   : > { %v1783_v51 = vadd.f32 %v1782_v48, %v1781_v45  ;;  %v1831_v52 = vadd.f32 %v1830_v50, %v1829_v46  ;;  %v1784_v53 = vpop.f32.mrb[14].mxu0  ;;  %v1832_v54 = vpop.f32.mrb[14].mxu1  ;;  %v361_v45 = vld [vmem:[#allocation2 + $0xe0] sm:$0xff] }
 0x192   : > { %v1785_v56 = vpop.f32.mrb[15].mxu0  ;;  %v1833_v58 = vpop.f32.mrb[15].mxu1 }
 0x193   : > { %v856_v59 = vadd.f32 %v1783_v51, %v339_v47  ;;  %v872_v60 = vadd.f32 %v1831_v52, %v355_v49  ;;  %v1786_v61 = vadd.f32 %v1785_v56, %v1784_v53  ;;  %v1834_v62 = vadd.f32 %v1833_v58, %v1832_v54  ;;  %v346_v51 = vld [vmem:[#allocation2 + $0x68] sm:$0xff] }
 0x194   : > { %v362_v53 = vld [vmem:[#allocation2 + $0xe8] sm:$0xff] }
 0x195   : > { %888 = vst [vmem:[#allocation2 + $0x30] sm:$0xff] %v856_v59  ;;  %904 = vst [vmem:[#allocation2 + $0xb0] sm:$0xff] %v872_v60  ;;  %v857_v63 = vadd.f32 %v1786_v61, %v340_v55  ;;  %v873_v0 = vadd.f32 %v1834_v62, %v356_v57 }
 0x197   : > { %889 = vst [vmem:[#allocation2 + $0x38] sm:$0xff] %v857_v63  ;;  %905 = vst [vmem:[#allocation2 + $0xb8] sm:$0xff] %v873_v0  ;;  %v1787_v1 = vpop.f32.mrb[16].mxu0  ;;  %v1835_v2 = vpop.f32.mrb[16].mxu1  ;;  %v347_v63 = vld [vmem:[#allocation2 + $0x70] sm:$0xff] }
 0x198   : > { %v1788_v4 = vpop.f32.mrb[17].mxu0  ;;  %v1836_v6 = vpop.f32.mrb[17].mxu1 }
 0x199   : > { %v1789_v7 = vadd.f32 %v1788_v4, %v1787_v1  ;;  %v1837_v8 = vadd.f32 %v1836_v6, %v1835_v2  ;;  %v1790_v9 = vpop.f32.mrb[18].mxu0  ;;  %v1838_v10 = vpop.f32.mrb[18].mxu1  ;;  %v363_v1 = vld [vmem:[#allocation2 + $0xf0] sm:$0xff] }
 0x19a   : > { %v1791_v12 = vpop.f32.mrb[19].mxu0  ;;  %v1839_v14 = vpop.f32.mrb[19].mxu1 }
 0x19b   : > { %v858_v15 = vadd.f32 %v1789_v7, %v341_v3  ;;  %v874_v16 = vadd.f32 %v1837_v8, %v357_v5  ;;  %v1792_v17 = vadd.f32 %v1791_v12, %v1790_v9  ;;  %v1840_v18 = vadd.f32 %v1839_v14, %v1838_v10  ;;  %v348_v7 = vld [vmem:[#allocation2 + $0x78] sm:$0xff] }
 0x19c   : > { %v364_v9 = vld [vmem:[#allocation2 + $0xf8] sm:$0xff] }
 0x19d   : > { %890 = vst [vmem:[#allocation2 + $0x40] sm:$0xff] %v858_v15  ;;  %906 = vst [vmem:[#allocation2 + $0xc0] sm:$0xff] %v874_v16  ;;  %v859_v19 = vadd.f32 %v1792_v17, %v342_v11  ;;  %v875_v20 = vadd.f32 %v1840_v18, %v358_v13 }
 0x19f   : > { %891 = vst [vmem:[#allocation2 + $0x48] sm:$0xff] %v859_v19  ;;  %907 = vst [vmem:[#allocation2 + $0xc8] sm:$0xff] %v875_v20  ;;  %v1793_v21 = vpop.f32.mrb[20].mxu0  ;;  %v1841_v22 = vpop.f32.mrb[20].mxu1 }
 0x1a0   : > { %v1794_v24 = vpop.f32.mrb[21].mxu0  ;;  %v1842_v26 = vpop.f32.mrb[21].mxu1 }
 0x1a1   : > { %v1795_v27 = vadd.f32 %v1794_v24, %v1793_v21  ;;  %v1843_v28 = vadd.f32 %v1842_v26, %v1841_v22  ;;  %v1796_v29 = vpop.f32.mrb[22].mxu0  ;;  %v1844_v30 = vpop.f32.mrb[22].mxu1 }
 0x1a2   : > { %v1797_v32 = vpop.f32.mrb[23].mxu0  ;;  %v1845_v34 = vpop.f32.mrb[23].mxu1 }
 0x1a3   : > { %v860_v35 = vadd.f32 %v1795_v27, %v343_v23  ;;  %v876_v36 = vadd.f32 %v1843_v28, %v359_v25  ;;  %v1798_v37 = vadd.f32 %v1797_v32, %v1796_v29  ;;  %v1846_v38 = vadd.f32 %v1845_v34, %v1844_v30 }
 0x1a5   : > { %892 = vst [vmem:[#allocation2 + $0x50] sm:$0xff] %v860_v35  ;;  %908 = vst [vmem:[#allocation2 + $0xd0] sm:$0xff] %v876_v36  ;;  %v861_v39 = vadd.f32 %v1798_v37, %v344_v31  ;;  %v877_v40 = vadd.f32 %v1846_v38, %v360_v33 }
 0x1a7   : > { %893 = vst [vmem:[#allocation2 + $0x58] sm:$0xff] %v861_v39  ;;  %909 = vst [vmem:[#allocation2 + $0xd8] sm:$0xff] %v877_v40  ;;  %v1799_v41 = vpop.f32.mrb[24].mxu0  ;;  %v1847_v42 = vpop.f32.mrb[24].mxu1 }
 0x1a8   : > { %v1800_v44 = vpop.f32.mrb[25].mxu0  ;;  %v1848_v46 = vpop.f32.mrb[25].mxu1 }
 0x1a9   : > { %v1801_v47 = vadd.f32 %v1800_v44, %v1799_v41  ;;  %v1849_v48 = vadd.f32 %v1848_v46, %v1847_v42  ;;  %v1802_v49 = vpop.f32.mrb[26].mxu0  ;;  %v1850_v50 = vpop.f32.mrb[26].mxu1 }
 0x1aa   : > { %v1803_v52 = vpop.f32.mrb[27].mxu0  ;;  %v1851_v54 = vpop.f32.mrb[27].mxu1 }
 0x1ab   : > { %v862_v55 = vadd.f32 %v1801_v47, %v345_v43  ;;  %v878_v56 = vadd.f32 %v1849_v48, %v361_v45  ;;  %v1804_v57 = vadd.f32 %v1803_v52, %v1802_v49  ;;  %v1852_v58 = vadd.f32 %v1851_v54, %v1850_v50 }
 0x1ad   : > { %894 = vst [vmem:[#allocation2 + $0x60] sm:$0xff] %v862_v55  ;;  %910 = vst [vmem:[#allocation2 + $0xe0] sm:$0xff] %v878_v56  ;;  %v863_v59 = vadd.f32 %v1804_v57, %v346_v51  ;;  %v879_v60 = vadd.f32 %v1852_v58, %v362_v53 }
 0x1af   : > { %895 = vst [vmem:[#allocation2 + $0x68] sm:$0xff] %v863_v59  ;;  %911 = vst [vmem:[#allocation2 + $0xe8] sm:$0xff] %v879_v60  ;;  %v1805_v61 = vpop.f32.mrb[28].mxu0  ;;  %v1853_v62 = vpop.f32.mrb[28].mxu1 }
 0x1b0   : > { %v1806_v0 = vpop.f32.mrb[29].mxu0  ;;  %v1854_v2 = vpop.f32.mrb[29].mxu1 }
 0x1b1   : > { %v1807_v3 = vadd.f32 %v1806_v0, %v1805_v61  ;;  %v1855_v4 = vadd.f32 %v1854_v2, %v1853_v62  ;;  %v1808_v5 = vpop.f32.mrb[30].mxu0  ;;  %v1856_v6 = vpop.f32.mrb[30].mxu1 }
 0x1b2   : > { %v1809_v8 = vpop.f32.mrb[31].mxu0  ;;  %v1857_v10 = vpop.f32.mrb[31].mxu1 }
 0x1b3   : > { %v864_v11 = vadd.f32 %v1807_v3, %v347_v63  ;;  %v880_v12 = vadd.f32 %v1855_v4, %v363_v1  ;;  %v1810_v13 = vadd.f32 %v1809_v8, %v1808_v5  ;;  %v1858_v14 = vadd.f32 %v1857_v10, %v1856_v6 }
 0x1b5   : > { %896 = vst [vmem:[#allocation2 + $0x70] sm:$0xff] %v864_v11  ;;  %912 = vst [vmem:[#allocation2 + $0xf0] sm:$0xff] %v880_v12  ;;  %v865_v15 = vadd.f32 %v1810_v13, %v348_v7  ;;  %v881_v16 = vadd.f32 %v1858_v14, %v364_v9 }
 0x1b7   : > { %897 = vst [vmem:[#allocation2 + $0x78] sm:$0xff] %v865_v15  ;;  %913 = vst [vmem:[#allocation2 + $0xf8] sm:$0xff] %v881_v16 }
 0x1b8 PF: > { %p1575_p13 = scmp.ne.s32.totalorder %s2222_s8, 1 }
 0x1b9   : > { %v2108_v17 = vld [vmem:[%s2585_s5] sm:$0xff] (!%p1575_p13)   ;;  %v2109_v18 = vld [vmem:[%s2585_s5 + $0x8] sm:$0xff] (!%p1575_p13)   ;;  %v2110_v19 = vld [vmem:[%s2585_s5 + $0x10] sm:$0xff] (!%p1575_p13)  }
 0x1ba   : > { %917 = sbr.rel (%p1575_p13) target bundleno = 716 (0x2cc), region = 52  ;;  %1883 = vmatprep.subr.bf16.mxu0 (!%p1575_p13), %v2108_v17  ;;  %1947 = vmatprep.subr.bf16.mxu1 (!%p1575_p13), %v2108_v17  ;;  %v2111_v20 = vld [vmem:[%s2585_s5 + $0x18] sm:$0xff] (!%p1575_p13)   ;;  %v918_v21 = vld [vmem:[#allocation2] sm:$0xff] (!%p1575_p13)  ;;  %v919_v22 = vld [vmem:[#allocation2 + $0x8] sm:$0xff] (!%p1575_p13) }
 0x1bb   : > { %1884 = vmatpush3.bf16.msra.mxu0 (!%p1575_p13), %v2108_v17  ;;  %1955 = vmatpush3.bf16.msra.mxu1 (!%p1575_p13), %v2108_v17  ;;  %v2495_v23 = vld [vmem:[%s2584_s4] ss:$0 sm:$0xff] (!%p1575_p13)  ;;  %v935_v27 = vld [vmem:[#allocation2 + $0x88] sm:$0xff] (!%p1575_p13)  ;;  %v920_v38 = vld [vmem:[#allocation2 + $0x10] sm:$0xff] (!%p1575_p13) }
 0x1bc   : > { %1885 = vmatprep.subr.bf16.mxu0 (!%p1575_p13), %v2109_v18  ;;  %1948 = vmatprep.subr.bf16.mxu1 (!%p1575_p13), %v2109_v18  ;;  %v957_v24 = vadd.f32 (!%p1575_p13), %v2495_v23, %v918_v21  ;;  %v958_v25 = vadd.f32 (!%p1575_p13), %v2495_v23, %v919_v22  ;;  %v934_v26 = vld [vmem:[#allocation2 + $0x80] sm:$0xff] (!%p1575_p13)  ;;  %v974_v29 = vadd.f32 (!%p1575_p13), %v2495_v23, %v935_v27  ;;  %v2113_v37 = vld [vmem:[%s2585_s5 + $0x28] sm:$0xff] (!%p1575_p13)   ;;  %v921_v39 = vld [vmem:[#allocation2 + $0x18] sm:$0xff] (!%p1575_p13) }
 0x1bd   : > { %v973_v28 = vadd.f32 (!%p1575_p13), %v2495_v23, %v934_v26  ;;  %v2112_v32 = vld [vmem:[%s2585_s5 + $0x20] sm:$0xff] (!%p1575_p13)   ;;  %v936_v40 = vld [vmem:[#allocation2 + $0x90] sm:$0xff] (!%p1575_p13)  ;;  %v937_v41 = vld [vmem:[#allocation2 + $0x98] sm:$0xff] (!%p1575_p13)  ;;  %v959_v45 = vadd.f32 (!%p1575_p13), %v2495_v23, %v920_v38  ;;  %v960_v46 = vadd.f32 (!%p1575_p13), %v2495_v23, %v921_v39 }
 0x1be   : > { %v989_v30 = vmax.f32 (!%p1575_p13), %v957_v24, 0.0  ;;  %v990_v31 = vmax.f32 (!%p1575_p13), %v958_v25, 0.0  ;;  %v1006_v34 = vmax.f32 (!%p1575_p13), %v974_v29, 0.0  ;;  %v922_v42 = vld [vmem:[#allocation2 + $0x20] sm:$0xff] (!%p1575_p13)  ;;  %v923_v43 = vld [vmem:[#allocation2 + $0x28] sm:$0xff] (!%p1575_p13)  ;;  %v2114_v44 = vld [vmem:[%s2585_s5 + $0x30] sm:$0xff] (!%p1575_p13)   ;;  %v975_v49 = vadd.f32 (!%p1575_p13), %v2495_v23, %v936_v40 }
 0x1bf   : > { %1886 = vmatpush3.bf16.msra.mxu0 (!%p1575_p13), %v2109_v18  ;;  %1956 = vmatpush3.bf16.msra.mxu1 (!%p1575_p13), %v2109_v18  ;;  %v1005_v33 = vmax.f32 (!%p1575_p13), %v973_v28, 0.0  ;;  %v938_v47 = vld [vmem:[#allocation2 + $0xa0] sm:$0xff] (!%p1575_p13)  ;;  %v939_v48 = vld [vmem:[#allocation2 + $0xa8] sm:$0xff] (!%p1575_p13)  ;;  %v976_v50 = vadd.f32 (!%p1575_p13), %v2495_v23, %v937_v41  ;;  %v961_v51 = vadd.f32 (!%p1575_p13), %v2495_v23, %v922_v42  ;;  %v962_v52 = vadd.f32 (!%p1575_p13), %v2495_v23, %v923_v43  ;;  %v2115_v55 = vld [vmem:[%s2585_s5 + $0x38] sm:$0xff] (!%p1575_p13)  }
 0x1c0   : > { %1887 = vmatprep.subr.bf16.mxu0 (!%p1575_p13), %v2110_v19  ;;  %1949 = vmatprep.subr.bf16.mxu1 (!%p1575_p13), %v2110_v19  ;;  %v1021_v35 = vpack.c.bf16 (!%p1575_p13), %v990_v31, %v989_v30  ;;  %v977_v53 = vadd.f32 (!%p1575_p13), %v2495_v23, %v938_v47  ;;  %v978_v54 = vadd.f32 (!%p1575_p13), %v2495_v23, %v939_v48  ;;  %v991_v56 = vmax.f32 (!%p1575_p13), %v959_v45, 0.0  ;;  %v924_v62 = vld [vmem:[#allocation2 + $0x30] sm:$0xff] (!%p1575_p13)  ;;  %v925_v63 = vld [vmem:[#allocation2 + $0x38] sm:$0xff] (!%p1575_p13)  ;;  %v926_v4 = vld [vmem:[#allocation2 + $0x40] sm:$0xff] (!%p1575_p13) }
 0x1c1   : > { %v1029_v36 = vpack.c.bf16 %v1006_v34, %v1005_v33  ;;  %v992_v57 = vmax.f32 %v960_v46, 0.0  ;;  %v1007_v58 = vmax.f32 %v975_v49, 0.0  ;;  %v1008_v59 = vmax.f32 %v976_v50, 0.0  ;;  %v940_v0 = vld [vmem:[#allocation2 + $0xb0] sm:$0xff]  ;;  %v941_v3 = vld [vmem:[#allocation2 + $0xb8] sm:$0xff]  ;;  %v927_v5 = vld [vmem:[#allocation2 + $0x48] sm:$0xff] }
 0x1c2   : > { %1899 = vmatprep.mubr.bf16.mxu0 %v1021_v35  ;;  %v993_v60 = vmax.f32 %v961_v51, 0.0  ;;  %v994_v61 = vmax.f32 %v962_v52, 0.0  ;;  %v1009_v1 = vmax.f32 %v977_v53, 0.0  ;;  %v1010_v2 = vmax.f32 %v978_v54, 0.0  ;;  %v942_v7 = vld [vmem:[#allocation2 + $0xc0] sm:$0xff]  ;;  %v943_v8 = vld [vmem:[#allocation2 + $0xc8] sm:$0xff] }
 0x1c3   : > { %1888 = vmatpush3.bf16.msra.mxu0 %v2110_v19  ;;  %1957 = vmatpush3.bf16.msra.mxu1 %v2110_v19  ;;  %v1022_v6 = vpack.c.bf16 %v992_v57, %v991_v56  ;;  %v1030_v9 = vpack.c.bf16 %v1008_v59, %v1007_v58  ;;  %v963_v10 = vadd.f32 %v2495_v23, %v924_v62  ;;  %v928_v22 = vld [vmem:[#allocation2 + $0x50] sm:$0xff]  ;;  %v929_v24 = vld [vmem:[#allocation2 + $0x58] sm:$0xff]  ;;  %v930_v33 = vld [vmem:[#allocation2 + $0x60] sm:$0xff] }
 0x1c4   : > { %1889 = vmatprep.subr.bf16.mxu0 %v2111_v20  ;;  %1950 = vmatprep.subr.bf16.mxu1 %v2111_v20  ;;  %v964_v11 = vadd.f32 %v2495_v23, %v925_v63  ;;  %v979_v12 = vadd.f32 %v2495_v23, %v940_v0  ;;  %v1023_v13 = vpack.c.bf16 %v994_v61, %v993_v60  ;;  %v944_v29 = vld [vmem:[#allocation2 + $0xd0] sm:$0xff]  ;;  %v945_v30 = vld [vmem:[#allocation2 + $0xd8] sm:$0xff]  ;;  %v931_v34 = vld [vmem:[#allocation2 + $0x68] sm:$0xff] }
 0x1c5   : > { %1915 = vmatprep.mubr.bf16.mxu1 %v1029_v36  ;;  %v980_v14 = vadd.f32 %v2495_v23, %v941_v3  ;;  %v965_v15 = vadd.f32 %v2495_v23, %v926_v4  ;;  %v966_v16 = vadd.f32 %v2495_v23, %v927_v5  ;;  %v1031_v17 = vpack.c.bf16 %v1010_v2, %v1009_v1  ;;  %v946_v35 = vld [vmem:[#allocation2 + $0xe0] sm:$0xff]  ;;  %v947_v36 = vld [vmem:[#allocation2 + $0xe8] sm:$0xff]  ;;  %v932_v53 = vld [vmem:[#allocation2 + $0x70] sm:$0xff] }
 0x1c6   : > { %v981_v18 = vadd.f32 %v2495_v23, %v942_v7  ;;  %v982_v19 = vadd.f32 %v2495_v23, %v943_v8  ;;  %v996_v21 = vmax.f32 %v964_v11, 0.0  ;;  %v1011_v25 = vmax.f32 %v979_v12, 0.0  ;;  %v933_v54 = vld [vmem:[#allocation2 + $0x78] sm:$0xff]  ;;  %v948_v59 = vld [vmem:[#allocation2 + $0xf0] sm:$0xff] }
 0x1c7   : > { %1890 = vmatpush3.bf16.msra.mxu0 %v2111_v20  ;;  %1958 = vmatpush3.bf16.msra.mxu1 %v2111_v20  ;;  %v995_v20 = vmax.f32 %v963_v10, 0.0  ;;  %v1012_v26 = vmax.f32 %v980_v14, 0.0  ;;  %v997_v27 = vmax.f32 %v965_v15, 0.0  ;;  %v998_v28 = vmax.f32 %v966_v16, 0.0  ;;  %v949_v60 = vld [vmem:[#allocation2 + $0xf8] sm:$0xff] }
 0x1c8   : > { %1891 = vmatprep.subr.bf16.mxu0 %v2112_v32  ;;  %1951 = vmatprep.subr.bf16.mxu1 %v2112_v32  ;;  %v1013_v31 = vmax.f32 %v981_v18, 0.0  ;;  %v968_v38 = vadd.f32 %v2495_v23, %v929_v24  ;;  %v983_v39 = vadd.f32 %v2495_v23, %v944_v29  ;;  %v984_v40 = vadd.f32 %v2495_v23, %v945_v30 }
 0x1c9   : > { %v1024_v41 = vpack.c.bf16 %v996_v21, %v995_v20  ;;  %v1032_v42 = vpack.c.bf16 %v1012_v26, %v1011_v25  ;;  %v1025_v43 = vpack.c.bf16 %v998_v28, %v997_v27  ;;  %v970_v46 = vadd.f32 %v2495_v23, %v931_v34 }
 0x1ca   : > { %v985_v47 = vadd.f32 %v2495_v23, %v946_v35  ;;  %v986_v48 = vadd.f32 %v2495_v23, %v947_v36  ;;  %v1000_v50 = vmax.f32 %v968_v38, 0.0  ;;  %v1015_v51 = vmax.f32 %v983_v39, 0.0 }
 0x1cb   : > { %1892 = vmatpush3.bf16.msra.mxu0 %v2112_v32  ;;  %1959 = vmatpush3.bf16.msra.mxu1 %v2112_v32  ;;  %v1014_v32 = vmax.f32 %v982_v19, 0.0  ;;  %v1016_v52 = vmax.f32 %v984_v40, 0.0  ;;  %v1002_v56 = vmax.f32 %v970_v46, 0.0  ;;  %v971_v63 = vadd.f32 %v2495_v23, %v932_v53 }
 0x1cc   : > { %1893 = vmatprep.subr.bf16.mxu0 %v2113_v37  ;;  %1952 = vmatprep.subr.bf16.mxu1 %v2113_v37  ;;  %v1017_v57 = vmax.f32 %v985_v47, 0.0  ;;  %v1018_v58 = vmax.f32 %v986_v48, 0.0  ;;  %v972_v0 = vadd.f32 %v2495_v23, %v933_v54  ;;  %v987_v1 = vadd.f32 %v2495_v23, %v948_v59 }
 0x1cd   : > { %v1033_v45 = vpack.c.bf16 %v1014_v32, %v1013_v31  ;;  %v1034_v62 = vpack.c.bf16 %v1016_v52, %v1015_v51  ;;  %v988_v2 = vadd.f32 %v2495_v23, %v949_v60  ;;  %v1003_v5 = vmax.f32 %v971_v63, 0.0 }
 0x1ce   : > { %v1035_v4 = vpack.c.bf16 %v1018_v58, %v1017_v57  ;;  %v1019_v7 = vmax.f32 %v987_v1, 0.0 }
 0x1cf   : > { %1894 = vmatpush3.bf16.msra.mxu0 %v2113_v37  ;;  %1960 = vmatpush3.bf16.msra.mxu1 %v2113_v37  ;;  %v967_v37 = vadd.f32 %v2495_v23, %v928_v22  ;;  %v1020_v8 = vmax.f32 %v988_v2, 0.0 }
 0x1d0   : > { %1895 = vmatprep.subr.bf16.mxu0 %v2114_v44  ;;  %1953 = vmatprep.subr.bf16.mxu1 %v2114_v44 }
 0x1d1   : > { %v999_v49 = vmax.f32 %v967_v37, 0.0  ;;  %v1036_v10 = vpack.c.bf16 %v1020_v8, %v1019_v7 }
 0x1d3   : > { %1896 = vmatpush3.bf16.msra.mxu0 %v2114_v44  ;;  %1961 = vmatpush3.bf16.msra.mxu1 %v2114_v44  ;;  %v969_v44 = vadd.f32 %v2495_v23, %v930_v33  ;;  %v1026_v61 = vpack.c.bf16 %v1000_v50, %v999_v49 }
 0x1d4   : > { %1897 = vmatprep.subr.bf16.mxu0 %v2115_v55  ;;  %1954 = vmatprep.subr.bf16.mxu1 %v2115_v55 }
 0x1d7   : > { %1898 = vmatpush3.bf16.msra.mxu0 %v2115_v55  ;;  %1962 = vmatpush3.bf16.msra.mxu1 %v2115_v55  ;;  %v1001_v55 = vmax.f32 %v969_v44, 0.0 }
 0x1d9   : > { %v1027_v3 = vpack.c.bf16 %v1002_v56, %v1001_v55 }
 0x1da   : > { %1900 = vmatmul.mubr.bf16.vlgmr.msra.gmra.mrb[0].mxu0 %v1022_v6  ;;  %1916 = vmatmul.mubr.bf16.vlgmr.msra.gmra.mrb[0].mxu1 %v1030_v9  ;;  %v1004_v6 = vmax.f32 %v972_v0, 0.0 }
 0x1db   : > { %1903 = vmatprep.mubr.bf16.mxu0 %v1023_v13  ;;  %1919 = vmatprep.mubr.bf16.mxu1 %v1031_v17 }
 0x1dc   : > { %v1028_v9 = vpack.c.bf16 %v1004_v6, %v1003_v5 }
 0x1e2   : > { %1904 = vmatmul.mubr.bf16.gmra.mrb[4].mxu0 %v1024_v41  ;;  %1920 = vmatmul.mubr.bf16.gmra.mrb[4].mxu1 %v1032_v42 }
 0x1e3   : > { %1907 = vmatprep.mubr.bf16.mxu0 %v1025_v43  ;;  %1923 = vmatprep.mubr.bf16.mxu1 %v1033_v45 }
 0x1ea   : > { %1908 = vmatmul.mubr.bf16.gmra.mrb[8].mxu0 %v1026_v61  ;;  %1924 = vmatmul.mubr.bf16.gmra.mrb[8].mxu1 %v1034_v62 }
 0x1eb   : > { %1911 = vmatprep.mubr.bf16.mxu0 %v1027_v3  ;;  %1927 = vmatprep.mubr.bf16.mxu1 %v1035_v4 }
 0x1f2   : > { %1912 = vmatmul.mubr.bf16.gmra.mrb[12].mxu0 %v1028_v9  ;;  %1928 = vmatmul.mubr.bf16.gmra.mrb[12].mxu1 %v1036_v10 }
 0x2ad   : > { %v1901_v11 = vpop.f32.mrb[0].mxu0  ;;  %v1917_v23 = vpop.f32.mrb[0].mxu1 }
 0x2ae   : > { %v1135_v12 = vpop.f32.mrb[1].mxu0  ;;  %v1199_v13 = vpop.f32.mrb[1].mxu1 }
 0x2af   : > { %v1902_v14 = vpop.f32.mrb[2].mxu0  ;;  %v1918_v15 = vpop.f32.mrb[2].mxu1 }
 0x2b0   : > { %v1660_v16 = vpack.c.bf16 %v1902_v14, %v1901_v11  ;;  %v1700_v17 = vpack.c.bf16 %v1918_v15, %v1917_v23  ;;  %v1138_v18 = vpop.f32.mrb[3].mxu0  ;;  %v1202_v19 = vpop.f32.mrb[3].mxu1 }
 0x2b1   : > { %v1655_v20 = vpack.c.bf16 %v1138_v18, %v1135_v12  ;;  %v1695_v21 = vpack.c.bf16 %v1202_v19, %v1199_v13 }
 0x2b2   : > { %1732 = vst [vmem:[%s2418_s26 + $0x8] sm:$0xff] %v1660_v16   ;;  %1740 = vst [vmem:[%s2418_s26 + $0x48] sm:$0xff] %v1700_v17  }
 0x2b3   : > { %1656 = vst [vmem:[%s2418_s26] sm:$0xff] %v1655_v20   ;;  %1739 = vst [vmem:[%s2418_s26 + $0x40] sm:$0xff] %v1695_v21  }
 0x2b5   : > { %v1905_v22 = vpop.f32.mrb[4].mxu0  ;;  %v1921_v24 = vpop.f32.mrb[4].mxu1 }
 0x2b6   : > { %v1151_v25 = vpop.f32.mrb[5].mxu0  ;;  %v1215_v26 = vpop.f32.mrb[5].mxu1 }
 0x2b7   : > { %v1906_v27 = vpop.f32.mrb[6].mxu0  ;;  %v1922_v28 = vpop.f32.mrb[6].mxu1 }
 0x2b8   : > { %v1670_v29 = vpack.c.bf16 %v1906_v27, %v1905_v22  ;;  %v1710_v30 = vpack.c.bf16 %v1922_v28, %v1921_v24  ;;  %v1154_v31 = vpop.f32.mrb[7].mxu0  ;;  %v1218_v32 = vpop.f32.mrb[7].mxu1 }
 0x2b9   : > { %v1665_v33 = vpack.c.bf16 %v1154_v31, %v1151_v25  ;;  %v1705_v34 = vpack.c.bf16 %v1218_v32, %v1215_v26 }
 0x2ba   : > { %1734 = vst [vmem:[%s2418_s26 + $0x18] sm:$0xff] %v1670_v29   ;;  %1742 = vst [vmem:[%s2418_s26 + $0x58] sm:$0xff] %v1710_v30  }
 0x2bb   : > { %1733 = vst [vmem:[%s2418_s26 + $0x10] sm:$0xff] %v1665_v33   ;;  %1741 = vst [vmem:[%s2418_s26 + $0x50] sm:$0xff] %v1705_v34  }
 0x2bd   : > { %v1909_v35 = vpop.f32.mrb[8].mxu0  ;;  %v1925_v36 = vpop.f32.mrb[8].mxu1 }
 0x2be   : > { %v1167_v37 = vpop.f32.mrb[9].mxu0  ;;  %v1231_v38 = vpop.f32.mrb[9].mxu1 }
 0x2bf   : > { %v1910_v39 = vpop.f32.mrb[10].mxu0  ;;  %v1926_v40 = vpop.f32.mrb[10].mxu1 }
 0x2c0   : > { %v1680_v41 = vpack.c.bf16 %v1910_v39, %v1909_v35  ;;  %v1720_v42 = vpack.c.bf16 %v1926_v40, %v1925_v36  ;;  %v1170_v43 = vpop.f32.mrb[11].mxu0  ;;  %v1234_v44 = vpop.f32.mrb[11].mxu1 }
 0x2c1   : > { %v1675_v45 = vpack.c.bf16 %v1170_v43, %v1167_v37  ;;  %v1715_v46 = vpack.c.bf16 %v1234_v44, %v1231_v38 }
 0x2c2   : > { %1736 = vst [vmem:[%s2418_s26 + $0x28] sm:$0xff] %v1680_v41   ;;  %1744 = vst [vmem:[%s2418_s26 + $0x68] sm:$0xff] %v1720_v42  }
 0x2c3   : > { %1735 = vst [vmem:[%s2418_s26 + $0x20] sm:$0xff] %v1675_v45   ;;  %1743 = vst [vmem:[%s2418_s26 + $0x60] sm:$0xff] %v1715_v46  }
 0x2c5   : > { %v1913_v47 = vpop.f32.mrb[12].mxu0  ;;  %v1929_v48 = vpop.f32.mrb[12].mxu1 }
 0x2c6   : > { %v1183_v49 = vpop.f32.mrb[13].mxu0  ;;  %v1247_v50 = vpop.f32.mrb[13].mxu1 }
 0x2c7   : > { %v1914_v51 = vpop.f32.mrb[14].mxu0  ;;  %v1930_v52 = vpop.f32.mrb[14].mxu1 }
 0x2c8   : > { %v1690_v53 = vpack.c.bf16 %v1914_v51, %v1913_v47  ;;  %v1730_v54 = vpack.c.bf16 %v1930_v52, %v1929_v48  ;;  %v1186_v55 = vpop.f32.mrb[15].mxu0  ;;  %v1250_v56 = vpop.f32.mrb[15].mxu1 }
 0x2c9   : > { %v1685_v57 = vpack.c.bf16 %v1186_v55, %v1183_v49  ;;  %v1725_v58 = vpack.c.bf16 %v1250_v56, %v1247_v50 }
 0x2ca   : > { %1738 = vst [vmem:[%s2418_s26 + $0x38] sm:$0xff] %v1690_v53   ;;  %1746 = vst [vmem:[%s2418_s26 + $0x78] sm:$0xff] %v1730_v54  }
 0x2cb   : > { %1737 = vst [vmem:[%s2418_s26 + $0x30] sm:$0xff] %v1685_v57   ;;  %1745 = vst [vmem:[%s2418_s26 + $0x70] sm:$0xff] %v1725_v58  }
 0x2cc PF: > { %s29_s12 = sadd.s32 1, %s2238_s12   ;;  %s2595_s27 = sld [smem:[#allocation12_spill]] }
 0x2cd   : > { %p26_p4 = scmp.ge.s32.totalorder %s29_s12, 6   ;;  %s2596_s1 = smov %s2214_s30 }
 0x2ce   : > { %s2597_s30 = smov %s2218_s7  ;;  %s2598_s7 = smov %s2361_s20 }
 0x2cf   : > { %s2599_s8 = smov %s2230_s10  ;;  %s2600_s9 = smov %s2234_s11 }
 0x2d0   : > { %s2601_s10 = smov %s2604_s13  ;;  %28 = sbr.rel (!%p26_p4) target bundleno = 30 (0x1e), region = 89 }
 0x2d2   : > { %s2602_s11 = smov %s2595_s27 }
 0x2d7   :  { %1444 = vsyncpa [#allocation7], 1 }
 0x2d8   :  { %1446 = vsyncpa [#allocation7 + $0x1], 1 }

</bundles_post_ra>
